<compile_context>
chip_gen: v6e
topology: v6e:2x2x1
jax: 0.10.0
libtpu: 0.0.40
codegen_flags: <defaults>
</compile_context>

<pallas_src>
import functools

import jax
import jax.numpy as jnp
from jax import lax
from jax.experimental import pallas as pl
from jax.experimental.pallas import tpu as pltpu


def _round_up(v, m):
    return -(-v // m) * m


def _vmem_cap_bytes():
    """Physical VMEM per TensorCore; conservative 64 MiB (v7x) if unqueryable."""
    try:
        return int(pltpu.get_tpu_info().vmem_capacity_bytes)
    except Exception:  # best-effort hardware query
        return 64 * 2**20


def _pick_row_tile(H, W):
    """Row tile capped at 8/16 so the (TH, W) f32 accumulator stays <= ~8 vregs."""
    prefer = (16, 8) if W <= 512 else (8, 16)
    for th in prefer:
        if H % th == 0:
            return th
    return H  # tiny / odd H: single full-height tile


def _lga_kernel(x_hbm, f_ref, o_ref, xwin, xs_ref, sem, *opt_fc,
                radius, C, W, TH, nh_in):
    K = 2 * radius + 1
    K2 = K * K
    F = 3 * K2
    halo = TH + 2 * radius
    fc_ref = opt_fc[0] if opt_fc else None

    b = pl.program_id(0)
    s = pl.program_id(1)
    h = pl.program_id(2)
    g = s * nh_in + h          # global row-tile index
    slot = h % 2

    def window_copy(gg, which_slot):
        row0 = gg * TH
        if TH % 8 == 0:
            row0 = pl.multiple_of(row0, 8)
        return pltpu.make_async_copy(
            x_hbm.at[b, :, pl.ds(row0, halo), :],
            xwin.at[which_slot],
            sem.at[which_slot],
        )

    # Prime the double buffer at the first row tile of this (batch, split).
    @pl.when(h == 0)
    def _():
        window_copy(g, slot).start()

    # Prefetch the next row tile so its HBM->VMEM DMA overlaps this compute.
    @pl.when(h + 1 < nh_in)
    def _():
        window_copy(g + 1, 1 - slot).start()

    window_copy(g, slot).wait()

    # ---- Phase 1: hoist every cast / lane shift out of the tap loops. ----
    # (a) pre-cast filter planes once per tile (only when not already f32).
    if fc_ref is not None:
        for t in range(F):
            fc_ref[t] = f_ref[t].astype(jnp.float32)
    fsrc = fc_ref if fc_ref is not None else f_ref

    # (b) channel-padded, f32, lane-shifted copies of the halo window.
    xw = xwin.at[slot]
    zero_plane = jnp.zeros((K, halo, W), jnp.float32)
    xs_ref[0] = zero_plane          # virtual channel c = -1
    xs_ref[C + 1] = zero_plane      # virtual channel c = C
    for j in range(K):
        for cc in range(C):
            xs_ref[1 + cc, j] = xw[cc, :, j:j + W].astype(jnp.float32)

    # ---- Phase 2: per output channel, pure mul+add over the 3*K*K taps. ----
    def channel_body(c, carry):
        acc = jnp.zeros((TH, W), jnp.float32)
        for j in range(K):
            x3 = xs_ref[pl.ds(c, 3), j]    # (3, halo, W): channels c-1, c, c+1
            xm, xc, xp = x3[0], x3[1], x3[2]
            for i in range(K):
                tap = i * K + j
                acc = acc + fsrc[tap] * xm[i:i + TH]
                acc = acc + fsrc[K2 + tap] * xc[i:i + TH]
                acc = acc + fsrc[2 * K2 + tap] * xp[i:i + TH]
        o_ref[pl.ds(c, 1)] = acc[None].astype(o_ref.dtype)
        return carry

    lax.fori_loop(0, C, channel_body, 0)


def lga(x, filters, radius=2, row_tile=None):
    """x: (N, C, H, W); filters: (N, 3*(2r+1)^2, H, W). Returns (N, C, H, W)."""
    N, C, H, W = x.shape
    K = 2 * radius + 1
    F = 3 * K * K
    assert filters.shape == (N, F, H, W), filters.shape
    r = radius

    TH = row_tile if row_tile is not None else _pick_row_tile(H, W)
    assert H % TH == 0, (H, TH)
    nh = H // TH
    n_par = 2 if (nh % 2 == 0 and nh >= 4) else 1   # 2nd-TC row split (v7x)
    nh_in = nh // n_par
    halo = TH + 2 * r

    # Spatial zero pad; last dim padded up to a lane multiple so the halo DMAs
    # and lane shifts are 128-aligned.  Channel padding is done in VMEM.
    W_body = W + 2 * r
    W_al = _round_up(W_body, 128)
    xpad = jnp.pad(x, ((0, 0), (0, 0), (r, r), (r, W_al - W - r)))

    need_fc = filters.dtype != jnp.float32

    # VMEM budget with layout padding (sublane -> 8, lane -> 128).
    x_isz = jnp.dtype(x.dtype).itemsize
    f_isz = jnp.dtype(filters.dtype).itemsize
    halo_p = _round_up(halo, 8)
    th_p = _round_up(TH, 8)
    w_p = _round_up(W, 128)
    est = (2 * C * halo_p * W_al * x_isz        # halo window double buffer
           + (C + 2) * K * halo_p * w_p * 4     # f32 shifted / channel-padded copies
           + 2 * F * th_p * w_p * f_isz         # pipelined filter tiles
           + 2 * C * th_p * w_p * x_isz)        # pipelined output tiles
    if need_fc:
        est += F * th_p * w_p * 4               # pre-cast f32 filter scratch
    cap = _vmem_cap_bytes()
    vmem_limit = int(min(cap * 3 // 4, max(32 * 2**20, est + est // 4)))

    scratch = [
        pltpu.VMEM((2, C, halo, W_al), x.dtype),        # halo windows (double buffer)
        pltpu.VMEM((C + 2, K, halo, W), jnp.float32),   # shifted, channel-padded, f32
        pltpu.SemaphoreType.DMA((2,)),
    ]
    if need_fc:
        scratch.append(pltpu.VMEM((F, TH, W), jnp.float32))

    kernel = functools.partial(_lga_kernel, radius=radius, C=C, W=W, TH=TH,
                               nh_in=nh_in)
    return pl.pallas_call(
        kernel,
        out_shape=jax.ShapeDtypeStruct((N, C, H, W), x.dtype),
        grid=(N, n_par, nh_in),
        in_specs=[
            pl.BlockSpec(memory_space=pl.ANY),                # xpad stays in HBM
            pl.BlockSpec((None, F, TH, W),
                         lambda b, s, h: (b, 0, s * nh_in + h, 0)),
        ],
        out_specs=pl.BlockSpec((None, C, TH, W),
                               lambda b, s, h: (b, 0, s * nh_in + h, 0)),
        scratch_shapes=scratch,
        compiler_params=pltpu.CompilerParams(
            dimension_semantics=("parallel", "parallel", "arbitrary"),
            vmem_limit_bytes=vmem_limit,
        ),
    )(xpad, filters)


def lga_ref(x, filters, radius=2):
    """Pure-JAX reference of the same LGA semantics (for verification)."""
    N, C, H, W = x.shape
    K = 2 * radius + 1
    K2 = K * K
    xpad = jnp.pad(x, ((0, 0), (1, 1), (radius, radius), (radius, radius)))
    out = jnp.zeros((N, C, H, W), jnp.float32)
    f = filters.astype(jnp.float32)
    for i in range(K):
        for j in range(K):
            fidx = i * K + j
            win = xpad[:, :, i:i + H, j:j + W].astype(jnp.float32)
            out = out + f[:, fidx][:, None] * win[:, 0:C]
            out = out + f[:, K2 + fidx][:, None] * win[:, 1:C + 1]
            out = out + f[:, 2 * K2 + fidx][:, None] * win[:, 2:C + 2]
    return out.astype(x.dtype)


if __name__ == "__main__":
    radius = 2
    K = 2 * radius + 1
    N, C, H, W = 2, 4, 16, 16

    key = jax.random.PRNGKey(0)
    k1, k2, k3, k4 = jax.random.split(key, 4)
    input1 = jax.random.normal(k1, (N, C, H, W), dtype=jnp.float32)          # cost volume
    input2 = jax.random.normal(k2, (N, 3 * K * K, H, W), dtype=jnp.float32)  # guidance filters

    ref = lga_ref(input1, input2, radius)
    out = jax.block_until_ready(lga(input1, input2, radius))
    assert out.shape == (N, C, H, W)
    assert jnp.allclose(out, ref, atol=1e-4, rtol=1e-4), "Pallas LGA mismatch vs reference"

    # bf16 filters in HBM (primary v5e traffic lever); f32 accumulation
    # in-kernel, exercising the pre-cast f32 filter scratch path.
    f_bf16 = input2.astype(jnp.bfloat16)
    out_bf = jax.block_until_ready(lga(input1, f_bf16, radius))
    ref_bf = lga_ref(input1, f_bf16, radius)
    assert jnp.allclose(out_bf, ref_bf, atol=1e-3, rtol=1e-3), "bf16-filter Pallas LGA mismatch"

    # Taller input: multi-row-tile path (halo DMA double-buffer / prefetch).
    C2, H2 = 3, 32
    x2 = jax.random.normal(k3, (1, C2, H2, W), dtype=jnp.float32)
    f2 = jax.random.normal(k4, (1, 3 * K * K, H2, W), dtype=jnp.float32)
    ref2 = lga_ref(x2, f2, radius)
    out2 = jax.block_until_ready(lga(x2, f2, radius))
    assert jnp.allclose(out2, ref2, atol=1e-4, rtol=1e-4), "Tiled Pallas LGA mismatch"

    # Force TH=8 so nh=4 -> 2-way parallel row split (v7x second-TC path).
    out2s = jax.block_until_ready(lga(x2, f2, radius, row_tile=8))
    assert jnp.allclose(out2s, ref2, atol=1e-4, rtol=1e-4), "Row-split Pallas LGA mismatch"

    print("KERNEL_OK")
</pallas_src>

<mosaic_0001>
module attributes {stable_mosaic.version = 11 : i64} {
  func.func @_lga_kernel(%arg0: i32, %arg1: i32, %arg2: i32, %arg3: memref<2x4x20x128xf32, #tpu.memory_space<any>>, %arg4: memref<1x75x16x16xf32, #tpu.memory_space<vmem>>, %arg5: memref<1x4x16x16xf32, #tpu.memory_space<vmem>>, %arg6: memref<2x4x20x128xf32, #tpu.memory_space<vmem>>, %arg7: memref<6x5x20x16xf32, #tpu.memory_space<vmem>>, %arg8: memref<2x!tpu.dma_semaphore, #tpu.memory_space<semaphore_mem>>) attributes {dimension_semantics = [#tpu.dimension_semantics<parallel>, #tpu.dimension_semantics<parallel>, #tpu.dimension_semantics<arbitrary>], iteration_bounds = array<i64: 2, 1, 1>, scalar_prefetch = 0 : i64, scratch_operands = 3 : i64, tpu.core_type = #tpu.core_type<tc>, window_params = [{}, {transform_indices = @transform_1, window_bounds = array<i64: 1, 75, 16, 16>}, {transform_indices = @transform_2, window_bounds = array<i64: 1, 4, 16, 16>}]} {
    %c1_i32 = arith.constant 1 : i32
    %0 = arith.muli %arg1, %c1_i32 : i32
    %1 = arith.addi %0, %arg2 : i32
    %c2_i32 = arith.constant 2 : i32
    %c0_i32 = arith.constant 0 : i32
    %2 = arith.cmpi eq, %c2_i32, %c0_i32 : i32
    %c1_i32_0 = arith.constant 1 : i32
    %3 = arith.select %2, %c1_i32_0, %c2_i32 : i32
    %4 = arith.remsi %arg2, %3 : i32
    %c0_i32_1 = arith.constant 0 : i32
    %5 = arith.cmpi ne, %4, %c0_i32_1 : i32
    %c0_i32_2 = arith.constant 0 : i32
    %6 = arith.cmpi slt, %4, %c0_i32_2 : i32
    %c0_i32_3 = arith.constant 0 : i32
    %7 = arith.cmpi slt, %3, %c0_i32_3 : i32
    %8 = arith.xori %6, %7 : i1
    %9 = arith.andi %8, %5 : i1
    %10 = arith.addi %4, %3 : i32
    %11 = arith.select %9, %10, %4 : i32
    %c0_i32_4 = arith.constant 0 : i32
    %12 = arith.cmpi eq, %arg2, %c0_i32_4 : i32
    %13 = arith.extui %12 : i1 to i32
    %c0_i32_5 = arith.constant 0 : i32
    %14 = arith.cmpi ne, %13, %c0_i32_5 : i32
    scf.if %14 {
      %c16_i32_219 = arith.constant 16 : i32
      %175 = arith.muli %1, %c16_i32_219 : i32
      %176 = tpu.assume_multiple %175, 8 : i32
      %c0_i32_220 = arith.constant 0 : i32
      %c0_i32_221 = arith.constant 0 : i32
      %177 = tpu.memref_slice %arg3[%arg0, %c0_i32_220, %176, %c0_i32_221] : memref<2x4x20x128xf32, #tpu.memory_space<any>> -> memref<1x4x20x128xf32, #tpu.memory_space<any>>
      %178 = tpu.memref_squeeze %177 : memref<1x4x20x128xf32, #tpu.memory_space<any>> -> memref<4x20x128xf32, #tpu.memory_space<any>>
      %c0_i32_222 = arith.constant 0 : i32
      %c0_i32_223 = arith.constant 0 : i32
      %c0_i32_224 = arith.constant 0 : i32
      %179 = tpu.memref_slice %arg6[%11, %c0_i32_222, %c0_i32_223, %c0_i32_224] : memref<2x4x20x128xf32, #tpu.memory_space<vmem>> -> memref<1x4x20x128xf32, #tpu.memory_space<vmem>>
      %180 = tpu.memref_squeeze %179 : memref<1x4x20x128xf32, #tpu.memory_space<vmem>> -> memref<4x20x128xf32, #tpu.memory_space<vmem>>
      %181 = tpu.memref_slice %arg8[%11] : memref<2x!tpu.dma_semaphore, #tpu.memory_space<semaphore_mem>> -> memref<1x!tpu.dma_semaphore, #tpu.memory_space<semaphore_mem>>
      %182 = tpu.memref_squeeze %181 : memref<1x!tpu.dma_semaphore, #tpu.memory_space<semaphore_mem>> -> memref<!tpu.dma_semaphore, #tpu.memory_space<semaphore_mem>>
      tpu.enqueue_dma source(%178 : memref<4x20x128xf32, #tpu.memory_space<any>>) target(%180 : memref<4x20x128xf32, #tpu.memory_space<vmem>>) target_semaphore(%182 : memref<!tpu.dma_semaphore, #tpu.memory_space<semaphore_mem>>)
    } else {
    }
    %c1_i32_6 = arith.constant 1 : i32
    %15 = arith.addi %arg2, %c1_i32_6 : i32
    %c1_i32_7 = arith.constant 1 : i32
    %16 = arith.cmpi slt, %15, %c1_i32_7 : i32
    %17 = arith.extui %16 : i1 to i32
    %c0_i32_8 = arith.constant 0 : i32
    %18 = arith.cmpi ne, %17, %c0_i32_8 : i32
    scf.if %18 {
      %c1_i32_219 = arith.constant 1 : i32
      %175 = arith.addi %1, %c1_i32_219 : i32
      %c1_i32_220 = arith.constant 1 : i32
      %176 = arith.subi %c1_i32_220, %11 : i32
      %c16_i32_221 = arith.constant 16 : i32
      %177 = arith.muli %175, %c16_i32_221 : i32
      %178 = tpu.assume_multiple %177, 8 : i32
      %c0_i32_222 = arith.constant 0 : i32
      %c0_i32_223 = arith.constant 0 : i32
      %179 = tpu.memref_slice %arg3[%arg0, %c0_i32_222, %178, %c0_i32_223] : memref<2x4x20x128xf32, #tpu.memory_space<any>> -> memref<1x4x20x128xf32, #tpu.memory_space<any>>
      %180 = tpu.memref_squeeze %179 : memref<1x4x20x128xf32, #tpu.memory_space<any>> -> memref<4x20x128xf32, #tpu.memory_space<any>>
      %c0_i32_224 = arith.constant 0 : i32
      %c0_i32_225 = arith.constant 0 : i32
      %c0_i32_226 = arith.constant 0 : i32
      %181 = tpu.memref_slice %arg6[%176, %c0_i32_224, %c0_i32_225, %c0_i32_226] : memref<2x4x20x128xf32, #tpu.memory_space<vmem>> -> memref<1x4x20x128xf32, #tpu.memory_space<vmem>>
      %182 = tpu.memref_squeeze %181 : memref<1x4x20x128xf32, #tpu.memory_space<vmem>> -> memref<4x20x128xf32, #tpu.memory_space<vmem>>
      %183 = tpu.memref_slice %arg8[%176] : memref<2x!tpu.dma_semaphore, #tpu.memory_space<semaphore_mem>> -> memref<1x!tpu.dma_semaphore, #tpu.memory_space<semaphore_mem>>
      %184 = tpu.memref_squeeze %183 : memref<1x!tpu.dma_semaphore, #tpu.memory_space<semaphore_mem>> -> memref<!tpu.dma_semaphore, #tpu.memory_space<semaphore_mem>>
      tpu.enqueue_dma source(%180 : memref<4x20x128xf32, #tpu.memory_space<any>>) target(%182 : memref<4x20x128xf32, #tpu.memory_space<vmem>>) target_semaphore(%184 : memref<!tpu.dma_semaphore, #tpu.memory_space<semaphore_mem>>)
    } else {
    }
    %c16_i32 = arith.constant 16 : i32
    %19 = arith.muli %1, %c16_i32 : i32
    %20 = tpu.assume_multiple %19, 8 : i32
    %c0_i32_9 = arith.constant 0 : i32
    %c0_i32_10 = arith.constant 0 : i32
    %21 = tpu.memref_slice %arg3[%arg0, %c0_i32_9, %20, %c0_i32_10] : memref<2x4x20x128xf32, #tpu.memory_space<any>> -> memref<1x4x20x128xf32, #tpu.memory_space<any>>
    %22 = tpu.memref_squeeze %21 : memref<1x4x20x128xf32, #tpu.memory_space<any>> -> memref<4x20x128xf32, #tpu.memory_space<any>>
    %c0_i32_11 = arith.constant 0 : i32
    %c0_i32_12 = arith.constant 0 : i32
    %c0_i32_13 = arith.constant 0 : i32
    %23 = tpu.memref_slice %arg6[%11, %c0_i32_11, %c0_i32_12, %c0_i32_13] : memref<2x4x20x128xf32, #tpu.memory_space<vmem>> -> memref<1x4x20x128xf32, #tpu.memory_space<vmem>>
    %24 = tpu.memref_squeeze %23 : memref<1x4x20x128xf32, #tpu.memory_space<vmem>> -> memref<4x20x128xf32, #tpu.memory_space<vmem>>
    %25 = tpu.memref_slice %arg8[%11] : memref<2x!tpu.dma_semaphore, #tpu.memory_space<semaphore_mem>> -> memref<1x!tpu.dma_semaphore, #tpu.memory_space<semaphore_mem>>
    %26 = tpu.memref_squeeze %25 : memref<1x!tpu.dma_semaphore, #tpu.memory_space<semaphore_mem>> -> memref<!tpu.dma_semaphore, #tpu.memory_space<semaphore_mem>>
    tpu.wait_dma2 semaphore(%26 : memref<!tpu.dma_semaphore, #tpu.memory_space<semaphore_mem>>) src(%22 : memref<4x20x128xf32, #tpu.memory_space<any>>) dst(%24 : memref<4x20x128xf32, #tpu.memory_space<vmem>>)
    %cst = arith.constant 0.000000e+00 : f32
    %27 = vector.broadcast %cst : f32 to vector<5x20x16xf32>
    %c0 = arith.constant 0 : index
    %c0_14 = arith.constant 0 : index
    %c0_15 = arith.constant 0 : index
    %c0_16 = arith.constant 0 : index
    %28 = vector.load %arg7[%c0, %c0_14, %c0_15, %c0_16] : memref<6x5x20x16xf32, #tpu.memory_space<vmem>>, vector<1x5x20x16xf32>
    %29 = vector.shape_cast %28 : vector<1x5x20x16xf32> to vector<5x20x16xf32>
    %30 = vector.shape_cast %27 : vector<5x20x16xf32> to vector<1x5x20x16xf32>
    tpu.vector_store %arg7[%c0, %c0_14, %c0_15, %c0_16], %30 {strides = array<i32>} : memref<6x5x20x16xf32, #tpu.memory_space<vmem>>, vector<1x5x20x16xf32>,
    %c5 = arith.constant 5 : index
    %c0_17 = arith.constant 0 : index
    %c0_18 = arith.constant 0 : index
    %c0_19 = arith.constant 0 : index
    %31 = vector.load %arg7[%c5, %c0_17, %c0_18, %c0_19] : memref<6x5x20x16xf32, #tpu.memory_space<vmem>>, vector<1x5x20x16xf32>
    %32 = vector.shape_cast %31 : vector<1x5x20x16xf32> to vector<5x20x16xf32>
    %33 = vector.shape_cast %27 : vector<5x20x16xf32> to vector<1x5x20x16xf32>
    tpu.vector_store %arg7[%c5, %c0_17, %c0_18, %c0_19], %33 {strides = array<i32>} : memref<6x5x20x16xf32, #tpu.memory_space<vmem>>, vector<1x5x20x16xf32>,
    %c0_i32_20 = arith.constant 0 : i32
    %c0_i32_21 = arith.constant 0 : i32
    %c0_i32_22 = arith.constant 0 : i32
    %34 = tpu.memref_slice %arg6[%11, %c0_i32_20, %c0_i32_21, %c0_i32_22] : memref<2x4x20x128xf32, #tpu.memory_space<vmem>> -> memref<1x4x20x128xf32, #tpu.memory_space<vmem>>
    %35 = tpu.memref_squeeze %34 : memref<1x4x20x128xf32, #tpu.memory_space<vmem>> -> memref<4x20x128xf32, #tpu.memory_space<vmem>>
    %c0_23 = arith.constant 0 : index
    %c0_24 = arith.constant 0 : index
    %c0_25 = arith.constant 0 : index
    %36 = vector.load %35[%c0_23, %c0_24, %c0_25] : memref<4x20x128xf32, #tpu.memory_space<vmem>>, vector<1x20x16xf32>
    %37 = vector.shape_cast %36 : vector<1x20x16xf32> to vector<20x16xf32>
    %c1 = arith.constant 1 : index
    %c0_26 = arith.constant 0 : index
    %c0_27 = arith.constant 0 : index
    %c0_28 = arith.constant 0 : index
    %38 = vector.load %arg7[%c1, %c0_26, %c0_27, %c0_28] : memref<6x5x20x16xf32, #tpu.memory_space<vmem>>, vector<1x1x20x16xf32>
    %39 = vector.shape_cast %38 : vector<1x1x20x16xf32> to vector<20x16xf32>
    %40 = vector.shape_cast %37 : vector<20x16xf32> to vector<1x1x20x16xf32>
    tpu.vector_store %arg7[%c1, %c0_26, %c0_27, %c0_28], %40 {strides = array<i32>} : memref<6x5x20x16xf32, #tpu.memory_space<vmem>>, vector<1x1x20x16xf32>,
    %c0_i32_29 = arith.constant 0 : i32
    %c0_i32_30 = arith.constant 0 : i32
    %c0_i32_31 = arith.constant 0 : i32
    %41 = tpu.memref_slice %arg6[%11, %c0_i32_29, %c0_i32_30, %c0_i32_31] : memref<2x4x20x128xf32, #tpu.memory_space<vmem>> -> memref<1x4x20x128xf32, #tpu.memory_space<vmem>>
    %42 = tpu.memref_squeeze %41 : memref<1x4x20x128xf32, #tpu.memory_space<vmem>> -> memref<4x20x128xf32, #tpu.memory_space<vmem>>
    %c1_32 = arith.constant 1 : index
    %c0_33 = arith.constant 0 : index
    %c0_34 = arith.constant 0 : index
    %43 = vector.load %42[%c1_32, %c0_33, %c0_34] : memref<4x20x128xf32, #tpu.memory_space<vmem>>, vector<1x20x16xf32>
    %44 = vector.shape_cast %43 : vector<1x20x16xf32> to vector<20x16xf32>
    %c2 = arith.constant 2 : index
    %c0_35 = arith.constant 0 : index
    %c0_36 = arith.constant 0 : index
    %c0_37 = arith.constant 0 : index
    %45 = vector.load %arg7[%c2, %c0_35, %c0_36, %c0_37] : memref<6x5x20x16xf32, #tpu.memory_space<vmem>>, vector<1x1x20x16xf32>
    %46 = vector.shape_cast %45 : vector<1x1x20x16xf32> to vector<20x16xf32>
    %47 = vector.shape_cast %44 : vector<20x16xf32> to vector<1x1x20x16xf32>
    tpu.vector_store %arg7[%c2, %c0_35, %c0_36, %c0_37], %47 {strides = array<i32>} : memref<6x5x20x16xf32, #tpu.memory_space<vmem>>, vector<1x1x20x16xf32>,
    %c0_i32_38 = arith.constant 0 : i32
    %c0_i32_39 = arith.constant 0 : i32
    %c0_i32_40 = arith.constant 0 : i32
    %48 = tpu.memref_slice %arg6[%11, %c0_i32_38, %c0_i32_39, %c0_i32_40] : memref<2x4x20x128xf32, #tpu.memory_space<vmem>> -> memref<1x4x20x128xf32, #tpu.memory_space<vmem>>
    %49 = tpu.memref_squeeze %48 : memref<1x4x20x128xf32, #tpu.memory_space<vmem>> -> memref<4x20x128xf32, #tpu.memory_space<vmem>>
    %c2_41 = arith.constant 2 : index
    %c0_42 = arith.constant 0 : index
    %c0_43 = arith.constant 0 : index
    %50 = vector.load %49[%c2_41, %c0_42, %c0_43] : memref<4x20x128xf32, #tpu.memory_space<vmem>>, vector<1x20x16xf32>
    %51 = vector.shape_cast %50 : vector<1x20x16xf32> to vector<20x16xf32>
    %c3 = arith.constant 3 : index
    %c0_44 = arith.constant 0 : index
    %c0_45 = arith.constant 0 : index
    %c0_46 = arith.constant 0 : index
    %52 = vector.load %arg7[%c3, %c0_44, %c0_45, %c0_46] : memref<6x5x20x16xf32, #tpu.memory_space<vmem>>, vector<1x1x20x16xf32>
    %53 = vector.shape_cast %52 : vector<1x1x20x16xf32> to vector<20x16xf32>
    %54 = vector.shape_cast %51 : vector<20x16xf32> to vector<1x1x20x16xf32>
    tpu.vector_store %arg7[%c3, %c0_44, %c0_45, %c0_46], %54 {strides = array<i32>} : memref<6x5x20x16xf32, #tpu.memory_space<vmem>>, vector<1x1x20x16xf32>,
    %c0_i32_47 = arith.constant 0 : i32
    %c0_i32_48 = arith.constant 0 : i32
    %c0_i32_49 = arith.constant 0 : i32
    %55 = tpu.memref_slice %arg6[%11, %c0_i32_47, %c0_i32_48, %c0_i32_49] : memref<2x4x20x128xf32, #tpu.memory_space<vmem>> -> memref<1x4x20x128xf32, #tpu.memory_space<vmem>>
    %56 = tpu.memref_squeeze %55 : memref<1x4x20x128xf32, #tpu.memory_space<vmem>> -> memref<4x20x128xf32, #tpu.memory_space<vmem>>
    %c3_50 = arith.constant 3 : index
    %c0_51 = arith.constant 0 : index
    %c0_52 = arith.constant 0 : index
    %57 = vector.load %56[%c3_50, %c0_51, %c0_52] : memref<4x20x128xf32, #tpu.memory_space<vmem>>, vector<1x20x16xf32>
    %58 = vector.shape_cast %57 : vector<1x20x16xf32> to vector<20x16xf32>
    %c4 = arith.constant 4 : index
    %c0_53 = arith.constant 0 : index
    %c0_54 = arith.constant 0 : index
    %c0_55 = arith.constant 0 : index
    %59 = vector.load %arg7[%c4, %c0_53, %c0_54, %c0_55] : memref<6x5x20x16xf32, #tpu.memory_space<vmem>>, vector<1x1x20x16xf32>
    %60 = vector.shape_cast %59 : vector<1x1x20x16xf32> to vector<20x16xf32>
    %61 = vector.shape_cast %58 : vector<20x16xf32> to vector<1x1x20x16xf32>
    tpu.vector_store %arg7[%c4, %c0_53, %c0_54, %c0_55], %61 {strides = array<i32>} : memref<6x5x20x16xf32, #tpu.memory_space<vmem>>, vector<1x1x20x16xf32>,
    %c0_i32_56 = arith.constant 0 : i32
    %c0_i32_57 = arith.constant 0 : i32
    %c0_i32_58 = arith.constant 0 : i32
    %62 = tpu.memref_slice %arg6[%11, %c0_i32_56, %c0_i32_57, %c0_i32_58] : memref<2x4x20x128xf32, #tpu.memory_space<vmem>> -> memref<1x4x20x128xf32, #tpu.memory_space<vmem>>
    %63 = tpu.memref_squeeze %62 : memref<1x4x20x128xf32, #tpu.memory_space<vmem>> -> memref<4x20x128xf32, #tpu.memory_space<vmem>>
    %c0_59 = arith.constant 0 : index
    %c0_60 = arith.constant 0 : index
    %c1_61 = arith.constant 1 : index
    %64 = vector.load %63[%c0_59, %c0_60, %c1_61] : memref<4x20x128xf32, #tpu.memory_space<vmem>>, vector<1x20x16xf32>
    %65 = vector.shape_cast %64 : vector<1x20x16xf32> to vector<20x16xf32>
    %c1_62 = arith.constant 1 : index
    %c1_63 = arith.constant 1 : index
    %c0_64 = arith.constant 0 : index
    %c0_65 = arith.constant 0 : index
    %66 = vector.load %arg7[%c1_62, %c1_63, %c0_64, %c0_65] : memref<6x5x20x16xf32, #tpu.memory_space<vmem>>, vector<1x1x20x16xf32>
    %67 = vector.shape_cast %66 : vector<1x1x20x16xf32> to vector<20x16xf32>
    %68 = vector.shape_cast %65 : vector<20x16xf32> to vector<1x1x20x16xf32>
    tpu.vector_store %arg7[%c1_62, %c1_63, %c0_64, %c0_65], %68 {strides = array<i32>} : memref<6x5x20x16xf32, #tpu.memory_space<vmem>>, vector<1x1x20x16xf32>,
    %c0_i32_66 = arith.constant 0 : i32
    %c0_i32_67 = arith.constant 0 : i32
    %c0_i32_68 = arith.constant 0 : i32
    %69 = tpu.memref_slice %arg6[%11, %c0_i32_66, %c0_i32_67, %c0_i32_68] : memref<2x4x20x128xf32, #tpu.memory_space<vmem>> -> memref<1x4x20x128xf32, #tpu.memory_space<vmem>>
    %70 = tpu.memref_squeeze %69 : memref<1x4x20x128xf32, #tpu.memory_space<vmem>> -> memref<4x20x128xf32, #tpu.memory_space<vmem>>
    %c1_69 = arith.constant 1 : index
    %c0_70 = arith.constant 0 : index
    %c1_71 = arith.constant 1 : index
    %71 = vector.load %70[%c1_69, %c0_70, %c1_71] : memref<4x20x128xf32, #tpu.memory_space<vmem>>, vector<1x20x16xf32>
    %72 = vector.shape_cast %71 : vector<1x20x16xf32> to vector<20x16xf32>
    %c2_72 = arith.constant 2 : index
    %c1_73 = arith.constant 1 : index
    %c0_74 = arith.constant 0 : index
    %c0_75 = arith.constant 0 : index
    %73 = vector.load %arg7[%c2_72, %c1_73, %c0_74, %c0_75] : memref<6x5x20x16xf32, #tpu.memory_space<vmem>>, vector<1x1x20x16xf32>
    %74 = vector.shape_cast %73 : vector<1x1x20x16xf32> to vector<20x16xf32>
    %75 = vector.shape_cast %72 : vector<20x16xf32> to vector<1x1x20x16xf32>
    tpu.vector_store %arg7[%c2_72, %c1_73, %c0_74, %c0_75], %75 {strides = array<i32>} : memref<6x5x20x16xf32, #tpu.memory_space<vmem>>, vector<1x1x20x16xf32>,
    %c0_i32_76 = arith.constant 0 : i32
    %c0_i32_77 = arith.constant 0 : i32
    %c0_i32_78 = arith.constant 0 : i32
    %76 = tpu.memref_slice %arg6[%11, %c0_i32_76, %c0_i32_77, %c0_i32_78] : memref<2x4x20x128xf32, #tpu.memory_space<vmem>> -> memref<1x4x20x128xf32, #tpu.memory_space<vmem>>
    %77 = tpu.memref_squeeze %76 : memref<1x4x20x128xf32, #tpu.memory_space<vmem>> -> memref<4x20x128xf32, #tpu.memory_space<vmem>>
    %c2_79 = arith.constant 2 : index
    %c0_80 = arith.constant 0 : index
    %c1_81 = arith.constant 1 : index
    %78 = vector.load %77[%c2_79, %c0_80, %c1_81] : memref<4x20x128xf32, #tpu.memory_space<vmem>>, vector<1x20x16xf32>
    %79 = vector.shape_cast %78 : vector<1x20x16xf32> to vector<20x16xf32>
    %c3_82 = arith.constant 3 : index
    %c1_83 = arith.constant 1 : index
    %c0_84 = arith.constant 0 : index
    %c0_85 = arith.constant 0 : index
    %80 = vector.load %arg7[%c3_82, %c1_83, %c0_84, %c0_85] : memref<6x5x20x16xf32, #tpu.memory_space<vmem>>, vector<1x1x20x16xf32>
    %81 = vector.shape_cast %80 : vector<1x1x20x16xf32> to vector<20x16xf32>
    %82 = vector.shape_cast %79 : vector<20x16xf32> to vector<1x1x20x16xf32>
    tpu.vector_store %arg7[%c3_82, %c1_83, %c0_84, %c0_85], %82 {strides = array<i32>} : memref<6x5x20x16xf32, #tpu.memory_space<vmem>>, vector<1x1x20x16xf32>,
    %c0_i32_86 = arith.constant 0 : i32
    %c0_i32_87 = arith.constant 0 : i32
    %c0_i32_88 = arith.constant 0 : i32
    %83 = tpu.memref_slice %arg6[%11, %c0_i32_86, %c0_i32_87, %c0_i32_88] : memref<2x4x20x128xf32, #tpu.memory_space<vmem>> -> memref<1x4x20x128xf32, #tpu.memory_space<vmem>>
    %84 = tpu.memref_squeeze %83 : memref<1x4x20x128xf32, #tpu.memory_space<vmem>> -> memref<4x20x128xf32, #tpu.memory_space<vmem>>
    %c3_89 = arith.constant 3 : index
    %c0_90 = arith.constant 0 : index
    %c1_91 = arith.constant 1 : index
    %85 = vector.load %84[%c3_89, %c0_90, %c1_91] : memref<4x20x128xf32, #tpu.memory_space<vmem>>, vector<1x20x16xf32>
    %86 = vector.shape_cast %85 : vector<1x20x16xf32> to vector<20x16xf32>
    %c4_92 = arith.constant 4 : index
    %c1_93 = arith.constant 1 : index
    %c0_94 = arith.constant 0 : index
    %c0_95 = arith.constant 0 : index
    %87 = vector.load %arg7[%c4_92, %c1_93, %c0_94, %c0_95] : memref<6x5x20x16xf32, #tpu.memory_space<vmem>>, vector<1x1x20x16xf32>
    %88 = vector.shape_cast %87 : vector<1x1x20x16xf32> to vector<20x16xf32>
    %89 = vector.shape_cast %86 : vector<20x16xf32> to vector<1x1x20x16xf32>
    tpu.vector_store %arg7[%c4_92, %c1_93, %c0_94, %c0_95], %89 {strides = array<i32>} : memref<6x5x20x16xf32, #tpu.memory_space<vmem>>, vector<1x1x20x16xf32>,
    %c0_i32_96 = arith.constant 0 : i32
    %c0_i32_97 = arith.constant 0 : i32
    %c0_i32_98 = arith.constant 0 : i32
    %90 = tpu.memref_slice %arg6[%11, %c0_i32_96, %c0_i32_97, %c0_i32_98] : memref<2x4x20x128xf32, #tpu.memory_space<vmem>> -> memref<1x4x20x128xf32, #tpu.memory_space<vmem>>
    %91 = tpu.memref_squeeze %90 : memref<1x4x20x128xf32, #tpu.memory_space<vmem>> -> memref<4x20x128xf32, #tpu.memory_space<vmem>>
    %c0_99 = arith.constant 0 : index
    %c0_100 = arith.constant 0 : index
    %c2_101 = arith.constant 2 : index
    %92 = vector.load %91[%c0_99, %c0_100, %c2_101] : memref<4x20x128xf32, #tpu.memory_space<vmem>>, vector<1x20x16xf32>
    %93 = vector.shape_cast %92 : vector<1x20x16xf32> to vector<20x16xf32>
    %c1_102 = arith.constant 1 : index
    %c2_103 = arith.constant 2 : index
    %c0_104 = arith.constant 0 : index
    %c0_105 = arith.constant 0 : index
    %94 = vector.load %arg7[%c1_102, %c2_103, %c0_104, %c0_105] : memref<6x5x20x16xf32, #tpu.memory_space<vmem>>, vector<1x1x20x16xf32>
    %95 = vector.shape_cast %94 : vector<1x1x20x16xf32> to vector<20x16xf32>
    %96 = vector.shape_cast %93 : vector<20x16xf32> to vector<1x1x20x16xf32>
    tpu.vector_store %arg7[%c1_102, %c2_103, %c0_104, %c0_105], %96 {strides = array<i32>} : memref<6x5x20x16xf32, #tpu.memory_space<vmem>>, vector<1x1x20x16xf32>,
    %c0_i32_106 = arith.constant 0 : i32
    %c0_i32_107 = arith.constant 0 : i32
    %c0_i32_108 = arith.constant 0 : i32
    %97 = tpu.memref_slice %arg6[%11, %c0_i32_106, %c0_i32_107, %c0_i32_108] : memref<2x4x20x128xf32, #tpu.memory_space<vmem>> -> memref<1x4x20x128xf32, #tpu.memory_space<vmem>>
    %98 = tpu.memref_squeeze %97 : memref<1x4x20x128xf32, #tpu.memory_space<vmem>> -> memref<4x20x128xf32, #tpu.memory_space<vmem>>
    %c1_109 = arith.constant 1 : index
    %c0_110 = arith.constant 0 : index
    %c2_111 = arith.constant 2 : index
    %99 = vector.load %98[%c1_109, %c0_110, %c2_111] : memref<4x20x128xf32, #tpu.memory_space<vmem>>, vector<1x20x16xf32>
    %100 = vector.shape_cast %99 : vector<1x20x16xf32> to vector<20x16xf32>
    %c2_112 = arith.constant 2 : index
    %c2_113 = arith.constant 2 : index
    %c0_114 = arith.constant 0 : index
    %c0_115 = arith.constant 0 : index
    %101 = vector.load %arg7[%c2_112, %c2_113, %c0_114, %c0_115] : memref<6x5x20x16xf32, #tpu.memory_space<vmem>>, vector<1x1x20x16xf32>
    %102 = vector.shape_cast %101 : vector<1x1x20x16xf32> to vector<20x16xf32>
    %103 = vector.shape_cast %100 : vector<20x16xf32> to vector<1x1x20x16xf32>
    tpu.vector_store %arg7[%c2_112, %c2_113, %c0_114, %c0_115], %103 {strides = array<i32>} : memref<6x5x20x16xf32, #tpu.memory_space<vmem>>, vector<1x1x20x16xf32>,
    %c0_i32_116 = arith.constant 0 : i32
    %c0_i32_117 = arith.constant 0 : i32
    %c0_i32_118 = arith.constant 0 : i32
    %104 = tpu.memref_slice %arg6[%11, %c0_i32_116, %c0_i32_117, %c0_i32_118] : memref<2x4x20x128xf32, #tpu.memory_space<vmem>> -> memref<1x4x20x128xf32, #tpu.memory_space<vmem>>
    %105 = tpu.memref_squeeze %104 : memref<1x4x20x128xf32, #tpu.memory_space<vmem>> -> memref<4x20x128xf32, #tpu.memory_space<vmem>>
    %c2_119 = arith.constant 2 : index
    %c0_120 = arith.constant 0 : index
    %c2_121 = arith.constant 2 : index
    %106 = vector.load %105[%c2_119, %c0_120, %c2_121] : memref<4x20x128xf32, #tpu.memory_space<vmem>>, vector<1x20x16xf32>
    %107 = vector.shape_cast %106 : vector<1x20x16xf32> to vector<20x16xf32>
    %c3_122 = arith.constant 3 : index
    %c2_123 = arith.constant 2 : index
    %c0_124 = arith.constant 0 : index
    %c0_125 = arith.constant 0 : index
    %108 = vector.load %arg7[%c3_122, %c2_123, %c0_124, %c0_125] : memref<6x5x20x16xf32, #tpu.memory_space<vmem>>, vector<1x1x20x16xf32>
    %109 = vector.shape_cast %108 : vector<1x1x20x16xf32> to vector<20x16xf32>
    %110 = vector.shape_cast %107 : vector<20x16xf32> to vector<1x1x20x16xf32>
    tpu.vector_store %arg7[%c3_122, %c2_123, %c0_124, %c0_125], %110 {strides = array<i32>} : memref<6x5x20x16xf32, #tpu.memory_space<vmem>>, vector<1x1x20x16xf32>,
    %c0_i32_126 = arith.constant 0 : i32
    %c0_i32_127 = arith.constant 0 : i32
    %c0_i32_128 = arith.constant 0 : i32
    %111 = tpu.memref_slice %arg6[%11, %c0_i32_126, %c0_i32_127, %c0_i32_128] : memref<2x4x20x128xf32, #tpu.memory_space<vmem>> -> memref<1x4x20x128xf32, #tpu.memory_space<vmem>>
    %112 = tpu.memref_squeeze %111 : memref<1x4x20x128xf32, #tpu.memory_space<vmem>> -> memref<4x20x128xf32, #tpu.memory_space<vmem>>
    %c3_129 = arith.constant 3 : index
    %c0_130 = arith.constant 0 : index
    %c2_131 = arith.constant 2 : index
    %113 = vector.load %112[%c3_129, %c0_130, %c2_131] : memref<4x20x128xf32, #tpu.memory_space<vmem>>, vector<1x20x16xf32>
    %114 = vector.shape_cast %113 : vector<1x20x16xf32> to vector<20x16xf32>
    %c4_132 = arith.constant 4 : index
    %c2_133 = arith.constant 2 : index
    %c0_134 = arith.constant 0 : index
    %c0_135 = arith.constant 0 : index
    %115 = vector.load %arg7[%c4_132, %c2_133, %c0_134, %c0_135] : memref<6x5x20x16xf32, #tpu.memory_space<vmem>>, vector<1x1x20x16xf32>
    %116 = vector.shape_cast %115 : vector<1x1x20x16xf32> to vector<20x16xf32>
    %117 = vector.shape_cast %114 : vector<20x16xf32> to vector<1x1x20x16xf32>
    tpu.vector_store %arg7[%c4_132, %c2_133, %c0_134, %c0_135], %117 {strides = array<i32>} : memref<6x5x20x16xf32, #tpu.memory_space<vmem>>, vector<1x1x20x16xf32>,
    %c0_i32_136 = arith.constant 0 : i32
    %c0_i32_137 = arith.constant 0 : i32
    %c0_i32_138 = arith.constant 0 : i32
    %118 = tpu.memref_slice %arg6[%11, %c0_i32_136, %c0_i32_137, %c0_i32_138] : memref<2x4x20x128xf32, #tpu.memory_space<vmem>> -> memref<1x4x20x128xf32, #tpu.memory_space<vmem>>
    %119 = tpu.memref_squeeze %118 : memref<1x4x20x128xf32, #tpu.memory_space<vmem>> -> memref<4x20x128xf32, #tpu.memory_space<vmem>>
    %c0_139 = arith.constant 0 : index
    %c0_140 = arith.constant 0 : index
    %c3_141 = arith.constant 3 : index
    %120 = vector.load %119[%c0_139, %c0_140, %c3_141] : memref<4x20x128xf32, #tpu.memory_space<vmem>>, vector<1x20x16xf32>
    %121 = vector.shape_cast %120 : vector<1x20x16xf32> to vector<20x16xf32>
    %c1_142 = arith.constant 1 : index
    %c3_143 = arith.constant 3 : index
    %c0_144 = arith.constant 0 : index
    %c0_145 = arith.constant 0 : index
    %122 = vector.load %arg7[%c1_142, %c3_143, %c0_144, %c0_145] : memref<6x5x20x16xf32, #tpu.memory_space<vmem>>, vector<1x1x20x16xf32>
    %123 = vector.shape_cast %122 : vector<1x1x20x16xf32> to vector<20x16xf32>
    %124 = vector.shape_cast %121 : vector<20x16xf32> to vector<1x1x20x16xf32>
    tpu.vector_store %arg7[%c1_142, %c3_143, %c0_144, %c0_145], %124 {strides = array<i32>} : memref<6x5x20x16xf32, #tpu.memory_space<vmem>>, vector<1x1x20x16xf32>,
    %c0_i32_146 = arith.constant 0 : i32
    %c0_i32_147 = arith.constant 0 : i32
    %c0_i32_148 = arith.constant 0 : i32
    %125 = tpu.memref_slice %arg6[%11, %c0_i32_146, %c0_i32_147, %c0_i32_148] : memref<2x4x20x128xf32, #tpu.memory_space<vmem>> -> memref<1x4x20x128xf32, #tpu.memory_space<vmem>>
    %126 = tpu.memref_squeeze %125 : memref<1x4x20x128xf32, #tpu.memory_space<vmem>> -> memref<4x20x128xf32, #tpu.memory_space<vmem>>
    %c1_149 = arith.constant 1 : index
    %c0_150 = arith.constant 0 : index
    %c3_151 = arith.constant 3 : index
    %127 = vector.load %126[%c1_149, %c0_150, %c3_151] : memref<4x20x128xf32, #tpu.memory_space<vmem>>, vector<1x20x16xf32>
    %128 = vector.shape_cast %127 : vector<1x20x16xf32> to vector<20x16xf32>
    %c2_152 = arith.constant 2 : index
    %c3_153 = arith.constant 3 : index
    %c0_154 = arith.constant 0 : index
    %c0_155 = arith.constant 0 : index
    %129 = vector.load %arg7[%c2_152, %c3_153, %c0_154, %c0_155] : memref<6x5x20x16xf32, #tpu.memory_space<vmem>>, vector<1x1x20x16xf32>
    %130 = vector.shape_cast %129 : vector<1x1x20x16xf32> to vector<20x16xf32>
    %131 = vector.shape_cast %128 : vector<20x16xf32> to vector<1x1x20x16xf32>
    tpu.vector_store %arg7[%c2_152, %c3_153, %c0_154, %c0_155], %131 {strides = array<i32>} : memref<6x5x20x16xf32, #tpu.memory_space<vmem>>, vector<1x1x20x16xf32>,
    %c0_i32_156 = arith.constant 0 : i32
    %c0_i32_157 = arith.constant 0 : i32
    %c0_i32_158 = arith.constant 0 : i32
    %132 = tpu.memref_slice %arg6[%11, %c0_i32_156, %c0_i32_157, %c0_i32_158] : memref<2x4x20x128xf32, #tpu.memory_space<vmem>> -> memref<1x4x20x128xf32, #tpu.memory_space<vmem>>
    %133 = tpu.memref_squeeze %132 : memref<1x4x20x128xf32, #tpu.memory_space<vmem>> -> memref<4x20x128xf32, #tpu.memory_space<vmem>>
    %c2_159 = arith.constant 2 : index
    %c0_160 = arith.constant 0 : index
    %c3_161 = arith.constant 3 : index
    %134 = vector.load %133[%c2_159, %c0_160, %c3_161] : memref<4x20x128xf32, #tpu.memory_space<vmem>>, vector<1x20x16xf32>
    %135 = vector.shape_cast %134 : vector<1x20x16xf32> to vector<20x16xf32>
    %c3_162 = arith.constant 3 : index
    %c3_163 = arith.constant 3 : index
    %c0_164 = arith.constant 0 : index
    %c0_165 = arith.constant 0 : index
    %136 = vector.load %arg7[%c3_162, %c3_163, %c0_164, %c0_165] : memref<6x5x20x16xf32, #tpu.memory_space<vmem>>, vector<1x1x20x16xf32>
    %137 = vector.shape_cast %136 : vector<1x1x20x16xf32> to vector<20x16xf32>
    %138 = vector.shape_cast %135 : vector<20x16xf32> to vector<1x1x20x16xf32>
    tpu.vector_store %arg7[%c3_162, %c3_163, %c0_164, %c0_165], %138 {strides = array<i32>} : memref<6x5x20x16xf32, #tpu.memory_space<vmem>>, vector<1x1x20x16xf32>,
    %c0_i32_166 = arith.constant 0 : i32
    %c0_i32_167 = arith.constant 0 : i32
    %c0_i32_168 = arith.constant 0 : i32
    %139 = tpu.memref_slice %arg6[%11, %c0_i32_166, %c0_i32_167, %c0_i32_168] : memref<2x4x20x128xf32, #tpu.memory_space<vmem>> -> memref<1x4x20x128xf32, #tpu.memory_space<vmem>>
    %140 = tpu.memref_squeeze %139 : memref<1x4x20x128xf32, #tpu.memory_space<vmem>> -> memref<4x20x128xf32, #tpu.memory_space<vmem>>
    %c3_169 = arith.constant 3 : index
    %c0_170 = arith.constant 0 : index
    %c3_171 = arith.constant 3 : index
    %141 = vector.load %140[%c3_169, %c0_170, %c3_171] : memref<4x20x128xf32, #tpu.memory_space<vmem>>, vector<1x20x16xf32>
    %142 = vector.shape_cast %141 : vector<1x20x16xf32> to vector<20x16xf32>
    %c4_172 = arith.constant 4 : index
    %c3_173 = arith.constant 3 : index
    %c0_174 = arith.constant 0 : index
    %c0_175 = arith.constant 0 : index
    %143 = vector.load %arg7[%c4_172, %c3_173, %c0_174, %c0_175] : memref<6x5x20x16xf32, #tpu.memory_space<vmem>>, vector<1x1x20x16xf32>
    %144 = vector.shape_cast %143 : vector<1x1x20x16xf32> to vector<20x16xf32>
    %145 = vector.shape_cast %142 : vector<20x16xf32> to vector<1x1x20x16xf32>
    tpu.vector_store %arg7[%c4_172, %c3_173, %c0_174, %c0_175], %145 {strides = array<i32>} : memref<6x5x20x16xf32, #tpu.memory_space<vmem>>, vector<1x1x20x16xf32>,
    %c0_i32_176 = arith.constant 0 : i32
    %c0_i32_177 = arith.constant 0 : i32
    %c0_i32_178 = arith.constant 0 : i32
    %146 = tpu.memref_slice %arg6[%11, %c0_i32_176, %c0_i32_177, %c0_i32_178] : memref<2x4x20x128xf32, #tpu.memory_space<vmem>> -> memref<1x4x20x128xf32, #tpu.memory_space<vmem>>
    %147 = tpu.memref_squeeze %146 : memref<1x4x20x128xf32, #tpu.memory_space<vmem>> -> memref<4x20x128xf32, #tpu.memory_space<vmem>>
    %c0_179 = arith.constant 0 : index
    %c0_180 = arith.constant 0 : index
    %c4_181 = arith.constant 4 : index
    %148 = vector.load %147[%c0_179, %c0_180, %c4_181] : memref<4x20x128xf32, #tpu.memory_space<vmem>>, vector<1x20x16xf32>
    %149 = vector.shape_cast %148 : vector<1x20x16xf32> to vector<20x16xf32>
    %c1_182 = arith.constant 1 : index
    %c4_183 = arith.constant 4 : index
    %c0_184 = arith.constant 0 : index
    %c0_185 = arith.constant 0 : index
    %150 = vector.load %arg7[%c1_182, %c4_183, %c0_184, %c0_185] : memref<6x5x20x16xf32, #tpu.memory_space<vmem>>, vector<1x1x20x16xf32>
    %151 = vector.shape_cast %150 : vector<1x1x20x16xf32> to vector<20x16xf32>
    %152 = vector.shape_cast %149 : vector<20x16xf32> to vector<1x1x20x16xf32>
    tpu.vector_store %arg7[%c1_182, %c4_183, %c0_184, %c0_185], %152 {strides = array<i32>} : memref<6x5x20x16xf32, #tpu.memory_space<vmem>>, vector<1x1x20x16xf32>,
    %c0_i32_186 = arith.constant 0 : i32
    %c0_i32_187 = arith.constant 0 : i32
    %c0_i32_188 = arith.constant 0 : i32
    %153 = tpu.memref_slice %arg6[%11, %c0_i32_186, %c0_i32_187, %c0_i32_188] : memref<2x4x20x128xf32, #tpu.memory_space<vmem>> -> memref<1x4x20x128xf32, #tpu.memory_space<vmem>>
    %154 = tpu.memref_squeeze %153 : memref<1x4x20x128xf32, #tpu.memory_space<vmem>> -> memref<4x20x128xf32, #tpu.memory_space<vmem>>
    %c1_189 = arith.constant 1 : index
    %c0_190 = arith.constant 0 : index
    %c4_191 = arith.constant 4 : index
    %155 = vector.load %154[%c1_189, %c0_190, %c4_191] : memref<4x20x128xf32, #tpu.memory_space<vmem>>, vector<1x20x16xf32>
    %156 = vector.shape_cast %155 : vector<1x20x16xf32> to vector<20x16xf32>
    %c2_192 = arith.constant 2 : index
    %c4_193 = arith.constant 4 : index
    %c0_194 = arith.constant 0 : index
    %c0_195 = arith.constant 0 : index
    %157 = vector.load %arg7[%c2_192, %c4_193, %c0_194, %c0_195] : memref<6x5x20x16xf32, #tpu.memory_space<vmem>>, vector<1x1x20x16xf32>
    %158 = vector.shape_cast %157 : vector<1x1x20x16xf32> to vector<20x16xf32>
    %159 = vector.shape_cast %156 : vector<20x16xf32> to vector<1x1x20x16xf32>
    tpu.vector_store %arg7[%c2_192, %c4_193, %c0_194, %c0_195], %159 {strides = array<i32>} : memref<6x5x20x16xf32, #tpu.memory_space<vmem>>, vector<1x1x20x16xf32>,
    %c0_i32_196 = arith.constant 0 : i32
    %c0_i32_197 = arith.constant 0 : i32
    %c0_i32_198 = arith.constant 0 : i32
    %160 = tpu.memref_slice %arg6[%11, %c0_i32_196, %c0_i32_197, %c0_i32_198] : memref<2x4x20x128xf32, #tpu.memory_space<vmem>> -> memref<1x4x20x128xf32, #tpu.memory_space<vmem>>
    %161 = tpu.memref_squeeze %160 : memref<1x4x20x128xf32, #tpu.memory_space<vmem>> -> memref<4x20x128xf32, #tpu.memory_space<vmem>>
    %c2_199 = arith.constant 2 : index
    %c0_200 = arith.constant 0 : index
    %c4_201 = arith.constant 4 : index
    %162 = vector.load %161[%c2_199, %c0_200, %c4_201] : memref<4x20x128xf32, #tpu.memory_space<vmem>>, vector<1x20x16xf32>
    %163 = vector.shape_cast %162 : vector<1x20x16xf32> to vector<20x16xf32>
    %c3_202 = arith.constant 3 : index
    %c4_203 = arith.constant 4 : index
    %c0_204 = arith.constant 0 : index
    %c0_205 = arith.constant 0 : index
    %164 = vector.load %arg7[%c3_202, %c4_203, %c0_204, %c0_205] : memref<6x5x20x16xf32, #tpu.memory_space<vmem>>, vector<1x1x20x16xf32>
    %165 = vector.shape_cast %164 : vector<1x1x20x16xf32> to vector<20x16xf32>
    %166 = vector.shape_cast %163 : vector<20x16xf32> to vector<1x1x20x16xf32>
    tpu.vector_store %arg7[%c3_202, %c4_203, %c0_204, %c0_205], %166 {strides = array<i32>} : memref<6x5x20x16xf32, #tpu.memory_space<vmem>>, vector<1x1x20x16xf32>,
    %c0_i32_206 = arith.constant 0 : i32
    %c0_i32_207 = arith.constant 0 : i32
    %c0_i32_208 = arith.constant 0 : i32
    %167 = tpu.memref_slice %arg6[%11, %c0_i32_206, %c0_i32_207, %c0_i32_208] : memref<2x4x20x128xf32, #tpu.memory_space<vmem>> -> memref<1x4x20x128xf32, #tpu.memory_space<vmem>>
    %168 = tpu.memref_squeeze %167 : memref<1x4x20x128xf32, #tpu.memory_space<vmem>> -> memref<4x20x128xf32, #tpu.memory_space<vmem>>
    %c3_209 = arith.constant 3 : index
    %c0_210 = arith.constant 0 : index
    %c4_211 = arith.constant 4 : index
    %169 = vector.load %168[%c3_209, %c0_210, %c4_211] : memref<4x20x128xf32, #tpu.memory_space<vmem>>, vector<1x20x16xf32>
    %170 = vector.shape_cast %169 : vector<1x20x16xf32> to vector<20x16xf32>
    %c4_212 = arith.constant 4 : index
    %c4_213 = arith.constant 4 : index
    %c0_214 = arith.constant 0 : index
    %c0_215 = arith.constant 0 : index
    %171 = vector.load %arg7[%c4_212, %c4_213, %c0_214, %c0_215] : memref<6x5x20x16xf32, #tpu.memory_space<vmem>>, vector<1x1x20x16xf32>
    %172 = vector.shape_cast %171 : vector<1x1x20x16xf32> to vector<20x16xf32>
    %173 = vector.shape_cast %170 : vector<20x16xf32> to vector<1x1x20x16xf32>
    tpu.vector_store %arg7[%c4_212, %c4_213, %c0_214, %c0_215], %173 {strides = array<i32>} : memref<6x5x20x16xf32, #tpu.memory_space<vmem>>, vector<1x1x20x16xf32>,
    %c0_i32_216 = arith.constant 0 : i32
    %c4_i32 = arith.constant 4 : i32
    %174 = arith.addi %c0_i32_216, %c4_i32 : i32
    %c1_i32_217 = arith.constant 1 : i32
    scf.for %arg9 = %c0_i32_216 to %174 step %c1_i32_217  : i32 {
      %cst_219 = arith.constant 0.000000e+00 : f32
      %175 = vector.broadcast %cst_219 : f32 to vector<16x16xf32>
      %176 = arith.index_cast %arg9 : i32 to index
      %c0_220 = arith.constant 0 : index
      %c0_221 = arith.constant 0 : index
      %c0_222 = arith.constant 0 : index
      %177 = vector.load %arg7[%176, %c0_220, %c0_221, %c0_222] : memref<6x5x20x16xf32, #tpu.memory_space<vmem>>, vector<3x1x20x16xf32>
      %178 = vector.shape_cast %177 : vector<3x1x20x16xf32> to vector<3x20x16xf32>
      %179 = vector.extract_strided_slice %178 {offsets = [0, 0, 0], sizes = [1, 20, 16], strides = [1, 1, 1]} : vector<3x20x16xf32> to vector<1x20x16xf32>
      %180 = vector.shape_cast %179 : vector<1x20x16xf32> to vector<20x16xf32>
      %181 = vector.extract_strided_slice %178 {offsets = [1, 0, 0], sizes = [1, 20, 16], strides = [1, 1, 1]} : vector<3x20x16xf32> to vector<1x20x16xf32>
      %182 = vector.shape_cast %181 : vector<1x20x16xf32> to vector<20x16xf32>
      %183 = vector.extract_strided_slice %178 {offsets = [2, 0, 0], sizes = [1, 20, 16], strides = [1, 1, 1]} : vector<3x20x16xf32> to vector<1x20x16xf32>
      %184 = vector.shape_cast %183 : vector<1x20x16xf32> to vector<20x16xf32>
      %c0_223 = arith.constant 0 : index
      %c0_224 = arith.constant 0 : index
      %c0_225 = arith.constant 0 : index
      %c0_226 = arith.constant 0 : index
      %185 = vector.load %arg4[%c0_223, %c0_224, %c0_225, %c0_226] : memref<1x75x16x16xf32, #tpu.memory_space<vmem>>, vector<1x1x16x16xf32>
      %186 = vector.shape_cast %185 : vector<1x1x16x16xf32> to vector<16x16xf32>
      %187 = vector.extract_strided_slice %180 {offsets = [0, 0], sizes = [16, 16], strides = [1, 1]} : vector<20x16xf32> to vector<16x16xf32>
      %188 = arith.mulf %186, %187 : vector<16x16xf32>
      %189 = arith.addf %175, %188 : vector<16x16xf32>
      %c0_227 = arith.constant 0 : index
      %c25 = arith.constant 25 : index
      %c0_228 = arith.constant 0 : index
      %c0_229 = arith.constant 0 : index
      %190 = vector.load %arg4[%c0_227, %c25, %c0_228, %c0_229] : memref<1x75x16x16xf32, #tpu.memory_space<vmem>>, vector<1x1x16x16xf32>
      %191 = vector.shape_cast %190 : vector<1x1x16x16xf32> to vector<16x16xf32>
      %192 = vector.extract_strided_slice %182 {offsets = [0, 0], sizes = [16, 16], strides = [1, 1]} : vector<20x16xf32> to vector<16x16xf32>
      %193 = arith.mulf %191, %192 : vector<16x16xf32>
      %194 = arith.addf %189, %193 : vector<16x16xf32>
      %c0_230 = arith.constant 0 : index
      %c50 = arith.constant 50 : index
      %c0_231 = arith.constant 0 : index
      %c0_232 = arith.constant 0 : index
      %195 = vector.load %arg4[%c0_230, %c50, %c0_231, %c0_232] : memref<1x75x16x16xf32, #tpu.memory_space<vmem>>, vector<1x1x16x16xf32>
      %196 = vector.shape_cast %195 : vector<1x1x16x16xf32> to vector<16x16xf32>
      %197 = vector.extract_strided_slice %184 {offsets = [0, 0], sizes = [16, 16], strides = [1, 1]} : vector<20x16xf32> to vector<16x16xf32>
      %198 = arith.mulf %196, %197 : vector<16x16xf32>
      %199 = arith.addf %194, %198 : vector<16x16xf32>
      %c0_233 = arith.constant 0 : index
      %c5_234 = arith.constant 5 : index
      %c0_235 = arith.constant 0 : index
      %c0_236 = arith.constant 0 : index
      %200 = vector.load %arg4[%c0_233, %c5_234, %c0_235, %c0_236] : memref<1x75x16x16xf32, #tpu.memory_space<vmem>>, vector<1x1x16x16xf32>
      %201 = vector.shape_cast %200 : vector<1x1x16x16xf32> to vector<16x16xf32>
      %202 = vector.extract_strided_slice %180 {offsets = [1, 0], sizes = [16, 16], strides = [1, 1]} : vector<20x16xf32> to vector<16x16xf32>
      %203 = arith.mulf %201, %202 : vector<16x16xf32>
      %204 = arith.addf %199, %203 : vector<16x16xf32>
      %c0_237 = arith.constant 0 : index
      %c30 = arith.constant 30 : index
      %c0_238 = arith.constant 0 : index
      %c0_239 = arith.constant 0 : index
      %205 = vector.load %arg4[%c0_237, %c30, %c0_238, %c0_239] : memref<1x75x16x16xf32, #tpu.memory_space<vmem>>, vector<1x1x16x16xf32>
      %206 = vector.shape_cast %205 : vector<1x1x16x16xf32> to vector<16x16xf32>
      %207 = vector.extract_strided_slice %182 {offsets = [1, 0], sizes = [16, 16], strides = [1, 1]} : vector<20x16xf32> to vector<16x16xf32>
      %208 = arith.mulf %206, %207 : vector<16x16xf32>
      %209 = arith.addf %204, %208 : vector<16x16xf32>
      %c0_240 = arith.constant 0 : index
      %c55 = arith.constant 55 : index
      %c0_241 = arith.constant 0 : index
      %c0_242 = arith.constant 0 : index
      %210 = vector.load %arg4[%c0_240, %c55, %c0_241, %c0_242] : memref<1x75x16x16xf32, #tpu.memory_space<vmem>>, vector<1x1x16x16xf32>
      %211 = vector.shape_cast %210 : vector<1x1x16x16xf32> to vector<16x16xf32>
      %212 = vector.extract_strided_slice %184 {offsets = [1, 0], sizes = [16, 16], strides = [1, 1]} : vector<20x16xf32> to vector<16x16xf32>
      %213 = arith.mulf %211, %212 : vector<16x16xf32>
      %214 = arith.addf %209, %213 : vector<16x16xf32>
      %c0_243 = arith.constant 0 : index
      %c10 = arith.constant 10 : index
      %c0_244 = arith.constant 0 : index
      %c0_245 = arith.constant 0 : index
      %215 = vector.load %arg4[%c0_243, %c10, %c0_244, %c0_245] : memref<1x75x16x16xf32, #tpu.memory_space<vmem>>, vector<1x1x16x16xf32>
      %216 = vector.shape_cast %215 : vector<1x1x16x16xf32> to vector<16x16xf32>
      %217 = vector.extract_strided_slice %180 {offsets = [2, 0], sizes = [16, 16], strides = [1, 1]} : vector<20x16xf32> to vector<16x16xf32>
      %218 = arith.mulf %216, %217 : vector<16x16xf32>
      %219 = arith.addf %214, %218 : vector<16x16xf32>
      %c0_246 = arith.constant 0 : index
      %c35 = arith.constant 35 : index
      %c0_247 = arith.constant 0 : index
      %c0_248 = arith.constant 0 : index
      %220 = vector.load %arg4[%c0_246, %c35, %c0_247, %c0_248] : memref<1x75x16x16xf32, #tpu.memory_space<vmem>>, vector<1x1x16x16xf32>
      %221 = vector.shape_cast %220 : vector<1x1x16x16xf32> to vector<16x16xf32>
      %222 = vector.extract_strided_slice %182 {offsets = [2, 0], sizes = [16, 16], strides = [1, 1]} : vector<20x16xf32> to vector<16x16xf32>
      %223 = arith.mulf %221, %222 : vector<16x16xf32>
      %224 = arith.addf %219, %223 : vector<16x16xf32>
      %c0_249 = arith.constant 0 : index
      %c60 = arith.constant 60 : index
      %c0_250 = arith.constant 0 : index
      %c0_251 = arith.constant 0 : index
      %225 = vector.load %arg4[%c0_249, %c60, %c0_250, %c0_251] : memref<1x75x16x16xf32, #tpu.memory_space<vmem>>, vector<1x1x16x16xf32>
      %226 = vector.shape_cast %225 : vector<1x1x16x16xf32> to vector<16x16xf32>
      %227 = vector.extract_strided_slice %184 {offsets = [2, 0], sizes = [16, 16], strides = [1, 1]} : vector<20x16xf32> to vector<16x16xf32>
      %228 = arith.mulf %226, %227 : vector<16x16xf32>
      %229 = arith.addf %224, %228 : vector<16x16xf32>
      %c0_252 = arith.constant 0 : index
      %c15 = arith.constant 15 : index
      %c0_253 = arith.constant 0 : index
      %c0_254 = arith.constant 0 : index
      %230 = vector.load %arg4[%c0_252, %c15, %c0_253, %c0_254] : memref<1x75x16x16xf32, #tpu.memory_space<vmem>>, vector<1x1x16x16xf32>
      %231 = vector.shape_cast %230 : vector<1x1x16x16xf32> to vector<16x16xf32>
      %232 = vector.extract_strided_slice %180 {offsets = [3, 0], sizes = [16, 16], strides = [1, 1]} : vector<20x16xf32> to vector<16x16xf32>
      %233 = arith.mulf %231, %232 : vector<16x16xf32>
      %234 = arith.addf %229, %233 : vector<16x16xf32>
      %c0_255 = arith.constant 0 : index
      %c40 = arith.constant 40 : index
      %c0_256 = arith.constant 0 : index
      %c0_257 = arith.constant 0 : index
      %235 = vector.load %arg4[%c0_255, %c40, %c0_256, %c0_257] : memref<1x75x16x16xf32, #tpu.memory_space<vmem>>, vector<1x1x16x16xf32>
      %236 = vector.shape_cast %235 : vector<1x1x16x16xf32> to vector<16x16xf32>
      %237 = vector.extract_strided_slice %182 {offsets = [3, 0], sizes = [16, 16], strides = [1, 1]} : vector<20x16xf32> to vector<16x16xf32>
      %238 = arith.mulf %236, %237 : vector<16x16xf32>
      %239 = arith.addf %234, %238 : vector<16x16xf32>
      %c0_258 = arith.constant 0 : index
      %c65 = arith.constant 65 : index
      %c0_259 = arith.constant 0 : index
      %c0_260 = arith.constant 0 : index
      %240 = vector.load %arg4[%c0_258, %c65, %c0_259, %c0_260] : memref<1x75x16x16xf32, #tpu.memory_space<vmem>>, vector<1x1x16x16xf32>
      %241 = vector.shape_cast %240 : vector<1x1x16x16xf32> to vector<16x16xf32>
      %242 = vector.extract_strided_slice %184 {offsets = [3, 0], sizes = [16, 16], strides = [1, 1]} : vector<20x16xf32> to vector<16x16xf32>
      %243 = arith.mulf %241, %242 : vector<16x16xf32>
      %244 = arith.addf %239, %243 : vector<16x16xf32>
      %c0_261 = arith.constant 0 : index
      %c20 = arith.constant 20 : index
      %c0_262 = arith.constant 0 : index
      %c0_263 = arith.constant 0 : index
      %245 = vector.load %arg4[%c0_261, %c20, %c0_262, %c0_263] : memref<1x75x16x16xf32, #tpu.memory_space<vmem>>, vector<1x1x16x16xf32>
      %246 = vector.shape_cast %245 : vector<1x1x16x16xf32> to vector<16x16xf32>
      %247 = vector.extract_strided_slice %180 {offsets = [4, 0], sizes = [16, 16], strides = [1, 1]} : vector<20x16xf32> to vector<16x16xf32>
      %248 = arith.mulf %246, %247 : vector<16x16xf32>
      %249 = arith.addf %244, %248 : vector<16x16xf32>
      %c0_264 = arith.constant 0 : index
      %c45 = arith.constant 45 : index
      %c0_265 = arith.constant 0 : index
      %c0_266 = arith.constant 0 : index
      %250 = vector.load %arg4[%c0_264, %c45, %c0_265, %c0_266] : memref<1x75x16x16xf32, #tpu.memory_space<vmem>>, vector<1x1x16x16xf32>
      %251 = vector.shape_cast %250 : vector<1x1x16x16xf32> to vector<16x16xf32>
      %252 = vector.extract_strided_slice %182 {offsets = [4, 0], sizes = [16, 16], strides = [1, 1]} : vector<20x16xf32> to vector<16x16xf32>
      %253 = arith.mulf %251, %252 : vector<16x16xf32>
      %254 = arith.addf %249, %253 : vector<16x16xf32>
      %c0_267 = arith.constant 0 : index
      %c70 = arith.constant 70 : index
      %c0_268 = arith.constant 0 : index
      %c0_269 = arith.constant 0 : index
      %255 = vector.load %arg4[%c0_267, %c70, %c0_268, %c0_269] : memref<1x75x16x16xf32, #tpu.memory_space<vmem>>, vector<1x1x16x16xf32>
      %256 = vector.shape_cast %255 : vector<1x1x16x16xf32> to vector<16x16xf32>
      %257 = vector.extract_strided_slice %184 {offsets = [4, 0], sizes = [16, 16], strides = [1, 1]} : vector<20x16xf32> to vector<16x16xf32>
      %258 = arith.mulf %256, %257 : vector<16x16xf32>
      %259 = arith.addf %254, %258 : vector<16x16xf32>
      %260 = arith.index_cast %arg9 : i32 to index
      %c1_270 = arith.constant 1 : index
      %c0_271 = arith.constant 0 : index
      %c0_272 = arith.constant 0 : index
      %261 = vector.load %arg7[%260, %c1_270, %c0_271, %c0_272] : memref<6x5x20x16xf32, #tpu.memory_space<vmem>>, vector<3x1x20x16xf32>
      %262 = vector.shape_cast %261 : vector<3x1x20x16xf32> to vector<3x20x16xf32>
      %263 = vector.extract_strided_slice %262 {offsets = [0, 0, 0], sizes = [1, 20, 16], strides = [1, 1, 1]} : vector<3x20x16xf32> to vector<1x20x16xf32>
      %264 = vector.shape_cast %263 : vector<1x20x16xf32> to vector<20x16xf32>
      %265 = vector.extract_strided_slice %262 {offsets = [1, 0, 0], sizes = [1, 20, 16], strides = [1, 1, 1]} : vector<3x20x16xf32> to vector<1x20x16xf32>
      %266 = vector.shape_cast %265 : vector<1x20x16xf32> to vector<20x16xf32>
      %267 = vector.extract_strided_slice %262 {offsets = [2, 0, 0], sizes = [1, 20, 16], strides = [1, 1, 1]} : vector<3x20x16xf32> to vector<1x20x16xf32>
      %268 = vector.shape_cast %267 : vector<1x20x16xf32> to vector<20x16xf32>
      %c0_273 = arith.constant 0 : index
      %c1_274 = arith.constant 1 : index
      %c0_275 = arith.constant 0 : index
      %c0_276 = arith.constant 0 : index
      %269 = vector.load %arg4[%c0_273, %c1_274, %c0_275, %c0_276] : memref<1x75x16x16xf32, #tpu.memory_space<vmem>>, vector<1x1x16x16xf32>
      %270 = vector.shape_cast %269 : vector<1x1x16x16xf32> to vector<16x16xf32>
      %271 = vector.extract_strided_slice %264 {offsets = [0, 0], sizes = [16, 16], strides = [1, 1]} : vector<20x16xf32> to vector<16x16xf32>
      %272 = arith.mulf %270, %271 : vector<16x16xf32>
      %273 = arith.addf %259, %272 : vector<16x16xf32>
      %c0_277 = arith.constant 0 : index
      %c26 = arith.constant 26 : index
      %c0_278 = arith.constant 0 : index
      %c0_279 = arith.constant 0 : index
      %274 = vector.load %arg4[%c0_277, %c26, %c0_278, %c0_279] : memref<1x75x16x16xf32, #tpu.memory_space<vmem>>, vector<1x1x16x16xf32>
      %275 = vector.shape_cast %274 : vector<1x1x16x16xf32> to vector<16x16xf32>
      %276 = vector.extract_strided_slice %266 {offsets = [0, 0], sizes = [16, 16], strides = [1, 1]} : vector<20x16xf32> to vector<16x16xf32>
      %277 = arith.mulf %275, %276 : vector<16x16xf32>
      %278 = arith.addf %273, %277 : vector<16x16xf32>
      %c0_280 = arith.constant 0 : index
      %c51 = arith.constant 51 : index
      %c0_281 = arith.constant 0 : index
      %c0_282 = arith.constant 0 : index
      %279 = vector.load %arg4[%c0_280, %c51, %c0_281, %c0_282] : memref<1x75x16x16xf32, #tpu.memory_space<vmem>>, vector<1x1x16x16xf32>
      %280 = vector.shape_cast %279 : vector<1x1x16x16xf32> to vector<16x16xf32>
      %281 = vector.extract_strided_slice %268 {offsets = [0, 0], sizes = [16, 16], strides = [1, 1]} : vector<20x16xf32> to vector<16x16xf32>
      %282 = arith.mulf %280, %281 : vector<16x16xf32>
      %283 = arith.addf %278, %282 : vector<16x16xf32>
      %c0_283 = arith.constant 0 : index
      %c6 = arith.constant 6 : index
      %c0_284 = arith.constant 0 : index
      %c0_285 = arith.constant 0 : index
      %284 = vector.load %arg4[%c0_283, %c6, %c0_284, %c0_285] : memref<1x75x16x16xf32, #tpu.memory_space<vmem>>, vector<1x1x16x16xf32>
      %285 = vector.shape_cast %284 : vector<1x1x16x16xf32> to vector<16x16xf32>
      %286 = vector.extract_strided_slice %264 {offsets = [1, 0], sizes = [16, 16], strides = [1, 1]} : vector<20x16xf32> to vector<16x16xf32>
      %287 = arith.mulf %285, %286 : vector<16x16xf32>
      %288 = arith.addf %283, %287 : vector<16x16xf32>
      %c0_286 = arith.constant 0 : index
      %c31 = arith.constant 31 : index
      %c0_287 = arith.constant 0 : index
      %c0_288 = arith.constant 0 : index
      %289 = vector.load %arg4[%c0_286, %c31, %c0_287, %c0_288] : memref<1x75x16x16xf32, #tpu.memory_space<vmem>>, vector<1x1x16x16xf32>
      %290 = vector.shape_cast %289 : vector<1x1x16x16xf32> to vector<16x16xf32>
      %291 = vector.extract_strided_slice %266 {offsets = [1, 0], sizes = [16, 16], strides = [1, 1]} : vector<20x16xf32> to vector<16x16xf32>
      %292 = arith.mulf %290, %291 : vector<16x16xf32>
      %293 = arith.addf %288, %292 : vector<16x16xf32>
      %c0_289 = arith.constant 0 : index
      %c56 = arith.constant 56 : index
      %c0_290 = arith.constant 0 : index
      %c0_291 = arith.constant 0 : index
      %294 = vector.load %arg4[%c0_289, %c56, %c0_290, %c0_291] : memref<1x75x16x16xf32, #tpu.memory_space<vmem>>, vector<1x1x16x16xf32>
      %295 = vector.shape_cast %294 : vector<1x1x16x16xf32> to vector<16x16xf32>
      %296 = vector.extract_strided_slice %268 {offsets = [1, 0], sizes = [16, 16], strides = [1, 1]} : vector<20x16xf32> to vector<16x16xf32>
      %297 = arith.mulf %295, %296 : vector<16x16xf32>
      %298 = arith.addf %293, %297 : vector<16x16xf32>
      %c0_292 = arith.constant 0 : index
      %c11 = arith.constant 11 : index
      %c0_293 = arith.constant 0 : index
      %c0_294 = arith.constant 0 : index
      %299 = vector.load %arg4[%c0_292, %c11, %c0_293, %c0_294] : memref<1x75x16x16xf32, #tpu.memory_space<vmem>>, vector<1x1x16x16xf32>
      %300 = vector.shape_cast %299 : vector<1x1x16x16xf32> to vector<16x16xf32>
      %301 = vector.extract_strided_slice %264 {offsets = [2, 0], sizes = [16, 16], strides = [1, 1]} : vector<20x16xf32> to vector<16x16xf32>
      %302 = arith.mulf %300, %301 : vector<16x16xf32>
      %303 = arith.addf %298, %302 : vector<16x16xf32>
      %c0_295 = arith.constant 0 : index
      %c36 = arith.constant 36 : index
      %c0_296 = arith.constant 0 : index
      %c0_297 = arith.constant 0 : index
      %304 = vector.load %arg4[%c0_295, %c36, %c0_296, %c0_297] : memref<1x75x16x16xf32, #tpu.memory_space<vmem>>, vector<1x1x16x16xf32>
      %305 = vector.shape_cast %304 : vector<1x1x16x16xf32> to vector<16x16xf32>
      %306 = vector.extract_strided_slice %266 {offsets = [2, 0], sizes = [16, 16], strides = [1, 1]} : vector<20x16xf32> to vector<16x16xf32>
      %307 = arith.mulf %305, %306 : vector<16x16xf32>
      %308 = arith.addf %303, %307 : vector<16x16xf32>
      %c0_298 = arith.constant 0 : index
      %c61 = arith.constant 61 : index
      %c0_299 = arith.constant 0 : index
      %c0_300 = arith.constant 0 : index
      %309 = vector.load %arg4[%c0_298, %c61, %c0_299, %c0_300] : memref<1x75x16x16xf32, #tpu.memory_space<vmem>>, vector<1x1x16x16xf32>
      %310 = vector.shape_cast %309 : vector<1x1x16x16xf32> to vector<16x16xf32>
      %311 = vector.extract_strided_slice %268 {offsets = [2, 0], sizes = [16, 16], strides = [1, 1]} : vector<20x16xf32> to vector<16x16xf32>
      %312 = arith.mulf %310, %311 : vector<16x16xf32>
      %313 = arith.addf %308, %312 : vector<16x16xf32>
      %c0_301 = arith.constant 0 : index
      %c16 = arith.constant 16 : index
      %c0_302 = arith.constant 0 : index
      %c0_303 = arith.constant 0 : index
      %314 = vector.load %arg4[%c0_301, %c16, %c0_302, %c0_303] : memref<1x75x16x16xf32, #tpu.memory_space<vmem>>, vector<1x1x16x16xf32>
      %315 = vector.shape_cast %314 : vector<1x1x16x16xf32> to vector<16x16xf32>
      %316 = vector.extract_strided_slice %264 {offsets = [3, 0], sizes = [16, 16], strides = [1, 1]} : vector<20x16xf32> to vector<16x16xf32>
      %317 = arith.mulf %315, %316 : vector<16x16xf32>
      %318 = arith.addf %313, %317 : vector<16x16xf32>
      %c0_304 = arith.constant 0 : index
      %c41 = arith.constant 41 : index
      %c0_305 = arith.constant 0 : index
      %c0_306 = arith.constant 0 : index
      %319 = vector.load %arg4[%c0_304, %c41, %c0_305, %c0_306] : memref<1x75x16x16xf32, #tpu.memory_space<vmem>>, vector<1x1x16x16xf32>
      %320 = vector.shape_cast %319 : vector<1x1x16x16xf32> to vector<16x16xf32>
      %321 = vector.extract_strided_slice %266 {offsets = [3, 0], sizes = [16, 16], strides = [1, 1]} : vector<20x16xf32> to vector<16x16xf32>
      %322 = arith.mulf %320, %321 : vector<16x16xf32>
      %323 = arith.addf %318, %322 : vector<16x16xf32>
      %c0_307 = arith.constant 0 : index
      %c66 = arith.constant 66 : index
      %c0_308 = arith.constant 0 : index
      %c0_309 = arith.constant 0 : index
      %324 = vector.load %arg4[%c0_307, %c66, %c0_308, %c0_309] : memref<1x75x16x16xf32, #tpu.memory_space<vmem>>, vector<1x1x16x16xf32>
      %325 = vector.shape_cast %324 : vector<1x1x16x16xf32> to vector<16x16xf32>
      %326 = vector.extract_strided_slice %268 {offsets = [3, 0], sizes = [16, 16], strides = [1, 1]} : vector<20x16xf32> to vector<16x16xf32>
      %327 = arith.mulf %325, %326 : vector<16x16xf32>
      %328 = arith.addf %323, %327 : vector<16x16xf32>
      %c0_310 = arith.constant 0 : index
      %c21 = arith.constant 21 : index
      %c0_311 = arith.constant 0 : index
      %c0_312 = arith.constant 0 : index
      %329 = vector.load %arg4[%c0_310, %c21, %c0_311, %c0_312] : memref<1x75x16x16xf32, #tpu.memory_space<vmem>>, vector<1x1x16x16xf32>
      %330 = vector.shape_cast %329 : vector<1x1x16x16xf32> to vector<16x16xf32>
      %331 = vector.extract_strided_slice %264 {offsets = [4, 0], sizes = [16, 16], strides = [1, 1]} : vector<20x16xf32> to vector<16x16xf32>
      %332 = arith.mulf %330, %331 : vector<16x16xf32>
      %333 = arith.addf %328, %332 : vector<16x16xf32>
      %c0_313 = arith.constant 0 : index
      %c46 = arith.constant 46 : index
      %c0_314 = arith.constant 0 : index
      %c0_315 = arith.constant 0 : index
      %334 = vector.load %arg4[%c0_313, %c46, %c0_314, %c0_315] : memref<1x75x16x16xf32, #tpu.memory_space<vmem>>, vector<1x1x16x16xf32>
      %335 = vector.shape_cast %334 : vector<1x1x16x16xf32> to vector<16x16xf32>
      %336 = vector.extract_strided_slice %266 {offsets = [4, 0], sizes = [16, 16], strides = [1, 1]} : vector<20x16xf32> to vector<16x16xf32>
      %337 = arith.mulf %335, %336 : vector<16x16xf32>
      %338 = arith.addf %333, %337 : vector<16x16xf32>
      %c0_316 = arith.constant 0 : index
      %c71 = arith.constant 71 : index
      %c0_317 = arith.constant 0 : index
      %c0_318 = arith.constant 0 : index
      %339 = vector.load %arg4[%c0_316, %c71, %c0_317, %c0_318] : memref<1x75x16x16xf32, #tpu.memory_space<vmem>>, vector<1x1x16x16xf32>
      %340 = vector.shape_cast %339 : vector<1x1x16x16xf32> to vector<16x16xf32>
      %341 = vector.extract_strided_slice %268 {offsets = [4, 0], sizes = [16, 16], strides = [1, 1]} : vector<20x16xf32> to vector<16x16xf32>
      %342 = arith.mulf %340, %341 : vector<16x16xf32>
      %343 = arith.addf %338, %342 : vector<16x16xf32>
      %344 = arith.index_cast %arg9 : i32 to index
      %c2_319 = arith.constant 2 : index
      %c0_320 = arith.constant 0 : index
      %c0_321 = arith.constant 0 : index
      %345 = vector.load %arg7[%344, %c2_319, %c0_320, %c0_321] : memref<6x5x20x16xf32, #tpu.memory_space<vmem>>, vector<3x1x20x16xf32>
      %346 = vector.shape_cast %345 : vector<3x1x20x16xf32> to vector<3x20x16xf32>
      %347 = vector.extract_strided_slice %346 {offsets = [0, 0, 0], sizes = [1, 20, 16], strides = [1, 1, 1]} : vector<3x20x16xf32> to vector<1x20x16xf32>
      %348 = vector.shape_cast %347 : vector<1x20x16xf32> to vector<20x16xf32>
      %349 = vector.extract_strided_slice %346 {offsets = [1, 0, 0], sizes = [1, 20, 16], strides = [1, 1, 1]} : vector<3x20x16xf32> to vector<1x20x16xf32>
      %350 = vector.shape_cast %349 : vector<1x20x16xf32> to vector<20x16xf32>
      %351 = vector.extract_strided_slice %346 {offsets = [2, 0, 0], sizes = [1, 20, 16], strides = [1, 1, 1]} : vector<3x20x16xf32> to vector<1x20x16xf32>
      %352 = vector.shape_cast %351 : vector<1x20x16xf32> to vector<20x16xf32>
      %c0_322 = arith.constant 0 : index
      %c2_323 = arith.constant 2 : index
      %c0_324 = arith.constant 0 : index
      %c0_325 = arith.constant 0 : index
      %353 = vector.load %arg4[%c0_322, %c2_323, %c0_324, %c0_325] : memref<1x75x16x16xf32, #tpu.memory_space<vmem>>, vector<1x1x16x16xf32>
      %354 = vector.shape_cast %353 : vector<1x1x16x16xf32> to vector<16x16xf32>
      %355 = vector.extract_strided_slice %348 {offsets = [0, 0], sizes = [16, 16], strides = [1, 1]} : vector<20x16xf32> to vector<16x16xf32>
      %356 = arith.mulf %354, %355 : vector<16x16xf32>
      %357 = arith.addf %343, %356 : vector<16x16xf32>
      %c0_326 = arith.constant 0 : index
      %c27 = arith.constant 27 : index
      %c0_327 = arith.constant 0 : index
      %c0_328 = arith.constant 0 : index
      %358 = vector.load %arg4[%c0_326, %c27, %c0_327, %c0_328] : memref<1x75x16x16xf32, #tpu.memory_space<vmem>>, vector<1x1x16x16xf32>
      %359 = vector.shape_cast %358 : vector<1x1x16x16xf32> to vector<16x16xf32>
      %360 = vector.extract_strided_slice %350 {offsets = [0, 0], sizes = [16, 16], strides = [1, 1]} : vector<20x16xf32> to vector<16x16xf32>
      %361 = arith.mulf %359, %360 : vector<16x16xf32>
      %362 = arith.addf %357, %361 : vector<16x16xf32>
      %c0_329 = arith.constant 0 : index
      %c52 = arith.constant 52 : index
      %c0_330 = arith.constant 0 : index
      %c0_331 = arith.constant 0 : index
      %363 = vector.load %arg4[%c0_329, %c52, %c0_330, %c0_331] : memref<1x75x16x16xf32, #tpu.memory_space<vmem>>, vector<1x1x16x16xf32>
      %364 = vector.shape_cast %363 : vector<1x1x16x16xf32> to vector<16x16xf32>
      %365 = vector.extract_strided_slice %352 {offsets = [0, 0], sizes = [16, 16], strides = [1, 1]} : vector<20x16xf32> to vector<16x16xf32>
      %366 = arith.mulf %364, %365 : vector<16x16xf32>
      %367 = arith.addf %362, %366 : vector<16x16xf32>
      %c0_332 = arith.constant 0 : index
      %c7 = arith.constant 7 : index
      %c0_333 = arith.constant 0 : index
      %c0_334 = arith.constant 0 : index
      %368 = vector.load %arg4[%c0_332, %c7, %c0_333, %c0_334] : memref<1x75x16x16xf32, #tpu.memory_space<vmem>>, vector<1x1x16x16xf32>
      %369 = vector.shape_cast %368 : vector<1x1x16x16xf32> to vector<16x16xf32>
      %370 = vector.extract_strided_slice %348 {offsets = [1, 0], sizes = [16, 16], strides = [1, 1]} : vector<20x16xf32> to vector<16x16xf32>
      %371 = arith.mulf %369, %370 : vector<16x16xf32>
      %372 = arith.addf %367, %371 : vector<16x16xf32>
      %c0_335 = arith.constant 0 : index
      %c32 = arith.constant 32 : index
      %c0_336 = arith.constant 0 : index
      %c0_337 = arith.constant 0 : index
      %373 = vector.load %arg4[%c0_335, %c32, %c0_336, %c0_337] : memref<1x75x16x16xf32, #tpu.memory_space<vmem>>, vector<1x1x16x16xf32>
      %374 = vector.shape_cast %373 : vector<1x1x16x16xf32> to vector<16x16xf32>
      %375 = vector.extract_strided_slice %350 {offsets = [1, 0], sizes = [16, 16], strides = [1, 1]} : vector<20x16xf32> to vector<16x16xf32>
      %376 = arith.mulf %374, %375 : vector<16x16xf32>
      %377 = arith.addf %372, %376 : vector<16x16xf32>
      %c0_338 = arith.constant 0 : index
      %c57 = arith.constant 57 : index
      %c0_339 = arith.constant 0 : index
      %c0_340 = arith.constant 0 : index
      %378 = vector.load %arg4[%c0_338, %c57, %c0_339, %c0_340] : memref<1x75x16x16xf32, #tpu.memory_space<vmem>>, vector<1x1x16x16xf32>
      %379 = vector.shape_cast %378 : vector<1x1x16x16xf32> to vector<16x16xf32>
      %380 = vector.extract_strided_slice %352 {offsets = [1, 0], sizes = [16, 16], strides = [1, 1]} : vector<20x16xf32> to vector<16x16xf32>
      %381 = arith.mulf %379, %380 : vector<16x16xf32>
      %382 = arith.addf %377, %381 : vector<16x16xf32>
      %c0_341 = arith.constant 0 : index
      %c12 = arith.constant 12 : index
      %c0_342 = arith.constant 0 : index
      %c0_343 = arith.constant 0 : index
      %383 = vector.load %arg4[%c0_341, %c12, %c0_342, %c0_343] : memref<1x75x16x16xf32, #tpu.memory_space<vmem>>, vector<1x1x16x16xf32>
      %384 = vector.shape_cast %383 : vector<1x1x16x16xf32> to vector<16x16xf32>
      %385 = vector.extract_strided_slice %348 {offsets = [2, 0], sizes = [16, 16], strides = [1, 1]} : vector<20x16xf32> to vector<16x16xf32>
      %386 = arith.mulf %384, %385 : vector<16x16xf32>
      %387 = arith.addf %382, %386 : vector<16x16xf32>
      %c0_344 = arith.constant 0 : index
      %c37 = arith.constant 37 : index
      %c0_345 = arith.constant 0 : index
      %c0_346 = arith.constant 0 : index
      %388 = vector.load %arg4[%c0_344, %c37, %c0_345, %c0_346] : memref<1x75x16x16xf32, #tpu.memory_space<vmem>>, vector<1x1x16x16xf32>
      %389 = vector.shape_cast %388 : vector<1x1x16x16xf32> to vector<16x16xf32>
      %390 = vector.extract_strided_slice %350 {offsets = [2, 0], sizes = [16, 16], strides = [1, 1]} : vector<20x16xf32> to vector<16x16xf32>
      %391 = arith.mulf %389, %390 : vector<16x16xf32>
      %392 = arith.addf %387, %391 : vector<16x16xf32>
      %c0_347 = arith.constant 0 : index
      %c62 = arith.constant 62 : index
      %c0_348 = arith.constant 0 : index
      %c0_349 = arith.constant 0 : index
      %393 = vector.load %arg4[%c0_347, %c62, %c0_348, %c0_349] : memref<1x75x16x16xf32, #tpu.memory_space<vmem>>, vector<1x1x16x16xf32>
      %394 = vector.shape_cast %393 : vector<1x1x16x16xf32> to vector<16x16xf32>
      %395 = vector.extract_strided_slice %352 {offsets = [2, 0], sizes = [16, 16], strides = [1, 1]} : vector<20x16xf32> to vector<16x16xf32>
      %396 = arith.mulf %394, %395 : vector<16x16xf32>
      %397 = arith.addf %392, %396 : vector<16x16xf32>
      %c0_350 = arith.constant 0 : index
      %c17 = arith.constant 17 : index
      %c0_351 = arith.constant 0 : index
      %c0_352 = arith.constant 0 : index
      %398 = vector.load %arg4[%c0_350, %c17, %c0_351, %c0_352] : memref<1x75x16x16xf32, #tpu.memory_space<vmem>>, vector<1x1x16x16xf32>
      %399 = vector.shape_cast %398 : vector<1x1x16x16xf32> to vector<16x16xf32>
      %400 = vector.extract_strided_slice %348 {offsets = [3, 0], sizes = [16, 16], strides = [1, 1]} : vector<20x16xf32> to vector<16x16xf32>
      %401 = arith.mulf %399, %400 : vector<16x16xf32>
      %402 = arith.addf %397, %401 : vector<16x16xf32>
      %c0_353 = arith.constant 0 : index
      %c42 = arith.constant 42 : index
      %c0_354 = arith.constant 0 : index
      %c0_355 = arith.constant 0 : index
      %403 = vector.load %arg4[%c0_353, %c42, %c0_354, %c0_355] : memref<1x75x16x16xf32, #tpu.memory_space<vmem>>, vector<1x1x16x16xf32>
      %404 = vector.shape_cast %403 : vector<1x1x16x16xf32> to vector<16x16xf32>
      %405 = vector.extract_strided_slice %350 {offsets = [3, 0], sizes = [16, 16], strides = [1, 1]} : vector<20x16xf32> to vector<16x16xf32>
      %406 = arith.mulf %404, %405 : vector<16x16xf32>
      %407 = arith.addf %402, %406 : vector<16x16xf32>
      %c0_356 = arith.constant 0 : index
      %c67 = arith.constant 67 : index
      %c0_357 = arith.constant 0 : index
      %c0_358 = arith.constant 0 : index
      %408 = vector.load %arg4[%c0_356, %c67, %c0_357, %c0_358] : memref<1x75x16x16xf32, #tpu.memory_space<vmem>>, vector<1x1x16x16xf32>
      %409 = vector.shape_cast %408 : vector<1x1x16x16xf32> to vector<16x16xf32>
      %410 = vector.extract_strided_slice %352 {offsets = [3, 0], sizes = [16, 16], strides = [1, 1]} : vector<20x16xf32> to vector<16x16xf32>
      %411 = arith.mulf %409, %410 : vector<16x16xf32>
      %412 = arith.addf %407, %411 : vector<16x16xf32>
      %c0_359 = arith.constant 0 : index
      %c22 = arith.constant 22 : index
      %c0_360 = arith.constant 0 : index
      %c0_361 = arith.constant 0 : index
      %413 = vector.load %arg4[%c0_359, %c22, %c0_360, %c0_361] : memref<1x75x16x16xf32, #tpu.memory_space<vmem>>, vector<1x1x16x16xf32>
      %414 = vector.shape_cast %413 : vector<1x1x16x16xf32> to vector<16x16xf32>
      %415 = vector.extract_strided_slice %348 {offsets = [4, 0], sizes = [16, 16], strides = [1, 1]} : vector<20x16xf32> to vector<16x16xf32>
      %416 = arith.mulf %414, %415 : vector<16x16xf32>
      %417 = arith.addf %412, %416 : vector<16x16xf32>
      %c0_362 = arith.constant 0 : index
      %c47 = arith.constant 47 : index
      %c0_363 = arith.constant 0 : index
      %c0_364 = arith.constant 0 : index
      %418 = vector.load %arg4[%c0_362, %c47, %c0_363, %c0_364] : memref<1x75x16x16xf32, #tpu.memory_space<vmem>>, vector<1x1x16x16xf32>
      %419 = vector.shape_cast %418 : vector<1x1x16x16xf32> to vector<16x16xf32>
      %420 = vector.extract_strided_slice %350 {offsets = [4, 0], sizes = [16, 16], strides = [1, 1]} : vector<20x16xf32> to vector<16x16xf32>
      %421 = arith.mulf %419, %420 : vector<16x16xf32>
      %422 = arith.addf %417, %421 : vector<16x16xf32>
      %c0_365 = arith.constant 0 : index
      %c72 = arith.constant 72 : index
      %c0_366 = arith.constant 0 : index
      %c0_367 = arith.constant 0 : index
      %423 = vector.load %arg4[%c0_365, %c72, %c0_366, %c0_367] : memref<1x75x16x16xf32, #tpu.memory_space<vmem>>, vector<1x1x16x16xf32>
      %424 = vector.shape_cast %423 : vector<1x1x16x16xf32> to vector<16x16xf32>
      %425 = vector.extract_strided_slice %352 {offsets = [4, 0], sizes = [16, 16], strides = [1, 1]} : vector<20x16xf32> to vector<16x16xf32>
      %426 = arith.mulf %424, %425 : vector<16x16xf32>
      %427 = arith.addf %422, %426 : vector<16x16xf32>
      %428 = arith.index_cast %arg9 : i32 to index
      %c3_368 = arith.constant 3 : index
      %c0_369 = arith.constant 0 : index
      %c0_370 = arith.constant 0 : index
      %429 = vector.load %arg7[%428, %c3_368, %c0_369, %c0_370] : memref<6x5x20x16xf32, #tpu.memory_space<vmem>>, vector<3x1x20x16xf32>
      %430 = vector.shape_cast %429 : vector<3x1x20x16xf32> to vector<3x20x16xf32>
      %431 = vector.extract_strided_slice %430 {offsets = [0, 0, 0], sizes = [1, 20, 16], strides = [1, 1, 1]} : vector<3x20x16xf32> to vector<1x20x16xf32>
      %432 = vector.shape_cast %431 : vector<1x20x16xf32> to vector<20x16xf32>
      %433 = vector.extract_strided_slice %430 {offsets = [1, 0, 0], sizes = [1, 20, 16], strides = [1, 1, 1]} : vector<3x20x16xf32> to vector<1x20x16xf32>
      %434 = vector.shape_cast %433 : vector<1x20x16xf32> to vector<20x16xf32>
      %435 = vector.extract_strided_slice %430 {offsets = [2, 0, 0], sizes = [1, 20, 16], strides = [1, 1, 1]} : vector<3x20x16xf32> to vector<1x20x16xf32>
      %436 = vector.shape_cast %435 : vector<1x20x16xf32> to vector<20x16xf32>
      %c0_371 = arith.constant 0 : index
      %c3_372 = arith.constant 3 : index
      %c0_373 = arith.constant 0 : index
      %c0_374 = arith.constant 0 : index
      %437 = vector.load %arg4[%c0_371, %c3_372, %c0_373, %c0_374] : memref<1x75x16x16xf32, #tpu.memory_space<vmem>>, vector<1x1x16x16xf32>
      %438 = vector.shape_cast %437 : vector<1x1x16x16xf32> to vector<16x16xf32>
      %439 = vector.extract_strided_slice %432 {offsets = [0, 0], sizes = [16, 16], strides = [1, 1]} : vector<20x16xf32> to vector<16x16xf32>
      %440 = arith.mulf %438, %439 : vector<16x16xf32>
      %441 = arith.addf %427, %440 : vector<16x16xf32>
      %c0_375 = arith.constant 0 : index
      %c28 = arith.constant 28 : index
      %c0_376 = arith.constant 0 : index
      %c0_377 = arith.constant 0 : index
      %442 = vector.load %arg4[%c0_375, %c28, %c0_376, %c0_377] : memref<1x75x16x16xf32, #tpu.memory_space<vmem>>, vector<1x1x16x16xf32>
      %443 = vector.shape_cast %442 : vector<1x1x16x16xf32> to vector<16x16xf32>
      %444 = vector.extract_strided_slice %434 {offsets = [0, 0], sizes = [16, 16], strides = [1, 1]} : vector<20x16xf32> to vector<16x16xf32>
      %445 = arith.mulf %443, %444 : vector<16x16xf32>
      %446 = arith.addf %441, %445 : vector<16x16xf32>
      %c0_378 = arith.constant 0 : index
      %c53 = arith.constant 53 : index
      %c0_379 = arith.constant 0 : index
      %c0_380 = arith.constant 0 : index
      %447 = vector.load %arg4[%c0_378, %c53, %c0_379, %c0_380] : memref<1x75x16x16xf32, #tpu.memory_space<vmem>>, vector<1x1x16x16xf32>
      %448 = vector.shape_cast %447 : vector<1x1x16x16xf32> to vector<16x16xf32>
      %449 = vector.extract_strided_slice %436 {offsets = [0, 0], sizes = [16, 16], strides = [1, 1]} : vector<20x16xf32> to vector<16x16xf32>
      %450 = arith.mulf %448, %449 : vector<16x16xf32>
      %451 = arith.addf %446, %450 : vector<16x16xf32>
      %c0_381 = arith.constant 0 : index
      %c8 = arith.constant 8 : index
      %c0_382 = arith.constant 0 : index
      %c0_383 = arith.constant 0 : index
      %452 = vector.load %arg4[%c0_381, %c8, %c0_382, %c0_383] : memref<1x75x16x16xf32, #tpu.memory_space<vmem>>, vector<1x1x16x16xf32>
      %453 = vector.shape_cast %452 : vector<1x1x16x16xf32> to vector<16x16xf32>
      %454 = vector.extract_strided_slice %432 {offsets = [1, 0], sizes = [16, 16], strides = [1, 1]} : vector<20x16xf32> to vector<16x16xf32>
      %455 = arith.mulf %453, %454 : vector<16x16xf32>
      %456 = arith.addf %451, %455 : vector<16x16xf32>
      %c0_384 = arith.constant 0 : index
      %c33 = arith.constant 33 : index
      %c0_385 = arith.constant 0 : index
      %c0_386 = arith.constant 0 : index
      %457 = vector.load %arg4[%c0_384, %c33, %c0_385, %c0_386] : memref<1x75x16x16xf32, #tpu.memory_space<vmem>>, vector<1x1x16x16xf32>
      %458 = vector.shape_cast %457 : vector<1x1x16x16xf32> to vector<16x16xf32>
      %459 = vector.extract_strided_slice %434 {offsets = [1, 0], sizes = [16, 16], strides = [1, 1]} : vector<20x16xf32> to vector<16x16xf32>
      %460 = arith.mulf %458, %459 : vector<16x16xf32>
      %461 = arith.addf %456, %460 : vector<16x16xf32>
      %c0_387 = arith.constant 0 : index
      %c58 = arith.constant 58 : index
      %c0_388 = arith.constant 0 : index
      %c0_389 = arith.constant 0 : index
      %462 = vector.load %arg4[%c0_387, %c58, %c0_388, %c0_389] : memref<1x75x16x16xf32, #tpu.memory_space<vmem>>, vector<1x1x16x16xf32>
      %463 = vector.shape_cast %462 : vector<1x1x16x16xf32> to vector<16x16xf32>
      %464 = vector.extract_strided_slice %436 {offsets = [1, 0], sizes = [16, 16], strides = [1, 1]} : vector<20x16xf32> to vector<16x16xf32>
      %465 = arith.mulf %463, %464 : vector<16x16xf32>
      %466 = arith.addf %461, %465 : vector<16x16xf32>
      %c0_390 = arith.constant 0 : index
      %c13 = arith.constant 13 : index
      %c0_391 = arith.constant 0 : index
      %c0_392 = arith.constant 0 : index
      %467 = vector.load %arg4[%c0_390, %c13, %c0_391, %c0_392] : memref<1x75x16x16xf32, #tpu.memory_space<vmem>>, vector<1x1x16x16xf32>
      %468 = vector.shape_cast %467 : vector<1x1x16x16xf32> to vector<16x16xf32>
      %469 = vector.extract_strided_slice %432 {offsets = [2, 0], sizes = [16, 16], strides = [1, 1]} : vector<20x16xf32> to vector<16x16xf32>
      %470 = arith.mulf %468, %469 : vector<16x16xf32>
      %471 = arith.addf %466, %470 : vector<16x16xf32>
      %c0_393 = arith.constant 0 : index
      %c38 = arith.constant 38 : index
      %c0_394 = arith.constant 0 : index
      %c0_395 = arith.constant 0 : index
      %472 = vector.load %arg4[%c0_393, %c38, %c0_394, %c0_395] : memref<1x75x16x16xf32, #tpu.memory_space<vmem>>, vector<1x1x16x16xf32>
      %473 = vector.shape_cast %472 : vector<1x1x16x16xf32> to vector<16x16xf32>
      %474 = vector.extract_strided_slice %434 {offsets = [2, 0], sizes = [16, 16], strides = [1, 1]} : vector<20x16xf32> to vector<16x16xf32>
      %475 = arith.mulf %473, %474 : vector<16x16xf32>
      %476 = arith.addf %471, %475 : vector<16x16xf32>
      %c0_396 = arith.constant 0 : index
      %c63 = arith.constant 63 : index
      %c0_397 = arith.constant 0 : index
      %c0_398 = arith.constant 0 : index
      %477 = vector.load %arg4[%c0_396, %c63, %c0_397, %c0_398] : memref<1x75x16x16xf32, #tpu.memory_space<vmem>>, vector<1x1x16x16xf32>
      %478 = vector.shape_cast %477 : vector<1x1x16x16xf32> to vector<16x16xf32>
      %479 = vector.extract_strided_slice %436 {offsets = [2, 0], sizes = [16, 16], strides = [1, 1]} : vector<20x16xf32> to vector<16x16xf32>
      %480 = arith.mulf %478, %479 : vector<16x16xf32>
      %481 = arith.addf %476, %480 : vector<16x16xf32>
      %c0_399 = arith.constant 0 : index
      %c18 = arith.constant 18 : index
      %c0_400 = arith.constant 0 : index
      %c0_401 = arith.constant 0 : index
      %482 = vector.load %arg4[%c0_399, %c18, %c0_400, %c0_401] : memref<1x75x16x16xf32, #tpu.memory_space<vmem>>, vector<1x1x16x16xf32>
      %483 = vector.shape_cast %482 : vector<1x1x16x16xf32> to vector<16x16xf32>
      %484 = vector.extract_strided_slice %432 {offsets = [3, 0], sizes = [16, 16], strides = [1, 1]} : vector<20x16xf32> to vector<16x16xf32>
      %485 = arith.mulf %483, %484 : vector<16x16xf32>
      %486 = arith.addf %481, %485 : vector<16x16xf32>
      %c0_402 = arith.constant 0 : index
      %c43 = arith.constant 43 : index
      %c0_403 = arith.constant 0 : index
      %c0_404 = arith.constant 0 : index
      %487 = vector.load %arg4[%c0_402, %c43, %c0_403, %c0_404] : memref<1x75x16x16xf32, #tpu.memory_space<vmem>>, vector<1x1x16x16xf32>
      %488 = vector.shape_cast %487 : vector<1x1x16x16xf32> to vector<16x16xf32>
      %489 = vector.extract_strided_slice %434 {offsets = [3, 0], sizes = [16, 16], strides = [1, 1]} : vector<20x16xf32> to vector<16x16xf32>
      %490 = arith.mulf %488, %489 : vector<16x16xf32>
      %491 = arith.addf %486, %490 : vector<16x16xf32>
      %c0_405 = arith.constant 0 : index
      %c68 = arith.constant 68 : index
      %c0_406 = arith.constant 0 : index
      %c0_407 = arith.constant 0 : index
      %492 = vector.load %arg4[%c0_405, %c68, %c0_406, %c0_407] : memref<1x75x16x16xf32, #tpu.memory_space<vmem>>, vector<1x1x16x16xf32>
      %493 = vector.shape_cast %492 : vector<1x1x16x16xf32> to vector<16x16xf32>
      %494 = vector.extract_strided_slice %436 {offsets = [3, 0], sizes = [16, 16], strides = [1, 1]} : vector<20x16xf32> to vector<16x16xf32>
      %495 = arith.mulf %493, %494 : vector<16x16xf32>
      %496 = arith.addf %491, %495 : vector<16x16xf32>
      %c0_408 = arith.constant 0 : index
      %c23 = arith.constant 23 : index
      %c0_409 = arith.constant 0 : index
      %c0_410 = arith.constant 0 : index
      %497 = vector.load %arg4[%c0_408, %c23, %c0_409, %c0_410] : memref<1x75x16x16xf32, #tpu.memory_space<vmem>>, vector<1x1x16x16xf32>
      %498 = vector.shape_cast %497 : vector<1x1x16x16xf32> to vector<16x16xf32>
      %499 = vector.extract_strided_slice %432 {offsets = [4, 0], sizes = [16, 16], strides = [1, 1]} : vector<20x16xf32> to vector<16x16xf32>
      %500 = arith.mulf %498, %499 : vector<16x16xf32>
      %501 = arith.addf %496, %500 : vector<16x16xf32>
      %c0_411 = arith.constant 0 : index
      %c48 = arith.constant 48 : index
      %c0_412 = arith.constant 0 : index
      %c0_413 = arith.constant 0 : index
      %502 = vector.load %arg4[%c0_411, %c48, %c0_412, %c0_413] : memref<1x75x16x16xf32, #tpu.memory_space<vmem>>, vector<1x1x16x16xf32>
      %503 = vector.shape_cast %502 : vector<1x1x16x16xf32> to vector<16x16xf32>
      %504 = vector.extract_strided_slice %434 {offsets = [4, 0], sizes = [16, 16], strides = [1, 1]} : vector<20x16xf32> to vector<16x16xf32>
      %505 = arith.mulf %503, %504 : vector<16x16xf32>
      %506 = arith.addf %501, %505 : vector<16x16xf32>
      %c0_414 = arith.constant 0 : index
      %c73 = arith.constant 73 : index
      %c0_415 = arith.constant 0 : index
      %c0_416 = arith.constant 0 : index
      %507 = vector.load %arg4[%c0_414, %c73, %c0_415, %c0_416] : memref<1x75x16x16xf32, #tpu.memory_space<vmem>>, vector<1x1x16x16xf32>
      %508 = vector.shape_cast %507 : vector<1x1x16x16xf32> to vector<16x16xf32>
      %509 = vector.extract_strided_slice %436 {offsets = [4, 0], sizes = [16, 16], strides = [1, 1]} : vector<20x16xf32> to vector<16x16xf32>
      %510 = arith.mulf %508, %509 : vector<16x16xf32>
      %511 = arith.addf %506, %510 : vector<16x16xf32>
      %512 = arith.index_cast %arg9 : i32 to index
      %c4_417 = arith.constant 4 : index
      %c0_418 = arith.constant 0 : index
      %c0_419 = arith.constant 0 : index
      %513 = vector.load %arg7[%512, %c4_417, %c0_418, %c0_419] : memref<6x5x20x16xf32, #tpu.memory_space<vmem>>, vector<3x1x20x16xf32>
      %514 = vector.shape_cast %513 : vector<3x1x20x16xf32> to vector<3x20x16xf32>
      %515 = vector.extract_strided_slice %514 {offsets = [0, 0, 0], sizes = [1, 20, 16], strides = [1, 1, 1]} : vector<3x20x16xf32> to vector<1x20x16xf32>
      %516 = vector.shape_cast %515 : vector<1x20x16xf32> to vector<20x16xf32>
      %517 = vector.extract_strided_slice %514 {offsets = [1, 0, 0], sizes = [1, 20, 16], strides = [1, 1, 1]} : vector<3x20x16xf32> to vector<1x20x16xf32>
      %518 = vector.shape_cast %517 : vector<1x20x16xf32> to vector<20x16xf32>
      %519 = vector.extract_strided_slice %514 {offsets = [2, 0, 0], sizes = [1, 20, 16], strides = [1, 1, 1]} : vector<3x20x16xf32> to vector<1x20x16xf32>
      %520 = vector.shape_cast %519 : vector<1x20x16xf32> to vector<20x16xf32>
      %c0_420 = arith.constant 0 : index
      %c4_421 = arith.constant 4 : index
      %c0_422 = arith.constant 0 : index
      %c0_423 = arith.constant 0 : index
      %521 = vector.load %arg4[%c0_420, %c4_421, %c0_422, %c0_423] : memref<1x75x16x16xf32, #tpu.memory_space<vmem>>, vector<1x1x16x16xf32>
      %522 = vector.shape_cast %521 : vector<1x1x16x16xf32> to vector<16x16xf32>
      %523 = vector.extract_strided_slice %516 {offsets = [0, 0], sizes = [16, 16], strides = [1, 1]} : vector<20x16xf32> to vector<16x16xf32>
      %524 = arith.mulf %522, %523 : vector<16x16xf32>
      %525 = arith.addf %511, %524 : vector<16x16xf32>
      %c0_424 = arith.constant 0 : index
      %c29 = arith.constant 29 : index
      %c0_425 = arith.constant 0 : index
      %c0_426 = arith.constant 0 : index
      %526 = vector.load %arg4[%c0_424, %c29, %c0_425, %c0_426] : memref<1x75x16x16xf32, #tpu.memory_space<vmem>>, vector<1x1x16x16xf32>
      %527 = vector.shape_cast %526 : vector<1x1x16x16xf32> to vector<16x16xf32>
      %528 = vector.extract_strided_slice %518 {offsets = [0, 0], sizes = [16, 16], strides = [1, 1]} : vector<20x16xf32> to vector<16x16xf32>
      %529 = arith.mulf %527, %528 : vector<16x16xf32>
      %530 = arith.addf %525, %529 : vector<16x16xf32>
      %c0_427 = arith.constant 0 : index
      %c54 = arith.constant 54 : index
      %c0_428 = arith.constant 0 : index
      %c0_429 = arith.constant 0 : index
      %531 = vector.load %arg4[%c0_427, %c54, %c0_428, %c0_429] : memref<1x75x16x16xf32, #tpu.memory_space<vmem>>, vector<1x1x16x16xf32>
      %532 = vector.shape_cast %531 : vector<1x1x16x16xf32> to vector<16x16xf32>
      %533 = vector.extract_strided_slice %520 {offsets = [0, 0], sizes = [16, 16], strides = [1, 1]} : vector<20x16xf32> to vector<16x16xf32>
      %534 = arith.mulf %532, %533 : vector<16x16xf32>
      %535 = arith.addf %530, %534 : vector<16x16xf32>
      %c0_430 = arith.constant 0 : index
      %c9 = arith.constant 9 : index
      %c0_431 = arith.constant 0 : index
      %c0_432 = arith.constant 0 : index
      %536 = vector.load %arg4[%c0_430, %c9, %c0_431, %c0_432] : memref<1x75x16x16xf32, #tpu.memory_space<vmem>>, vector<1x1x16x16xf32>
      %537 = vector.shape_cast %536 : vector<1x1x16x16xf32> to vector<16x16xf32>
      %538 = vector.extract_strided_slice %516 {offsets = [1, 0], sizes = [16, 16], strides = [1, 1]} : vector<20x16xf32> to vector<16x16xf32>
      %539 = arith.mulf %537, %538 : vector<16x16xf32>
      %540 = arith.addf %535, %539 : vector<16x16xf32>
      %c0_433 = arith.constant 0 : index
      %c34 = arith.constant 34 : index
      %c0_434 = arith.constant 0 : index
      %c0_435 = arith.constant 0 : index
      %541 = vector.load %arg4[%c0_433, %c34, %c0_434, %c0_435] : memref<1x75x16x16xf32, #tpu.memory_space<vmem>>, vector<1x1x16x16xf32>
      %542 = vector.shape_cast %541 : vector<1x1x16x16xf32> to vector<16x16xf32>
      %543 = vector.extract_strided_slice %518 {offsets = [1, 0], sizes = [16, 16], strides = [1, 1]} : vector<20x16xf32> to vector<16x16xf32>
      %544 = arith.mulf %542, %543 : vector<16x16xf32>
      %545 = arith.addf %540, %544 : vector<16x16xf32>
      %c0_436 = arith.constant 0 : index
      %c59 = arith.constant 59 : index
      %c0_437 = arith.constant 0 : index
      %c0_438 = arith.constant 0 : index
      %546 = vector.load %arg4[%c0_436, %c59, %c0_437, %c0_438] : memref<1x75x16x16xf32, #tpu.memory_space<vmem>>, vector<1x1x16x16xf32>
      %547 = vector.shape_cast %546 : vector<1x1x16x16xf32> to vector<16x16xf32>
      %548 = vector.extract_strided_slice %520 {offsets = [1, 0], sizes = [16, 16], strides = [1, 1]} : vector<20x16xf32> to vector<16x16xf32>
      %549 = arith.mulf %547, %548 : vector<16x16xf32>
      %550 = arith.addf %545, %549 : vector<16x16xf32>
      %c0_439 = arith.constant 0 : index
      %c14 = arith.constant 14 : index
      %c0_440 = arith.constant 0 : index
      %c0_441 = arith.constant 0 : index
      %551 = vector.load %arg4[%c0_439, %c14, %c0_440, %c0_441] : memref<1x75x16x16xf32, #tpu.memory_space<vmem>>, vector<1x1x16x16xf32>
      %552 = vector.shape_cast %551 : vector<1x1x16x16xf32> to vector<16x16xf32>
      %553 = vector.extract_strided_slice %516 {offsets = [2, 0], sizes = [16, 16], strides = [1, 1]} : vector<20x16xf32> to vector<16x16xf32>
      %554 = arith.mulf %552, %553 : vector<16x16xf32>
      %555 = arith.addf %550, %554 : vector<16x16xf32>
      %c0_442 = arith.constant 0 : index
      %c39 = arith.constant 39 : index
      %c0_443 = arith.constant 0 : index
      %c0_444 = arith.constant 0 : index
      %556 = vector.load %arg4[%c0_442, %c39, %c0_443, %c0_444] : memref<1x75x16x16xf32, #tpu.memory_space<vmem>>, vector<1x1x16x16xf32>
      %557 = vector.shape_cast %556 : vector<1x1x16x16xf32> to vector<16x16xf32>
      %558 = vector.extract_strided_slice %518 {offsets = [2, 0], sizes = [16, 16], strides = [1, 1]} : vector<20x16xf32> to vector<16x16xf32>
      %559 = arith.mulf %557, %558 : vector<16x16xf32>
      %560 = arith.addf %555, %559 : vector<16x16xf32>
      %c0_445 = arith.constant 0 : index
      %c64 = arith.constant 64 : index
      %c0_446 = arith.constant 0 : index
      %c0_447 = arith.constant 0 : index
      %561 = vector.load %arg4[%c0_445, %c64, %c0_446, %c0_447] : memref<1x75x16x16xf32, #tpu.memory_space<vmem>>, vector<1x1x16x16xf32>
      %562 = vector.shape_cast %561 : vector<1x1x16x16xf32> to vector<16x16xf32>
      %563 = vector.extract_strided_slice %520 {offsets = [2, 0], sizes = [16, 16], strides = [1, 1]} : vector<20x16xf32> to vector<16x16xf32>
      %564 = arith.mulf %562, %563 : vector<16x16xf32>
      %565 = arith.addf %560, %564 : vector<16x16xf32>
      %c0_448 = arith.constant 0 : index
      %c19 = arith.constant 19 : index
      %c0_449 = arith.constant 0 : index
      %c0_450 = arith.constant 0 : index
      %566 = vector.load %arg4[%c0_448, %c19, %c0_449, %c0_450] : memref<1x75x16x16xf32, #tpu.memory_space<vmem>>, vector<1x1x16x16xf32>
      %567 = vector.shape_cast %566 : vector<1x1x16x16xf32> to vector<16x16xf32>
      %568 = vector.extract_strided_slice %516 {offsets = [3, 0], sizes = [16, 16], strides = [1, 1]} : vector<20x16xf32> to vector<16x16xf32>
      %569 = arith.mulf %567, %568 : vector<16x16xf32>
      %570 = arith.addf %565, %569 : vector<16x16xf32>
      %c0_451 = arith.constant 0 : index
      %c44 = arith.constant 44 : index
      %c0_452 = arith.constant 0 : index
      %c0_453 = arith.constant 0 : index
      %571 = vector.load %arg4[%c0_451, %c44, %c0_452, %c0_453] : memref<1x75x16x16xf32, #tpu.memory_space<vmem>>, vector<1x1x16x16xf32>
      %572 = vector.shape_cast %571 : vector<1x1x16x16xf32> to vector<16x16xf32>
      %573 = vector.extract_strided_slice %518 {offsets = [3, 0], sizes = [16, 16], strides = [1, 1]} : vector<20x16xf32> to vector<16x16xf32>
      %574 = arith.mulf %572, %573 : vector<16x16xf32>
      %575 = arith.addf %570, %574 : vector<16x16xf32>
      %c0_454 = arith.constant 0 : index
      %c69 = arith.constant 69 : index
      %c0_455 = arith.constant 0 : index
      %c0_456 = arith.constant 0 : index
      %576 = vector.load %arg4[%c0_454, %c69, %c0_455, %c0_456] : memref<1x75x16x16xf32, #tpu.memory_space<vmem>>, vector<1x1x16x16xf32>
      %577 = vector.shape_cast %576 : vector<1x1x16x16xf32> to vector<16x16xf32>
      %578 = vector.extract_strided_slice %520 {offsets = [3, 0], sizes = [16, 16], strides = [1, 1]} : vector<20x16xf32> to vector<16x16xf32>
      %579 = arith.mulf %577, %578 : vector<16x16xf32>
      %580 = arith.addf %575, %579 : vector<16x16xf32>
      %c0_457 = arith.constant 0 : index
      %c24 = arith.constant 24 : index
      %c0_458 = arith.constant 0 : index
      %c0_459 = arith.constant 0 : index
      %581 = vector.load %arg4[%c0_457, %c24, %c0_458, %c0_459] : memref<1x75x16x16xf32, #tpu.memory_space<vmem>>, vector<1x1x16x16xf32>
      %582 = vector.shape_cast %581 : vector<1x1x16x16xf32> to vector<16x16xf32>
      %583 = vector.extract_strided_slice %516 {offsets = [4, 0], sizes = [16, 16], strides = [1, 1]} : vector<20x16xf32> to vector<16x16xf32>
      %584 = arith.mulf %582, %583 : vector<16x16xf32>
      %585 = arith.addf %580, %584 : vector<16x16xf32>
      %c0_460 = arith.constant 0 : index
      %c49 = arith.constant 49 : index
      %c0_461 = arith.constant 0 : index
      %c0_462 = arith.constant 0 : index
      %586 = vector.load %arg4[%c0_460, %c49, %c0_461, %c0_462] : memref<1x75x16x16xf32, #tpu.memory_space<vmem>>, vector<1x1x16x16xf32>
      %587 = vector.shape_cast %586 : vector<1x1x16x16xf32> to vector<16x16xf32>
      %588 = vector.extract_strided_slice %518 {offsets = [4, 0], sizes = [16, 16], strides = [1, 1]} : vector<20x16xf32> to vector<16x16xf32>
      %589 = arith.mulf %587, %588 : vector<16x16xf32>
      %590 = arith.addf %585, %589 : vector<16x16xf32>
      %c0_463 = arith.constant 0 : index
      %c74 = arith.constant 74 : index
      %c0_464 = arith.constant 0 : index
      %c0_465 = arith.constant 0 : index
      %591 = vector.load %arg4[%c0_463, %c74, %c0_464, %c0_465] : memref<1x75x16x16xf32, #tpu.memory_space<vmem>>, vector<1x1x16x16xf32>
      %592 = vector.shape_cast %591 : vector<1x1x16x16xf32> to vector<16x16xf32>
      %593 = vector.extract_strided_slice %520 {offsets = [4, 0], sizes = [16, 16], strides = [1, 1]} : vector<20x16xf32> to vector<16x16xf32>
      %594 = arith.mulf %592, %593 : vector<16x16xf32>
      %595 = arith.addf %590, %594 : vector<16x16xf32>
      %596 = vector.shape_cast %595 : vector<16x16xf32> to vector<1x16x16xf32>
      %c0_466 = arith.constant 0 : index
      %597 = arith.index_cast %arg9 : i32 to index
      %c0_467 = arith.constant 0 : index
      %c0_468 = arith.constant 0 : index
      %598 = vector.load %arg5[%c0_466, %597, %c0_467, %c0_468] : memref<1x4x16x16xf32, #tpu.memory_space<vmem>>, vector<1x1x16x16xf32>
      %599 = vector.shape_cast %598 : vector<1x1x16x16xf32> to vector<1x16x16xf32>
      %600 = vector.shape_cast %596 : vector<1x16x16xf32> to vector<1x1x16x16xf32>
      tpu.vector_store %arg5[%c0_466, %597, %c0_467, %c0_468], %600 {strides = array<i32>} : memref<1x4x16x16xf32, #tpu.memory_space<vmem>>, vector<1x1x16x16xf32>,
    }
    %c4_i32_218 = arith.constant 4 : i32
    return
  }
  func.func @transform_1(%arg0: i32, %arg1: i32, %arg2: i32) -> (i32, i32, i32, i32) {
    %c1_i32 = arith.constant 1 : i32
    %0 = arith.muli %arg1, %c1_i32 : i32
    %1 = arith.addi %0, %arg2 : i32
    %c0_i32 = arith.constant 0 : i32
    %c0_i32_0 = arith.constant 0 : i32
    %c0_i32_1 = arith.constant 0 : i32
    return %arg0, %c0_i32, %1, %c0_i32_0 : i32, i32, i32, i32
  }
  func.func @transform_2(%arg0: i32, %arg1: i32, %arg2: i32) -> (i32, i32, i32, i32) {
    %c1_i32 = arith.constant 1 : i32
    %0 = arith.muli %arg1, %c1_i32 : i32
    %1 = arith.addi %0, %arg2 : i32
    %c0_i32 = arith.constant 0 : i32
    %c0_i32_0 = arith.constant 0 : i32
    %c0_i32_1 = arith.constant 0 : i32
    return %arg0, %c0_i32, %1, %c0_i32_0 : i32, i32, i32, i32
  }
}

</mosaic_0001>

<bundles_post_ra>
// kernel: tpu_custom_call.1
= control target key start
LH: loop header
LB: loop body
LE: loop exit
PB: predicated region body
PF: predicated region fallthrough
CT: control target
= control target key end

     0   :  { %7 = vsyncpa [#allocation6], 0  ;;  %s3370_s0 = inlined_call_operand.vmem [shape: f32[2,4,20,128], index: 0, kind: input, shape index: {}]   ;;  %s3371_s1 = inlined_call_operand.vmem [shape: f32[2,75,16,16], index: 1, kind: input, shape index: {}]   ;;  %s3372_s2 = inlined_call_operand.hbm [shape: f32[2,4,16,16], index: 2, kind: output, shape index: {}]  }
   0x1   :  { %9 = vsyncpa [#allocation6 + $0x1], 0  ;;  %s2452_s9 = smov 0   ;;  %s2454_s10 = smov 0  }
   0x2   :  { %s2456_s11 = smov 0   ;;  %s2458_s12 = smov 0  }
   0x3   :  { %s2460_s13 = smov 0   ;;  %s2462_s14 = smov 0  }
   0x4 LB: > { %s1983_s15 = sadd.s32 4294967295, %s2423_s14   ;;  %s1984_s16 = sadd.s32 4294967294, %s2423_s14   ;;  %s2423_s14 = sphi %s2462_s14, %s15_s14   ;;  %s2419_s13 = sphi %s2460_s13, %s3379_s13   ;;  %s2415_s12 = sphi %s2458_s12, %s3378_s12   ;;  %s2411_s11 = sphi %s2456_s11, %s3377_s11   ;;  %s2407_s10 = sphi %s2454_s10, %s3376_s10   ;;  %s2403_s9 = sphi %s2452_s9, %s3375_s9  }
   0x5   : > { %s34_s17 = sadd.s32 1, %s2419_s13  ;;  %s75_s18 = sadd.s32 1, %s2411_s11 }
   0x6   : > { %p36_p0 = scmp.ge.s32.totalorder %s34_s17, 2  ;;  %p85_p1 = scmp.ne.s32.totalorder %s2411_s11, %s2407_s10 }
   0x7   : > { %p86_p2 = scmp.eq.s32.totalorder %s1983_s15, 1  ;;  %p91_p3 = scmp.ne.s32.totalorder %s2407_s10, %s2403_s9 }
   0x8   : > { %s3381_s17 = smov (%p36_p0, %s34_s17), 0  ;;  %p92_p5 = scmp.eq.s32.totalorder %s1984_s16, 1 }
   0x9   : > { %p2492_p4 = por %p86_p2, %p85_p1  ;;  %s70_s20 = ssub.s32 %s2419_s13, %s3381_s17 }
   0xa   : > { %p1987_p6 = scmp.ge.s32.totalorder %s2423_s14, 1  ;;  %p73_p7 = scmp.eq.s32.totalorder %s70_s20, 0 }
   0xb   : > { %p2499_p8 = por %p92_p5, %p91_p3  ;;  %p125_p9 = scmp.lt.s32.totalorder %s2423_s14, 3 }
   0xc   : > { %s2505_s22 = scalar_select %p73_p7, %s2411_s11, %s75_s18  }
   0xd   : > { %p126_p10 = pnand %p1987_p6, %p125_p9 }
   0xe   : > { %s147_s23 = sand.u32 (!%p126_p10), 1, %s2407_s10   ;;  %p152_p11 = scmp.lt.s32.totalorder (!%p126_p10), %s2415_s12, 1 }
   0xf   : > { %129 = sbr.rel (%p126_p10) target bundleno = 416 (0x1a0), region = 24  ;;  %s2511_s24 = sshll.u32 (!%p126_p10), %s147_s23, 6 }
  0x10   : > { %s182_s25 = smul.u32 (!%p126_p10), 96, %s2415_s12  ;;  %s149_s6 = scalar_lea.vmem (!%p126_p10), [#allocation5], %s2511_s24 }
  0x12   : > { %s184_s29 = scalar_lea.vmem (!%p126_p10), %s3370_s0, %s182_s25 }
  0x14   : > { %s153_s26 = scalar_select %p152_p11, %s2415_s12, 1  ;;  %v232_v0 = vld [vmem:[%s184_s29] sm:$0xff]  ;;  %v234_v1 = vld [vmem:[%s184_s29 + $0x8] sm:$0xff]  ;;  %v236_v2 = vld [vmem:[%s184_s29 + $0x18] sm:$0xff] }
  0x15   : > { %233 = vst [vmem:[#allocation2 + $0x48] sm:$0xff] %v232_v0  ;;  %235 = vst [vmem:[#allocation2] sm:$0xff] %v234_v1  ;;  %v238_v3 = vld [vmem:[%s184_s29 + $0x20] sm:$0xff]  ;;  %v240_v4 = vld [vmem:[%s184_s29 + $0x30] sm:$0xff] }
  0x16   : > { %s2270_s30 = smul.u32 1200, %s153_s26  ;;  %237 = vst [vmem:[#allocation2 + $0x58] sm:$0xff] %v236_v2  ;;  %v242_v5 = vld [vmem:[%s184_s29 + $0x38] sm:$0xff]  ;;  %239 = vst [vmem:[#allocation2 + $0x20] sm:$0xff] %v238_v3  ;;  %v244_v6 = vld [vmem:[%s184_s29 + $0x48] sm:$0xff] }
  0x17   : > { %241 = vst [vmem:[#allocation2 + $0x40] sm:$0xff] %v240_v4  ;;  %243 = vst [vmem:[#allocation2 + $0x30] sm:$0xff] %v242_v5  ;;  %v246_v7 = vld [vmem:[%s184_s29 + $0x50] sm:$0xff]  ;;  %v1992_v9 = vld [vmem:[%s184_s29 + $0x28] sm:$0xf] }
  0x18   : > { %s2521_s5 = scalar_lea.vmem %s3371_s1, %s2270_s30  ;;  %v1990_v8 = vld [vmem:[%s184_s29 + $0x10] sm:$0xf]  ;;  %245 = vst [vmem:[#allocation2 + $0x8] sm:$0xff] %v244_v6  ;;  %247 = vst [vmem:[#allocation2 + $0x50] sm:$0xff] %v246_v7  ;;  %v1994_v10 = vld [vmem:[%s184_s29 + $0x40] sm:$0xf] }
  0x19   : > { %1991 = vst [vmem:[#allocation2 + $0x38] sm:$0xf] %v1990_v8  ;;  %v1996_v11 = vld [vmem:[%s184_s29 + $0x58] sm:$0xf]  ;;  %1993 = vst [vmem:[#allocation2 + $0x28] sm:$0xf] %v1992_v9 }
  0x1a   : > { %1995 = vst [vmem:[#allocation2 + $0x18] sm:$0xf] %v1994_v10  ;;  %1997 = vst [vmem:[#allocation2 + $0x10] sm:$0xf] %v1996_v11 }
  0x1b   : > { %269 = vsyncadd [#allocation4], 1280 }
  0x1c   : > { %2395 = dma.done.wait [#allocation4], 1280 }
  0x1d   : > { %2396 = vsyncadd [#allocation4], 4294966016  ;;  %vm374_vm0 = vcmask 130048   ;;  %vm377_vm1 = vcmask 125952   ;;  %v2429_v12 = vmov 0.0   ;;  %v2554_v13 = vld [vmem:[#allocation2 + $0x48] sm:$0xff] }
  0x1e   : > { %375 = vst.msk [vmem:[#allocation3] sm:$0xff] %vm374_vm0, %v2429_v12  ;;  %376 = vst.msk [vmem:[#allocation3 + $0x8] sm:$0xff] %vm374_vm0, %v2429_v12  ;;  %v2556_v14 = vld [vmem:[#allocation2] sm:$0xff]  ;;  %v2558_v15 = vld [vmem:[#allocation2 + $0x58] sm:$0xff]  ;;  %s2430_s7 = smov 127   ;;  %s2431_s8 = smov 126  }
  0x1f   : > { %379 = vst.msk [vmem:[#allocation3 + $0x18] sm:$0xff] %vm374_vm0, %v2429_v12  ;;  %380 = vst.msk [vmem:[#allocation3 + $0x20] sm:$0xff] %vm374_vm0, %v2429_v12  ;;  %v2564_v16 = vld [vmem:[#allocation2 + $0x20] sm:$0xff]  ;;  %v2570_v18 = vld [vmem:[#allocation2 + $0x30] sm:$0xff]  ;;  %444 = vrot.lane.b32.xlu0 %v2554_v13, %s2430_s7  ;;  %s2432_s15 = smov 125   ;;  %s2433_s16 = smov 124  }
  0x20   : > { %382 = vst.msk [vmem:[#allocation3 + $0x30] sm:$0xff] %vm374_vm0, %v2429_v12  ;;  %383 = vst.msk [vmem:[#allocation3 + $0x38] sm:$0xff] %vm374_vm0, %v2429_v12  ;;  %v2568_v17 = vld [vmem:[#allocation2 + $0x40] sm:$0xff]  ;;  %v2580_v19 = vld [vmem:[#allocation2 + $0x8] sm:$0xff]  ;;  %s2682_s18 = smov 0  }
  0x21   : > { %385 = vst.msk [vmem:[#allocation3 + $0x48] sm:$0xff] %vm374_vm0, %v2429_v12  ;;  %386 = vst.msk [vmem:[#allocation3 + $0x50] sm:$0xff] %vm374_vm0, %v2429_v12  ;;  %v2582_v20 = vld [vmem:[#allocation2 + $0x50] sm:$0xff]  ;;  %v440_v21 = vld [vmem:[#allocation2 + $0x38] sm:$0xf] }
  0x22   : > { %388 = vst.msk [vmem:[#allocation3 + $0x60] sm:$0xff] %vm374_vm0, %v2429_v12  ;;  %389 = vst.msk [vmem:[#allocation3 + $0x68] sm:$0xff] %vm374_vm0, %v2429_v12  ;;  %448 = vrot.lane.b32.xlu1 %v440_v21, %s2430_s7  ;;  %v2043_v22 = vld [vmem:[#allocation2 + $0x28] sm:$0xf]  ;;  %v409_v23 = vld [vmem:[#allocation2 + $0x38] sm:$0xf] }
  0x23   : > { %392 = vst.msk [vmem:[#allocation3 + $0x258] sm:$0xff] %vm374_vm0, %v2429_v12  ;;  %393 = vst.msk [vmem:[#allocation3 + $0x260] sm:$0xff] %vm374_vm0, %v2429_v12  ;;  %446 = vrot.lane.b32.xlu0 %v2556_v14, %s2430_s7  ;;  %v2034_v24 = vld [vmem:[#allocation2 + $0x28] sm:$0xf]  ;;  %v2037_v25 = vld [vmem:[#allocation2 + $0x18] sm:$0xf] }
  0x24   : > { %395 = vst.msk [vmem:[#allocation3 + $0x270] sm:$0xff] %vm374_vm0, %v2429_v12  ;;  %396 = vst.msk [vmem:[#allocation3 + $0x278] sm:$0xff] %vm374_vm0, %v2429_v12  ;;  %v2040_v26 = vld [vmem:[#allocation2 + $0x10] sm:$0xf]  ;;  %v2046_v27 = vld [vmem:[#allocation2 + $0x18] sm:$0xf] }
  0x25   : > { %398 = vst.msk [vmem:[#allocation3 + $0x288] sm:$0xff] %vm374_vm0, %v2429_v12  ;;  %399 = vst.msk [vmem:[#allocation3 + $0x290] sm:$0xff] %vm374_vm0, %v2429_v12  ;;  %v2049_v28 = vld [vmem:[#allocation2 + $0x10] sm:$0xf]  ;;  %v516_v29 = vld [vmem:[#allocation2 + $0x38] sm:$0xf] }
  0x26   : > { %401 = vst.msk [vmem:[#allocation3 + $0x2a0] sm:$0xff] %vm374_vm0, %v2429_v12  ;;  %402 = vst.msk [vmem:[#allocation3 + $0x2a8] sm:$0xff] %vm374_vm0, %v2429_v12  ;;  %463 = vrot.lane.b32.xlu1 %v2558_v15, %s2430_s7  ;;  %v2052_v30 = vld [vmem:[#allocation2 + $0x28] sm:$0xf]  ;;  %v2055_v31 = vld [vmem:[#allocation2 + $0x18] sm:$0xf] }
  0x27   : > { %404 = vst.msk [vmem:[#allocation3 + $0x2b8] sm:$0xff] %vm374_vm0, %v2429_v12  ;;  %405 = vst.msk [vmem:[#allocation3 + $0x2c0] sm:$0xff] %vm374_vm0, %v2429_v12  ;;  %465 = vrot.lane.b32.xlu0 %v2564_v16, %s2430_s7  ;;  %v2058_v32 = vld [vmem:[#allocation2 + $0x10] sm:$0xf]  ;;  %v592_v33 = vld [vmem:[#allocation2 + $0x38] sm:$0xf] }
  0x28   : > { %378 = vst.msk [vmem:[#allocation3 + $0x10] sm:$0xf] %vm377_vm1, %v2429_v12  ;;  %381 = vst.msk [vmem:[#allocation3 + $0x28] sm:$0xf] %vm377_vm1, %v2429_v12  ;;  %v2061_v34 = vld [vmem:[#allocation2 + $0x28] sm:$0xf] }
  0x29   : > { %384 = vst.msk [vmem:[#allocation3 + $0x40] sm:$0xf] %vm377_vm1, %v2429_v12  ;;  %387 = vst.msk [vmem:[#allocation3 + $0x58] sm:$0xf] %vm377_vm1, %v2429_v12  ;;  %v2064_v35 = vld [vmem:[#allocation2 + $0x18] sm:$0xf] }
  0x2a   : > { %390 = vst.msk [vmem:[#allocation3 + $0x70] sm:$0xf] %vm377_vm1, %v2429_v12  ;;  %394 = vst.msk [vmem:[#allocation3 + $0x268] sm:$0xf] %vm377_vm1, %v2429_v12  ;;  %467 = vrot.lane.b32.xlu1 %v2043_v22, %s2430_s7  ;;  %v2067_v36 = vld [vmem:[#allocation2 + $0x10] sm:$0xf] }
  0x2b   : > { %397 = vst.msk [vmem:[#allocation3 + $0x280] sm:$0xf] %vm377_vm1, %v2429_v12  ;;  %400 = vst.msk [vmem:[#allocation3 + $0x298] sm:$0xf] %vm377_vm1, %v2429_v12  ;;  %482 = vrot.lane.b32.xlu0 %v2568_v17, %s2430_s7  ;;  %v668_v37 = vld [vmem:[#allocation2 + $0x38] sm:$0xf] }
  0x2c   : > { %403 = vst.msk [vmem:[#allocation3 + $0x2b0] sm:$0xf] %vm377_vm1, %v2429_v12  ;;  %406 = vst.msk [vmem:[#allocation3 + $0x2c8] sm:$0xf] %vm377_vm1, %v2429_v12  ;;  %v2070_v38 = vld [vmem:[#allocation2 + $0x28] sm:$0xf] }
  0x2d   : > { %411 = vst.msk [vmem:[#allocation3 + $0x78] sm:$0xff] %vm374_vm0, %v2554_v13  ;;  %412 = vst.msk [vmem:[#allocation3 + $0x80] sm:$0xff] %vm374_vm0, %v2556_v14  ;;  %v2073_v39 = vld [vmem:[#allocation2 + $0x18] sm:$0xf]  ;;  %v2076_v40 = vld [vmem:[#allocation2 + $0x10] sm:$0xf] }
  0x2e   : > { %419 = vst.msk [vmem:[#allocation3 + $0xf0] sm:$0xff] %vm374_vm0, %v2558_v15  ;;  %420 = vst.msk [vmem:[#allocation3 + $0xf8] sm:$0xff] %vm374_vm0, %v2564_v16  ;;  %484 = vrot.lane.b32.xlu1 %v2570_v18, %s2430_s7 }
  0x2f   : > { %427 = vst.msk [vmem:[#allocation3 + $0x168] sm:$0xff] %vm374_vm0, %v2568_v17  ;;  %428 = vst.msk [vmem:[#allocation3 + $0x170] sm:$0xff] %vm374_vm0, %v2570_v18  ;;  %486 = vrot.lane.b32.xlu0 %v2046_v27, %s2430_s7 }
  0x30   : > { %435 = vst.msk [vmem:[#allocation3 + $0x1e0] sm:$0xff] %vm374_vm0, %v2580_v19  ;;  %436 = vst.msk [vmem:[#allocation3 + $0x1e8] sm:$0xff] %vm374_vm0, %v2582_v20 }
  0x31   : > { %413 = vst.msk [vmem:[#allocation3 + $0x88] sm:$0xf] %vm377_vm1, %v409_v23  ;;  %421 = vst.msk [vmem:[#allocation3 + $0x100] sm:$0xf] %vm377_vm1, %v2034_v24 }
  0x32   : > { %429 = vst.msk [vmem:[#allocation3 + $0x178] sm:$0xf] %vm377_vm1, %v2037_v25  ;;  %437 = vst.msk [vmem:[#allocation3 + $0x1f0] sm:$0xf] %vm377_vm1, %v2040_v26  ;;  %501 = vrot.lane.b32.xlu1 %v2580_v19, %s2430_s7 }
  0x33   : > { %503 = vrot.lane.b32.xlu0 %v2582_v20, %s2430_s7 }
  0x36   : > { %505 = vrot.lane.b32.xlu1 %v2049_v28, %s2430_s7 }
  0x37   : > { %520 = vrot.lane.b32.xlu0 %v2554_v13, %s2431_s8 }
  0x3a   : > { %522 = vrot.lane.b32.xlu1 %v2556_v14, %s2431_s8 }
  0x3b   : > { %524 = vrot.lane.b32.xlu0 %v516_v29, %s2431_s8 }
  0x3e   : > { %539 = vrot.lane.b32.xlu1 %v2558_v15, %s2431_s8 }
  0x3f   : > { %541 = vrot.lane.b32.xlu0 %v2564_v16, %s2431_s8 }
  0x42   : > { %543 = vrot.lane.b32.xlu1 %v2052_v30, %s2431_s8 }
  0x43   : > { %558 = vrot.lane.b32.xlu0 %v2568_v17, %s2431_s8 }
  0x46   : > { %560 = vrot.lane.b32.xlu1 %v2570_v18, %s2431_s8 }
  0x47   : > { %562 = vrot.lane.b32.xlu0 %v2055_v31, %s2431_s8 }
  0x4a   : > { %577 = vrot.lane.b32.xlu1 %v2580_v19, %s2431_s8 }
  0x4b   : > { %579 = vrot.lane.b32.xlu0 %v2582_v20, %s2431_s8 }
  0x4e   : > { %581 = vrot.lane.b32.xlu1 %v2058_v32, %s2431_s8 }
  0x4f   : > { %596 = vrot.lane.b32.xlu0 %v2554_v13, %s2432_s15 }
  0x52   : > { %598 = vrot.lane.b32.xlu1 %v2556_v14, %s2432_s15 }
  0x53   : > { %600 = vrot.lane.b32.xlu0 %v592_v33, %s2432_s15 }
  0x56   : > { %615 = vrot.lane.b32.xlu1 %v2558_v15, %s2432_s15 }
  0x57   : > { %617 = vrot.lane.b32.xlu0 %v2564_v16, %s2432_s15 }
  0x5a   : > { %619 = vrot.lane.b32.xlu1 %v2061_v34, %s2432_s15 }
  0x5b   : > { %634 = vrot.lane.b32.xlu0 %v2568_v17, %s2432_s15 }
  0x5e   : > { %636 = vrot.lane.b32.xlu1 %v2570_v18, %s2432_s15 }
  0x5f   : > { %638 = vrot.lane.b32.xlu0 %v2064_v35, %s2432_s15 }
  0x62   : > { %653 = vrot.lane.b32.xlu1 %v2580_v19, %s2432_s15 }
  0x63   : > { %655 = vrot.lane.b32.xlu0 %v2582_v20, %s2432_s15 }
  0x66   : > { %657 = vrot.lane.b32.xlu1 %v2067_v36, %s2432_s15 }
  0x67   : > { %672 = vrot.lane.b32.xlu0 %v2554_v13, %s2433_s16 }
  0x6a   : > { %674 = vrot.lane.b32.xlu1 %v2556_v14, %s2433_s16 }
  0x6b   : > { %676 = vrot.lane.b32.xlu0 %v668_v37, %s2433_s16 }
  0x6e   : > { %691 = vrot.lane.b32.xlu1 %v2558_v15, %s2433_s16 }
  0x6f   : > { %693 = vrot.lane.b32.xlu0 %v2564_v16, %s2433_s16 }
  0x72   : > { %695 = vrot.lane.b32.xlu1 %v2070_v38, %s2433_s16 }
  0x73   : > { %710 = vrot.lane.b32.xlu0 %v2568_v17, %s2433_s16 }
  0x76   : > { %712 = vrot.lane.b32.xlu1 %v2570_v18, %s2433_s16 }
  0x77   : > { %714 = vrot.lane.b32.xlu0 %v2073_v39, %s2433_s16 }
  0x7a   : > { %729 = vrot.lane.b32.xlu1 %v2580_v19, %s2433_s16 }
  0x7b   : > { %731 = vrot.lane.b32.xlu0 %v2582_v20, %s2433_s16 }
  0x7e   : > { %733 = vrot.lane.b32.xlu1 %v2076_v40, %s2433_s16 }
  0x91   : > { %v445_v41 = vpop.permute.xlu0 %444 }
  0x92   : > { %454 = vst.msk [vmem:[#allocation3 + $0x90] sm:$0xff] %vm374_vm0, %v445_v41 }
  0x94   : > { %v449_v42 = vpop.permute.xlu1 %448 }
  0x95   : > { %456 = vst.msk [vmem:[#allocation3 + $0xa0] sm:$0xf] %vm377_vm1, %v449_v42  ;;  %v447_v43 = vpop.permute.xlu0 %446 }
  0x96   : > { %455 = vst.msk [vmem:[#allocation3 + $0x98] sm:$0xff] %vm374_vm0, %v447_v43 }
  0x98   : > { %v464_v44 = vpop.permute.xlu1 %463 }
  0x99   : > { %473 = vst.msk [vmem:[#allocation3 + $0x108] sm:$0xff] %vm374_vm0, %v464_v44  ;;  %v466_v45 = vpop.permute.xlu0 %465 }
  0x9a   : > { %474 = vst.msk [vmem:[#allocation3 + $0x110] sm:$0xff] %vm374_vm0, %v466_v45 }
  0x9c   : > { %v468_v46 = vpop.permute.xlu1 %467 }
  0x9d   : > { %475 = vst.msk [vmem:[#allocation3 + $0x118] sm:$0xf] %vm377_vm1, %v468_v46  ;;  %v483_v47 = vpop.permute.xlu0 %482 }
  0x9e   : > { %492 = vst.msk [vmem:[#allocation3 + $0x180] sm:$0xff] %vm374_vm0, %v483_v47 }
  0xa0   : > { %v485_v48 = vpop.permute.xlu1 %484 }
  0xa1   : > { %493 = vst.msk [vmem:[#allocation3 + $0x188] sm:$0xff] %vm374_vm0, %v485_v48  ;;  %v487_v49 = vpop.permute.xlu0 %486 }
  0xa2   : > { %494 = vst.msk [vmem:[#allocation3 + $0x190] sm:$0xf] %vm377_vm1, %v487_v49 }
  0xa4   : > { %v502_v50 = vpop.permute.xlu1 %501 }
  0xa5   : > { %511 = vst.msk [vmem:[#allocation3 + $0x1f8] sm:$0xff] %vm374_vm0, %v502_v50  ;;  %v504_v51 = vpop.permute.xlu0 %503 }
  0xa6   : > { %512 = vst.msk [vmem:[#allocation3 + $0x200] sm:$0xff] %vm374_vm0, %v504_v51 }
  0xa8   : > { %v506_v52 = vpop.permute.xlu1 %505 }
  0xa9   : > { %513 = vst.msk [vmem:[#allocation3 + $0x208] sm:$0xf] %vm377_vm1, %v506_v52  ;;  %v521_v53 = vpop.permute.xlu0 %520 }
  0xaa   : > { %530 = vst.msk [vmem:[#allocation3 + $0xa8] sm:$0xff] %vm374_vm0, %v521_v53 }
  0xac   : > { %v523_v54 = vpop.permute.xlu1 %522 }
  0xad   : > { %531 = vst.msk [vmem:[#allocation3 + $0xb0] sm:$0xff] %vm374_vm0, %v523_v54  ;;  %v525_v55 = vpop.permute.xlu0 %524 }
  0xae   : > { %532 = vst.msk [vmem:[#allocation3 + $0xb8] sm:$0xf] %vm377_vm1, %v525_v55 }
  0xb0   : > { %v540_v56 = vpop.permute.xlu1 %539 }
  0xb1   : > { %549 = vst.msk [vmem:[#allocation3 + $0x120] sm:$0xff] %vm374_vm0, %v540_v56  ;;  %v542_v57 = vpop.permute.xlu0 %541 }
  0xb2   : > { %550 = vst.msk [vmem:[#allocation3 + $0x128] sm:$0xff] %vm374_vm0, %v542_v57 }
  0xb4   : > { %v544_v58 = vpop.permute.xlu1 %543 }
  0xb5   : > { %551 = vst.msk [vmem:[#allocation3 + $0x130] sm:$0xf] %vm377_vm1, %v544_v58  ;;  %v559_v59 = vpop.permute.xlu0 %558 }
  0xb6   : > { %568 = vst.msk [vmem:[#allocation3 + $0x198] sm:$0xff] %vm374_vm0, %v559_v59 }
  0xb8   : > { %v561_v60 = vpop.permute.xlu1 %560 }
  0xb9   : > { %569 = vst.msk [vmem:[#allocation3 + $0x1a0] sm:$0xff] %vm374_vm0, %v561_v60  ;;  %v563_v61 = vpop.permute.xlu0 %562 }
  0xba   : > { %570 = vst.msk [vmem:[#allocation3 + $0x1a8] sm:$0xf] %vm377_vm1, %v563_v61 }
  0xbc   : > { %v578_v62 = vpop.permute.xlu1 %577 }
  0xbd   : > { %587 = vst.msk [vmem:[#allocation3 + $0x210] sm:$0xff] %vm374_vm0, %v578_v62  ;;  %v580_v63 = vpop.permute.xlu0 %579 }
  0xbe   : > { %588 = vst.msk [vmem:[#allocation3 + $0x218] sm:$0xff] %vm374_vm0, %v580_v63 }
  0xc0   : > { %v582_v0 = vpop.permute.xlu1 %581 }
  0xc1   : > { %589 = vst.msk [vmem:[#allocation3 + $0x220] sm:$0xf] %vm377_vm1, %v582_v0  ;;  %v597_v1 = vpop.permute.xlu0 %596 }
  0xc2   : > { %606 = vst.msk [vmem:[#allocation3 + $0xc0] sm:$0xff] %vm374_vm0, %v597_v1 }
  0xc4   : > { %v599_v2 = vpop.permute.xlu1 %598 }
  0xc5   : > { %607 = vst.msk [vmem:[#allocation3 + $0xc8] sm:$0xff] %vm374_vm0, %v599_v2  ;;  %v601_v3 = vpop.permute.xlu0 %600 }
  0xc6   : > { %608 = vst.msk [vmem:[#allocation3 + $0xd0] sm:$0xf] %vm377_vm1, %v601_v3 }
  0xc8   : > { %v616_v4 = vpop.permute.xlu1 %615 }
  0xc9   : > { %625 = vst.msk [vmem:[#allocation3 + $0x138] sm:$0xff] %vm374_vm0, %v616_v4  ;;  %v618_v5 = vpop.permute.xlu0 %617 }
  0xca   : > { %626 = vst.msk [vmem:[#allocation3 + $0x140] sm:$0xff] %vm374_vm0, %v618_v5 }
  0xcc   : > { %v620_v6 = vpop.permute.xlu1 %619 }
  0xcd   : > { %627 = vst.msk [vmem:[#allocation3 + $0x148] sm:$0xf] %vm377_vm1, %v620_v6  ;;  %v635_v7 = vpop.permute.xlu0 %634 }
  0xce   : > { %644 = vst.msk [vmem:[#allocation3 + $0x1b0] sm:$0xff] %vm374_vm0, %v635_v7 }
  0xd0   : > { %v637_v8 = vpop.permute.xlu1 %636 }
  0xd1   : > { %645 = vst.msk [vmem:[#allocation3 + $0x1b8] sm:$0xff] %vm374_vm0, %v637_v8  ;;  %v639_v9 = vpop.permute.xlu0 %638 }
  0xd2   : > { %646 = vst.msk [vmem:[#allocation3 + $0x1c0] sm:$0xf] %vm377_vm1, %v639_v9 }
  0xd4   : > { %v654_v10 = vpop.permute.xlu1 %653 }
  0xd5   : > { %663 = vst.msk [vmem:[#allocation3 + $0x228] sm:$0xff] %vm374_vm0, %v654_v10  ;;  %v656_v11 = vpop.permute.xlu0 %655 }
  0xd6   : > { %664 = vst.msk [vmem:[#allocation3 + $0x230] sm:$0xff] %vm374_vm0, %v656_v11 }
  0xd8   : > { %v658_v12 = vpop.permute.xlu1 %657 }
  0xd9   : > { %665 = vst.msk [vmem:[#allocation3 + $0x238] sm:$0xf] %vm377_vm1, %v658_v12  ;;  %v673_v13 = vpop.permute.xlu0 %672 }
  0xda   : > { %682 = vst.msk [vmem:[#allocation3 + $0xd8] sm:$0xff] %vm374_vm0, %v673_v13 }
  0xdc   : > { %v675_v14 = vpop.permute.xlu1 %674 }
  0xdd   : > { %683 = vst.msk [vmem:[#allocation3 + $0xe0] sm:$0xff] %vm374_vm0, %v675_v14  ;;  %v677_v15 = vpop.permute.xlu0 %676 }
  0xde   : > { %684 = vst.msk [vmem:[#allocation3 + $0xe8] sm:$0xf] %vm377_vm1, %v677_v15 }
  0xe0   : > { %v692_v16 = vpop.permute.xlu1 %691 }
  0xe1   : > { %701 = vst.msk [vmem:[#allocation3 + $0x150] sm:$0xff] %vm374_vm0, %v692_v16  ;;  %v694_v17 = vpop.permute.xlu0 %693 }
  0xe2   : > { %702 = vst.msk [vmem:[#allocation3 + $0x158] sm:$0xff] %vm374_vm0, %v694_v17 }
  0xe4   : > { %v696_v18 = vpop.permute.xlu1 %695 }
  0xe5   : > { %703 = vst.msk [vmem:[#allocation3 + $0x160] sm:$0xf] %vm377_vm1, %v696_v18  ;;  %v711_v19 = vpop.permute.xlu0 %710 }
  0xe6   : > { %720 = vst.msk [vmem:[#allocation3 + $0x1c8] sm:$0xff] %vm374_vm0, %v711_v19 }
  0xe8   : > { %v713_v20 = vpop.permute.xlu1 %712 }
  0xe9   : > { %721 = vst.msk [vmem:[#allocation3 + $0x1d0] sm:$0xff] %vm374_vm0, %v713_v20  ;;  %v715_v21 = vpop.permute.xlu0 %714 }
  0xea   : > { %722 = vst.msk [vmem:[#allocation3 + $0x1d8] sm:$0xf] %vm377_vm1, %v715_v21 }
  0xec   : > { %v730_v22 = vpop.permute.xlu1 %729 }
  0xed   : > { %739 = vst.msk [vmem:[#allocation3 + $0x240] sm:$0xff] %vm374_vm0, %v730_v22  ;;  %v732_v23 = vpop.permute.xlu0 %731 }
  0xee   : > { %740 = vst.msk [vmem:[#allocation3 + $0x248] sm:$0xff] %vm374_vm0, %v732_v23 }
  0xf0   : > { %v734_v24 = vpop.permute.xlu1 %733 }
  0xf1   : > { %741 = vst.msk [vmem:[#allocation3 + $0x250] sm:$0xf] %vm377_vm1, %v734_v24 }
  0xf2 LB: >> { %s748_s20 = smul.u32 120, %s2427_s18  ;;  %v759_v25 = vld [vmem:[%s2521_s5] sm:$0xff]  ;;  %v760_v26 = vld [vmem:[%s2521_s5 + $0x8] sm:$0xff]  ;;  %v2077_v27 = vld [vmem:[%s2521_s5 + $0x190] sm:$0xff]  ;;  %vm785_vm2 = vcmask 1046528   ;;  %vm834_vm3 = vcmask 1045504   ;;  %s2427_s18 = sphi %s2682_s18, %s747_s18  }
  0xf3   : >> { %v2078_v28 = vld [vmem:[%s2521_s5 + $0x198] sm:$0xff]  ;;  %v2079_v29 = vld [vmem:[%s2521_s5 + $0x320] sm:$0xff]  ;;  %v2080_v30 = vld [vmem:[%s2521_s5 + $0x328] sm:$0xff]  ;;  %vm877_vm4 = vcmask 1044480   ;;  %vm920_vm5 = vcmask 1043456   ;;  %s2261_s26 = sshll.u32 %s2427_s18, 4 }
  0xf4   : >> { %v2081_v31 = vld [vmem:[%s2521_s5 + $0x50] sm:$0xff]  ;;  %s2695_s25 = scalar_lea.vmem [#allocation3], %s748_s20  ;;  %v2082_v39 = vld [vmem:[%s2521_s5 + $0x58] sm:$0xff]  ;;  %v2083_v52 = vld [vmem:[%s2521_s5 + $0x1e0] sm:$0xff]  ;;  %s1797_s27 = scalar_lea.vmem %s149_s6, %s2261_s26 [#allocation5] }
  0xf5   : >> { %v2084_v60 = vld [vmem:[%s2521_s5 + $0x1e8] sm:$0xff]  ;;  %v2085_v3 = vld [vmem:[%s2521_s5 + $0x370] sm:$0xff]  ;;  %v2086_v6 = vld [vmem:[%s2521_s5 + $0x378] sm:$0xff]  ;;  %s747_s18 = sadd.s32 1, %s2427_s18  }
  0xf6   : >> { %v2087_v8 = vld [vmem:[%s2521_s5 + $0xa0] sm:$0xff]  ;;  %v2088_v17 = vld [vmem:[%s2521_s5 + $0xa8] sm:$0xff]  ;;  %p744_p12 = scmp.ge.s32.totalorder %s747_s18, 4  }
  0xf7   : > { %s2269_s28 = sshll.u32 (%p744_p12), %s2415_s12, 10  ;;  %s1817_s4 = sshll.u32 (%p744_p12), %s149_s6, 4  ;;  %s3321_s4 = int_to_ptr.vmem [resolvable:$true] %s1817_s4 }
  0xf8   : >> { %v2698_v32 = vld [vmem:[%s2695_s25] sm:$0xff]  ;;  %v2701_v33 = vld [vmem:[%s2695_s25 + $0x8] sm:$0xff]  ;;  %v2704_v34 = vld [vmem:[%s2695_s25 + $0x10] sm:$0xf]  ;;  %s3317_s3 = scalar_lea.hbm (%p744_p12), %s3372_s2, %s2269_s28  ;;  %s3325_s7 = scalar_lea.sflag (%p744_p12), [#allocation6], %s147_s23 }
  0xf9   : >> { %v2707_v35 = vld [vmem:[%s2695_s25 + $0x78] sm:$0xff]  ;;  %v2710_v36 = vld [vmem:[%s2695_s25 + $0x80] sm:$0xff]  ;;  %v761_v37 = vmul.f32 %v759_v25, %v2698_v32  ;;  %v762_v38 = vmul.f32 %v760_v26, %v2701_v33  ;;  %v786_v40 = vrot.slane %v2698_v32, 1  ;;  %v787_v41 = vrot.slane %v2701_v33, 1  ;;  %v2718_v42 = vld [vmem:[%s2695_s25 + $0x88] sm:$0xf] }
  0xfa   : >> { %v2721_v43 = vld [vmem:[%s2695_s25 + $0xf0] sm:$0xff]  ;;  %v2724_v44 = vld [vmem:[%s2695_s25 + $0xf8] sm:$0xff]  ;;  %v768_v45 = vmul.f32 %v2077_v27, %v2707_v35  ;;  %v769_v46 = vmul.f32 %v2078_v28, %v2710_v36  ;;  %v789_v47 = vrot.slane %v2704_v34, 1  ;;  %v803_v48 = vrot.slane %v2707_v35, 1  ;;  %v2736_v54 = vld [vmem:[%s2695_s25 + $0x100] sm:$0xf] }
  0xfb   : >> { %v775_v49 = vmul.f32 %v2079_v29, %v2721_v43  ;;  %v776_v50 = vmul.f32 %v2080_v30, %v2724_v44  ;;  %v788_v51 = vsel %vm785_vm2, %v786_v40, %v787_v41  ;;  %v804_v53 = vrot.slane %v2710_v36, 1  ;;  %v2089_v25 = vld [vmem:[%s2521_s5 + $0x230] sm:$0xff]  ;;  %v2090_v26 = vld [vmem:[%s2521_s5 + $0x238] sm:$0xff]  ;;  %s2434_s12 = smov (%p744_p12), [#allocation5]  }
  0xfc   : >> { %v770_v55 = vadd.f32 %v768_v45, %v761_v37  ;;  %v771_v56 = vadd.f32 %v769_v46, %v762_v38  ;;  %v790_v57 = vsel %vm785_vm2, %v787_v41, %v789_v47  ;;  %v793_v58 = vmul.f32 %v2081_v31, %v788_v51  ;;  %v2091_v41 = vld [vmem:[%s2521_s5 + $0x3c0] sm:$0xff]  ;;  %v2092_v45 = vld [vmem:[%s2521_s5 + $0x3c8] sm:$0xff]  ;;  %s2345_s8 = sshll.u32 (%p744_p12), %s2434_s12, 4  ;;  %s2346_s8 = int_to_ptr.vmem [resolvable:$false] %s2345_s8 }
  0xfd   : >> { %v794_v59 = vmul.f32 %v2082_v39, %v790_v57  ;;  %v805_v61 = vsel %vm785_vm2, %v803_v48, %v804_v53  ;;  %v806_v62 = vrot.slane %v2718_v42, 1  ;;  %v820_v63 = vrot.slane %v2721_v43, 1  ;;  %s2347_s15 = scalar_lea.vmem (%p744_p12), %s2346_s8, 2048  ;;  %p2348_p2 = scmp.lt.s32.totalorder (%p744_p12), %s3321_s4, %s2346_s8 }
  0xfe   : >> { %v777_v0 = vadd.f32 %v775_v49, %v770_v55  ;;  %v778_v1 = vadd.f32 %v776_v50, %v771_v56  ;;  %v810_v2 = vmul.f32 %v2083_v52, %v805_v61  ;;  %v821_v4 = vrot.slane %v2724_v44, 1  ;;  %v2093_v55 = vld [vmem:[%s2521_s5 + $0xf0] sm:$0xff] }
  0xff   : >> { %v807_v5 = vsel %vm785_vm2, %v804_v53, %v806_v62  ;;  %v823_v7 = vrot.slane %v2736_v54, 1  ;;  %v835_v9 = vrot.slane %v2698_v32, 2  ;;  %v836_v10 = vrot.slane %v2701_v33, 2  ;;  %v2094_v62 = vld [vmem:[%s2521_s5 + $0xf8] sm:$0xff] }
 0x100   : >> { %v795_v11 = vadd.f32 %v793_v58, %v777_v0  ;;  %v796_v12 = vadd.f32 %v794_v59, %v778_v1  ;;  %v811_v13 = vmul.f32 %v2084_v60, %v807_v5  ;;  %v822_v14 = vsel %vm785_vm2, %v820_v63, %v821_v4  ;;  %v2095_v1 = vld [vmem:[%s2521_s5 + $0x280] sm:$0xff] }
 0x101   : >> { %v824_v15 = vsel %vm785_vm2, %v821_v4, %v823_v7  ;;  %v827_v16 = vmul.f32 %v2085_v3, %v822_v14  ;;  %v837_v18 = vsel %vm834_vm3, %v835_v9, %v836_v10  ;;  %v838_v19 = vrot.slane %v2704_v34, 2  ;;  %v2096_v7 = vld [vmem:[%s2521_s5 + $0x288] sm:$0xff] }
 0x102   : >> { %v812_v20 = vadd.f32 %v810_v2, %v795_v11  ;;  %v813_v21 = vadd.f32 %v811_v13, %v796_v12  ;;  %v828_v22 = vmul.f32 %v2086_v6, %v824_v15  ;;  %v842_v23 = vmul.f32 %v2087_v8, %v837_v18  ;;  %v2097_v11 = vld [vmem:[%s2521_s5 + $0x410] sm:$0xff] }
 0x103   : >> { %v839_v24 = vsel %vm834_vm3, %v836_v10, %v838_v19  ;;  %v849_v27 = vrot.slane %v2707_v35, 2  ;;  %v850_v28 = vrot.slane %v2710_v36, 2  ;;  %v852_v29 = vrot.slane %v2718_v42, 2  ;;  %v2098_v19 = vld [vmem:[%s2521_s5 + $0x418] sm:$0xff] }
 0x104   : >> { %v829_v30 = vadd.f32 %v827_v16, %v812_v20  ;;  %v830_v31 = vadd.f32 %v828_v22, %v813_v21  ;;  %v843_v37 = vmul.f32 %v2088_v17, %v839_v24  ;;  %v863_v38 = vrot.slane %v2721_v43, 2 }
 0x105   : >> { %v851_v39 = vsel %vm834_vm3, %v849_v27, %v850_v28  ;;  %v853_v40 = vsel %vm834_vm3, %v850_v28, %v852_v29  ;;  %v864_v46 = vrot.slane %v2724_v44, 2  ;;  %v866_v47 = vrot.slane %v2736_v54, 2  ;;  %v2100_v29 = vld [vmem:[%s2521_s5 + $0x148] sm:$0xff] }
 0x106   : >> { %v844_v48 = vadd.f32 %v842_v23, %v829_v30  ;;  %v845_v49 = vadd.f32 %v843_v37, %v830_v31  ;;  %v856_v50 = vmul.f32 %v2089_v25, %v851_v39  ;;  %v857_v51 = vmul.f32 %v2090_v26, %v853_v40  ;;  %v2099_v26 = vld [vmem:[%s2521_s5 + $0x140] sm:$0xff]  ;;  %v2101_v31 = vld [vmem:[%s2521_s5 + $0x2d0] sm:$0xff] }
 0x107   : >> { %v865_v52 = vsel %vm834_vm3, %v863_v38, %v864_v46  ;;  %v867_v53 = vsel %vm834_vm3, %v864_v46, %v866_v47  ;;  %v878_v56 = vrot.slane %v2698_v32, 3  ;;  %v879_v57 = vrot.slane %v2701_v33, 3 }
 0x108   : >> { %v858_v58 = vadd.f32 %v856_v50, %v844_v48  ;;  %v859_v59 = vadd.f32 %v857_v51, %v845_v49  ;;  %v870_v60 = vmul.f32 %v2091_v41, %v865_v52  ;;  %v871_v61 = vmul.f32 %v2092_v45, %v867_v53  ;;  %v2102_v41 = vld [vmem:[%s2521_s5 + $0x2d8] sm:$0xff]  ;;  %v2810_v48 = vld [vmem:[%s2695_s25 + $0x20] sm:$0xff]  ;;  %v2114_v49 = vld [vmem:[%s2521_s5 + $0x10] sm:$0xff] }
 0x109   : >> { %v880_v63 = vsel %vm877_vm4, %v878_v56, %v879_v57  ;;  %v881_v0 = vrot.slane %v2704_v34, 3  ;;  %v892_v2 = vrot.slane %v2707_v35, 3  ;;  %v893_v3 = vrot.slane %v2710_v36, 3  ;;  %v2803_v45 = vld [vmem:[%s2695_s25 + $0x18] sm:$0xff] }
 0x10a   : >> { %v872_v4 = vadd.f32 %v870_v60, %v858_v58  ;;  %v873_v5 = vadd.f32 %v871_v61, %v859_v59  ;;  %v885_v6 = vmul.f32 %v2093_v55, %v880_v63  ;;  %v895_v8 = vrot.slane %v2718_v42, 3  ;;  %v2115_v50 = vld [vmem:[%s2521_s5 + $0x18] sm:$0xff]  ;;  %v2104_v55 = vld [vmem:[%s2521_s5 + $0x468] sm:$0xff] }
 0x10b   : >> { %v882_v9 = vsel %vm877_vm4, %v879_v57, %v881_v0  ;;  %v894_v10 = vsel %vm877_vm4, %v892_v2, %v893_v3  ;;  %v906_v12 = vrot.slane %v2721_v43, 3  ;;  %v907_v13 = vrot.slane %v2724_v44, 3  ;;  %v2817_v57 = vld [vmem:[%s2695_s25 + $0x90] sm:$0xff]  ;;  %v2827_v63 = vld [vmem:[%s2695_s25 + $0x108] sm:$0xff] }
 0x10c   : >> { %v886_v14 = vmul.f32 %v2094_v62, %v882_v9  ;;  %v887_v15 = vadd.f32 %v885_v6, %v872_v4  ;;  %v896_v16 = vsel %vm877_vm4, %v893_v3, %v895_v8  ;;  %v899_v17 = vmul.f32 %v2095_v1, %v894_v10  ;;  %v2824_v62 = vld [vmem:[%s2695_s25 + $0x98] sm:$0xff]  ;;  %v2117_v0 = vld [vmem:[%s2521_s5 + $0x1a8] sm:$0xff]  ;;  %v2831_v2 = vld [vmem:[%s2695_s25 + $0x110] sm:$0xff] }
 0x10d   : >> { %v900_v18 = vmul.f32 %v2096_v7, %v896_v16  ;;  %v908_v20 = vsel %vm877_vm4, %v906_v12, %v907_v13  ;;  %v909_v21 = vrot.slane %v2736_v54, 3  ;;  %v921_v22 = vrot.slane %v2698_v32, 4  ;;  %v2119_v6 = vld [vmem:[%s2521_s5 + $0x338] sm:$0xff]  ;;  %v2840_v8 = vld [vmem:[%s2695_s25 + $0x28] sm:$0xf] }
 0x10e   : >> { %v888_v23 = vadd.f32 %v886_v14, %v873_v5  ;;  %v901_v24 = vadd.f32 %v899_v17, %v887_v15  ;;  %v913_v25 = vmul.f32 %v2097_v11, %v908_v20  ;;  %v922_v27 = vrot.slane %v2701_v33, 4  ;;  %v2118_v5 = vld [vmem:[%s2521_s5 + $0x330] sm:$0xff]  ;;  %v2120_v17 = vld [vmem:[%s2521_s5 + $0x60] sm:$0xff] }
 0x10f   : >> { %v910_v28 = vsel %vm877_vm4, %v907_v13, %v909_v21  ;;  %v924_v30 = vrot.slane %v2704_v34, 4  ;;  %v935_v32 = vrot.slane %v2707_v35, 4  ;;  %v936_v37 = vrot.slane %v2710_v36, 4  ;;  %v2103_v36 = vld [vmem:[%s2521_s5 + $0x460] sm:$0xff] }
 0x110   : >> { %v902_v38 = vadd.f32 %v900_v18, %v888_v23  ;;  %v914_v39 = vmul.f32 %v2098_v19, %v910_v28  ;;  %v915_v40 = vadd.f32 %v913_v25, %v901_v24  ;;  %v923_v33 = vsel %vm920_vm5, %v921_v22, %v922_v27  ;;  %v2844_v13 = vld [vmem:[%s2695_s25 + $0xa0] sm:$0xf]  ;;  %v2121_v22 = vld [vmem:[%s2521_s5 + $0x68] sm:$0xff] }
 0x111   : >> { %v925_v34 = vsel %vm920_vm5, %v922_v27, %v924_v30  ;;  %v928_v46 = vmul.f32 %v2099_v26, %v923_v33  ;;  %v937_v47 = vsel %vm920_vm5, %v935_v32, %v936_v37  ;;  %v938_v35 = vrot.slane %v2718_v42, 4  ;;  %v2116_v42 = vld [vmem:[%s2521_s5 + $0x1a0] sm:$0xff]  ;;  %v2122_v26 = vld [vmem:[%s2521_s5 + $0x1f0] sm:$0xff]  ;;  %v2123_v27 = vld [vmem:[%s2521_s5 + $0x1f8] sm:$0xff] }
 0x112   : >> { %v916_v51 = vadd.f32 %v914_v39, %v902_v38  ;;  %v929_v52 = vmul.f32 %v2100_v29, %v925_v34  ;;  %v942_v53 = vmul.f32 %v2101_v31, %v937_v47  ;;  %v949_v56 = vrot.slane %v2721_v43, 4  ;;  %v2862_v31 = vld [vmem:[%s2695_s25 + $0x118] sm:$0xf]  ;;  %v2124_v34 = vld [vmem:[%s2521_s5 + $0x380] sm:$0xff] }
 0x113   : >> { %v930_v58 = vadd.f32 %v928_v46, %v915_v40  ;;  %v939_v59 = vsel %vm920_vm5, %v936_v37, %v938_v35  ;;  %v950_v60 = vrot.slane %v2724_v44, 4  ;;  %v952_v61 = vrot.slane %v2736_v54, 4 }
 0x114   : >> { %v931_v1 = vadd.f32 %v929_v52, %v916_v51  ;;  %v943_v43 = vmul.f32 %v2102_v41, %v939_v59  ;;  %v974_v3 = vmul.f32 %v2114_v49, %v2803_v45  ;;  %v975_v4 = vmul.f32 %v2115_v50, %v2810_v48  ;;  %v2125_v50 = vld [vmem:[%s2521_s5 + $0x388] sm:$0xff]  ;;  %v2126_v59 = vld [vmem:[%s2521_s5 + $0xb0] sm:$0xff] }
 0x115   : >> { %v944_v44 = vadd.f32 %v942_v53, %v930_v58  ;;  %v951_v54 = vsel %vm920_vm5, %v949_v56, %v950_v60  ;;  %v953_v7 = vsel %vm920_vm5, %v950_v60, %v952_v61  ;;  %v981_v9 = vmul.f32 %v2116_v42, %v2817_v57  ;;  %v2127_v60 = vld [vmem:[%s2521_s5 + $0xb8] sm:$0xff] }
 0x116   : >> { %v945_v10 = vadd.f32 %v943_v43, %v931_v1  ;;  %v956_v11 = vmul.f32 %v2103_v36, %v951_v54  ;;  %v957_v12 = vmul.f32 %v2104_v55, %v953_v7  ;;  %v982_v14 = vmul.f32 %v2117_v0, %v2824_v62  ;;  %v2128_v43 = vld [vmem:[%s2521_s5 + $0x240] sm:$0xff] }
 0x117   : >> { %v988_v15 = vmul.f32 %v2118_v5, %v2827_v63  ;;  %v989_v16 = vmul.f32 %v2119_v6, %v2831_v2  ;;  %v998_v18 = vrot.slane %v2803_v45, 1  ;;  %v999_v19 = vrot.slane %v2810_v48, 1 }
 0x118   : >> { %v958_v20 = vadd.f32 %v956_v11, %v944_v44  ;;  %v959_v21 = vadd.f32 %v957_v12, %v945_v10  ;;  %v1001_v23 = vrot.slane %v2840_v8, 1  ;;  %v1015_v24 = vrot.slane %v2817_v57, 1  ;;  %v2129_v10 = vld [vmem:[%s2521_s5 + $0x248] sm:$0xff] }
 0x119   : >> { %v1000_v25 = vsel %vm785_vm2, %v998_v18, %v999_v19  ;;  %v1016_v28 = vrot.slane %v2824_v62, 1  ;;  %v1018_v29 = vrot.slane %v2844_v13, 1  ;;  %v1032_v30 = vrot.slane %v2827_v63, 1 }
 0x11a   : >> { %v976_v32 = vadd.f32 %v974_v3, %v958_v20  ;;  %v977_v37 = vadd.f32 %v975_v4, %v959_v21  ;;  %v1002_v38 = vsel %vm785_vm2, %v999_v19, %v1001_v23  ;;  %v1005_v39 = vmul.f32 %v2120_v17, %v1000_v25  ;;  %v2130_v19 = vld [vmem:[%s2521_s5 + $0x3d0] sm:$0xff]  ;;  %v2131_v20 = vld [vmem:[%s2521_s5 + $0x3d8] sm:$0xff] }
 0x11b   : >> { %v1006_v40 = vmul.f32 %v2121_v22, %v1002_v38  ;;  %v1017_v33 = vsel %vm785_vm2, %v1015_v24, %v1016_v28  ;;  %v1019_v41 = vsel %vm785_vm2, %v1016_v28, %v1018_v29  ;;  %v1033_v46 = vrot.slane %v2831_v2, 1 }
 0x11c   : >> { %v983_v47 = vadd.f32 %v981_v9, %v976_v32  ;;  %v984_v35 = vadd.f32 %v982_v14, %v977_v37  ;;  %v1022_v36 = vmul.f32 %v2122_v26, %v1017_v33  ;;  %v1023_v49 = vmul.f32 %v2123_v27, %v1019_v41  ;;  %v2133_v32 = vld [vmem:[%s2521_s5 + $0x108] sm:$0xff] }
 0x11d   : >> { %v1034_v51 = vsel %vm785_vm2, %v1032_v30, %v1033_v46  ;;  %v1035_v52 = vrot.slane %v2862_v31, 1  ;;  %v1046_v53 = vrot.slane %v2803_v45, 2  ;;  %v1047_v55 = vrot.slane %v2810_v48, 2  ;;  %v2132_v30 = vld [vmem:[%s2521_s5 + $0x100] sm:$0xff] }
 0x11e   : >> { %v990_v56 = vadd.f32 %v988_v15, %v983_v47  ;;  %v991_v42 = vadd.f32 %v989_v16, %v984_v35  ;;  %v1039_v58 = vmul.f32 %v2124_v34, %v1034_v51  ;;  %v1049_v61 = vrot.slane %v2840_v8, 2  ;;  %v2134_v47 = vld [vmem:[%s2521_s5 + $0x290] sm:$0xff]  ;;  %v2135_v35 = vld [vmem:[%s2521_s5 + $0x298] sm:$0xff] }
 0x11f   : >> { %v1036_v0 = vsel %vm785_vm2, %v1033_v46, %v1035_v52  ;;  %v1048_v1 = vsel %vm834_vm3, %v1046_v53, %v1047_v55  ;;  %v1060_v3 = vrot.slane %v2817_v57, 2  ;;  %v1061_v4 = vrot.slane %v2824_v62, 2 }
 0x120   : >> { %v1007_v5 = vadd.f32 %v1005_v39, %v990_v56  ;;  %v1008_v6 = vadd.f32 %v1006_v40, %v991_v42  ;;  %v1040_v44 = vmul.f32 %v2125_v50, %v1036_v0  ;;  %v1050_v54 = vsel %vm834_vm3, %v1047_v55, %v1049_v61  ;;  %v2136_v42 = vld [vmem:[%s2521_s5 + $0x420] sm:$0xff] }
 0x121   : >> { %v1053_v7 = vmul.f32 %v2126_v59, %v1048_v1  ;;  %v1054_v9 = vmul.f32 %v2127_v60, %v1050_v54  ;;  %v1062_v11 = vsel %vm834_vm3, %v1060_v3, %v1061_v4  ;;  %v1063_v12 = vrot.slane %v2844_v13, 2 }
 0x122   : >> { %v1024_v14 = vadd.f32 %v1022_v36, %v1007_v5  ;;  %v1025_v15 = vadd.f32 %v1023_v49, %v1008_v6  ;;  %v1067_v16 = vmul.f32 %v2128_v43, %v1062_v11  ;;  %v1074_v17 = vrot.slane %v2827_v63, 2  ;;  %v2137_v43 = vld [vmem:[%s2521_s5 + $0x428] sm:$0xff] }
 0x123   : >> { %v1064_v18 = vsel %vm834_vm3, %v1061_v4, %v1063_v12  ;;  %v1075_v21 = vrot.slane %v2831_v2, 2  ;;  %v1077_v22 = vrot.slane %v2862_v31, 2  ;;  %v1088_v23 = vrot.slane %v2803_v45, 3 }
 0x124   : >> { %v1041_v24 = vadd.f32 %v1039_v58, %v1024_v14  ;;  %v1042_v25 = vadd.f32 %v1040_v44, %v1025_v15  ;;  %v1068_v26 = vmul.f32 %v2129_v10, %v1064_v18  ;;  %v1089_v27 = vrot.slane %v2810_v48, 3  ;;  %v2139_v10 = vld [vmem:[%s2521_s5 + $0x158] sm:$0xff]  ;;  %v2140_v15 = vld [vmem:[%s2521_s5 + $0x2e0] sm:$0xff] }
 0x125   : >> { %v1076_v28 = vsel %vm834_vm3, %v1074_v17, %v1075_v21  ;;  %v1078_v29 = vsel %vm834_vm3, %v1075_v21, %v1077_v22  ;;  %v1091_v37 = vrot.slane %v2840_v8, 3  ;;  %v1102_v38 = vrot.slane %v2817_v57, 3  ;;  %v2153_v21 = vld [vmem:[%s2521_s5 + $0x20] sm:$0xff] }
 0x126   : >> { %v1055_v39 = vadd.f32 %v1053_v7, %v1041_v24  ;;  %v1056_v40 = vadd.f32 %v1054_v9, %v1042_v25  ;;  %v1081_v33 = vmul.f32 %v2130_v19, %v1076_v28  ;;  %v1082_v41 = vmul.f32 %v2131_v20, %v1078_v29  ;;  %v2138_v9 = vld [vmem:[%s2521_s5 + $0x150] sm:$0xff]  ;;  %v2933_v24 = vld [vmem:[%s2695_s25 + $0x38] sm:$0xff]  ;;  %v2936_v25 = vld [vmem:[%s2695_s25 + $0xa8] sm:$0xff] }
 0x127   : >> { %v1090_v34 = vsel %vm877_vm4, %v1088_v23, %v1089_v27  ;;  %v1092_v46 = vsel %vm877_vm4, %v1089_v27, %v1091_v37  ;;  %v1103_v36 = vrot.slane %v2824_v62, 3  ;;  %v1105_v49 = vrot.slane %v2844_v13, 3  ;;  %v2927_v20 = vld [vmem:[%s2695_s25 + $0x30] sm:$0xff] }
 0x128   : >> { %v1069_v50 = vadd.f32 %v1067_v16, %v1055_v39  ;;  %v1070_v51 = vadd.f32 %v1068_v26, %v1056_v40  ;;  %v1095_v52 = vmul.f32 %v2132_v30, %v1090_v34  ;;  %v1096_v53 = vmul.f32 %v2133_v32, %v1092_v46  ;;  %v2154_v26 = vld [vmem:[%s2521_s5 + $0x28] sm:$0xff]  ;;  %v2941_v32 = vld [vmem:[%s2695_s25 + $0xb0] sm:$0xff]  ;;  %v2143_v40 = vld [vmem:[%s2521_s5 + $0x478] sm:$0xff] }
 0x129   : >> { %v1104_v55 = vsel %vm877_vm4, %v1102_v38, %v1103_v36  ;;  %v1106_v56 = vsel %vm877_vm4, %v1103_v36, %v1105_v49  ;;  %v1116_v58 = vrot.slane %v2827_v63, 3  ;;  %v1117_v59 = vrot.slane %v2831_v2, 3  ;;  %v2155_v37 = vld [vmem:[%s2521_s5 + $0x1b0] sm:$0xff]  ;;  %v2156_v38 = vld [vmem:[%s2521_s5 + $0x1b8] sm:$0xff]  ;;  %v2951_v34 = vld [vmem:[%s2695_s25 + $0x120] sm:$0xff] }
 0x12a   : >> { %v1083_v60 = vadd.f32 %v1081_v33, %v1069_v50  ;;  %v1084_v61 = vadd.f32 %v1082_v41, %v1070_v51  ;;  %v1109_v0 = vmul.f32 %v2134_v47, %v1104_v55  ;;  %v1110_v1 = vmul.f32 %v2135_v35, %v1106_v56  ;;  %v2142_v39 = vld [vmem:[%s2521_s5 + $0x470] sm:$0xff]  ;;  %v2955_v36 = vld [vmem:[%s2695_s25 + $0x128] sm:$0xff]  ;;  %v2157_v50 = vld [vmem:[%s2521_s5 + $0x340] sm:$0xff] }
 0x12b   : >> { %v1118_v3 = vsel %vm877_vm4, %v1116_v58, %v1117_v59  ;;  %v1119_v4 = vrot.slane %v2862_v31, 3  ;;  %v1130_v5 = vrot.slane %v2803_v45, 4  ;;  %v1131_v6 = vrot.slane %v2810_v48, 4  ;;  %v2158_v51 = vld [vmem:[%s2521_s5 + $0x348] sm:$0xff] }
 0x12c   : >> { %v1097_v44 = vadd.f32 %v1095_v52, %v1083_v60  ;;  %v1098_v54 = vadd.f32 %v1096_v53, %v1084_v61  ;;  %v1123_v7 = vmul.f32 %v2136_v42, %v1118_v3  ;;  %v1133_v11 = vrot.slane %v2840_v8, 4  ;;  %v2141_v8 = vld [vmem:[%s2521_s5 + $0x2e8] sm:$0xff]  ;;  %v2968_v60 = vld [vmem:[%s2695_s25 + $0xb8] sm:$0xf] }
 0x12d   : >> { %v1120_v12 = vsel %vm877_vm4, %v1117_v59, %v1119_v4  ;;  %v1132_v14 = vsel %vm920_vm5, %v1130_v5, %v1131_v6  ;;  %v1144_v45 = vrot.slane %v2817_v57, 4  ;;  %v1145_v48 = vrot.slane %v2824_v62, 4 }
 0x12e   : >> { %v1111_v16 = vadd.f32 %v1109_v0, %v1097_v44  ;;  %v1112_v17 = vadd.f32 %v1110_v1, %v1098_v54  ;;  %v1124_v18 = vmul.f32 %v2137_v43, %v1120_v12  ;;  %v1134_v19 = vsel %vm920_vm5, %v1131_v6, %v1133_v11  ;;  %v2159_v1 = vld [vmem:[%s2521_s5 + $0x70] sm:$0xff]  ;;  %v2160_v6 = vld [vmem:[%s2521_s5 + $0x78] sm:$0xff] }
 0x12f   : >> { %v1137_v22 = vmul.f32 %v2138_v9, %v1132_v14  ;;  %v1138_v23 = vmul.f32 %v2139_v10, %v1134_v19  ;;  %v1146_v57 = vsel %vm920_vm5, %v1144_v45, %v1145_v48  ;;  %v1147_v62 = vrot.slane %v2844_v13, 4  ;;  %v2161_v9 = vld [vmem:[%s2521_s5 + $0x200] sm:$0xff]  ;;  %v2162_v10 = vld [vmem:[%s2521_s5 + $0x208] sm:$0xff] }
 0x130   : >> { %v1125_v27 = vadd.f32 %v1123_v7, %v1111_v16  ;;  %v1126_v28 = vadd.f32 %v1124_v18, %v1112_v17  ;;  %v1151_v29 = vmul.f32 %v2140_v15, %v1146_v57  ;;  %v1158_v30 = vrot.slane %v2827_v63, 4  ;;  %v2985_v15 = vld [vmem:[%s2695_s25 + $0x130] sm:$0xf] }
 0x131   : >> { %v1148_v13 = vsel %vm920_vm5, %v1145_v48, %v1147_v62  ;;  %v1159_v33 = vrot.slane %v2831_v2, 4  ;;  %v1161_v41 = vrot.slane %v2862_v31, 4  ;;  %v1183_v46 = vmul.f32 %v2153_v21, %v2927_v20  ;;  %v2963_v31 = vld [vmem:[%s2695_s25 + $0x40] sm:$0xf]  ;;  %v2163_v21 = vld [vmem:[%s2521_s5 + $0x390] sm:$0xff] }
 0x132   : >> { %v1139_v63 = vadd.f32 %v1137_v22, %v1125_v27  ;;  %v1140_v47 = vadd.f32 %v1138_v23, %v1126_v28  ;;  %v1152_v35 = vmul.f32 %v2141_v8, %v1148_v13  ;;  %v1184_v49 = vmul.f32 %v2154_v26, %v2933_v24  ;;  %v2164_v27 = vld [vmem:[%s2521_s5 + $0x398] sm:$0xff] }
 0x133   : >> { %v1160_v52 = vsel %vm920_vm5, %v1158_v30, %v1159_v33  ;;  %v1162_v2 = vsel %vm920_vm5, %v1159_v33, %v1161_v41  ;;  %v1190_v53 = vmul.f32 %v2155_v37, %v2936_v25  ;;  %v1191_v55 = vmul.f32 %v2156_v38, %v2941_v32  ;;  %v2166_v33 = vld [vmem:[%s2521_s5 + $0xc8] sm:$0xff] }
 0x134   : >> { %v1153_v56 = vadd.f32 %v1151_v29, %v1139_v63  ;;  %v1154_v42 = vadd.f32 %v1152_v35, %v1140_v47  ;;  %v1165_v58 = vmul.f32 %v2142_v39, %v1160_v52  ;;  %v1166_v59 = vmul.f32 %v2143_v40, %v1162_v2  ;;  %v2165_v40 = vld [vmem:[%s2521_s5 + $0xc0] sm:$0xff]  ;;  %v2167_v47 = vld [vmem:[%s2521_s5 + $0x250] sm:$0xff] }
 0x135   : >> { %v1197_v61 = vmul.f32 %v2157_v50, %v2951_v34  ;;  %v1198_v0 = vmul.f32 %v2158_v51, %v2955_v36  ;;  %v1207_v43 = vrot.slane %v2927_v20, 1  ;;  %v1208_v3 = vrot.slane %v2933_v24, 1 }
 0x136   : >> { %v1167_v4 = vadd.f32 %v1165_v58, %v1153_v56  ;;  %v1168_v5 = vadd.f32 %v1166_v59, %v1154_v42  ;;  %v1210_v44 = vrot.slane %v2963_v31, 1  ;;  %v1224_v54 = vrot.slane %v2936_v25, 1  ;;  %v2168_v56 = vld [vmem:[%s2521_s5 + $0x258] sm:$0xff] }
 0x137   : >> { %v1209_v7 = vsel %vm785_vm2, %v1207_v43, %v1208_v3  ;;  %v1225_v11 = vrot.slane %v2941_v32, 1  ;;  %v1227_v12 = vrot.slane %v2968_v60, 1  ;;  %v1241_v14 = vrot.slane %v2951_v34, 1 }
 0x138   : >> { %v1185_v45 = vadd.f32 %v1183_v46, %v1167_v4  ;;  %v1186_v48 = vadd.f32 %v1184_v49, %v1168_v5  ;;  %v1211_v16 = vsel %vm785_vm2, %v1208_v3, %v1210_v44  ;;  %v1214_v17 = vmul.f32 %v2159_v1, %v1209_v7  ;;  %v2169_v3 = vld [vmem:[%s2521_s5 + $0x3e0] sm:$0xff]  ;;  %v2170_v4 = vld [vmem:[%s2521_s5 + $0x3e8] sm:$0xff] }
 0x139   : >> { %v1215_v18 = vmul.f32 %v2160_v6, %v1211_v16  ;;  %v1226_v19 = vsel %vm785_vm2, %v1224_v54, %v1225_v11  ;;  %v1228_v8 = vsel %vm785_vm2, %v1225_v11, %v1227_v12  ;;  %v1242_v22 = vrot.slane %v2955_v36, 1 }
 0x13a   : >> { %v1192_v23 = vadd.f32 %v1190_v53, %v1185_v45  ;;  %v1193_v57 = vadd.f32 %v1191_v55, %v1186_v48  ;;  %v1231_v62 = vmul.f32 %v2161_v9, %v1226_v19  ;;  %v1232_v26 = vmul.f32 %v2162_v10, %v1228_v8  ;;  %v2172_v45 = vld [vmem:[%s2521_s5 + $0x118] sm:$0xff] }
 0x13b   : >> { %v1243_v28 = vsel %vm785_vm2, %v1241_v14, %v1242_v22  ;;  %v1244_v29 = vrot.slane %v2985_v15, 1  ;;  %v1255_v30 = vrot.slane %v2927_v20, 2  ;;  %v1256_v37 = vrot.slane %v2933_v24, 2  ;;  %v2171_v14 = vld [vmem:[%s2521_s5 + $0x110] sm:$0xff] }
 0x13c   : >> { %v1199_v38 = vadd.f32 %v1197_v61, %v1192_v23  ;;  %v1200_v13 = vadd.f32 %v1198_v0, %v1193_v57  ;;  %v1248_v39 = vmul.f32 %v2163_v21, %v1243_v28  ;;  %v1258_v41 = vrot.slane %v2963_v31, 2  ;;  %v2173_v23 = vld [vmem:[%s2521_s5 + $0x2a0] sm:$0xff]  ;;  %v2174_v57 = vld [vmem:[%s2521_s5 + $0x2a8] sm:$0xff] }
 0x13d   : >> { %v1245_v46 = vsel %vm785_vm2, %v1242_v22, %v1244_v29  ;;  %v1257_v63 = vsel %vm834_vm3, %v1255_v30, %v1256_v37  ;;  %v1269_v35 = vrot.slane %v2936_v25, 2  ;;  %v1270_v49 = vrot.slane %v2941_v32, 2 }
 0x13e   : >> { %v1216_v50 = vadd.f32 %v1214_v17, %v1199_v38  ;;  %v1217_v51 = vadd.f32 %v1215_v18, %v1200_v13  ;;  %v1249_v52 = vmul.f32 %v2164_v27, %v1245_v46  ;;  %v1259_v2 = vsel %vm834_vm3, %v1256_v37, %v1258_v41  ;;  %v2175_v13 = vld [vmem:[%s2521_s5 + $0x430] sm:$0xff] }
 0x13f   : >> { %v1262_v53 = vmul.f32 %v2165_v40, %v1257_v63  ;;  %v1263_v55 = vmul.f32 %v2166_v33, %v1259_v2  ;;  %v1271_v42 = vsel %vm834_vm3, %v1269_v35, %v1270_v49  ;;  %v1272_v58 = vrot.slane %v2968_v60, 2 }
 0x140   : >> { %v1233_v59 = vadd.f32 %v1231_v62, %v1216_v50  ;;  %v1234_v61 = vadd.f32 %v1232_v26, %v1217_v51  ;;  %v1276_v0 = vmul.f32 %v2167_v47, %v1271_v42  ;;  %v1283_v1 = vrot.slane %v2951_v34, 2  ;;  %v2176_v47 = vld [vmem:[%s2521_s5 + $0x438] sm:$0xff] }
 0x141   : >> { %v1273_v43 = vsel %vm834_vm3, %v1270_v49, %v1272_v58  ;;  %v1284_v5 = vrot.slane %v2955_v36, 2  ;;  %v1286_v6 = vrot.slane %v2985_v15, 2  ;;  %v1297_v44 = vrot.slane %v2927_v20, 3 }
 0x142   : >> { %v1250_v54 = vadd.f32 %v1248_v39, %v1233_v59  ;;  %v1251_v7 = vadd.f32 %v1249_v52, %v1234_v61  ;;  %v1277_v9 = vmul.f32 %v2168_v56, %v1273_v43  ;;  %v1298_v10 = vrot.slane %v2933_v24, 3  ;;  %v2178_v56 = vld [vmem:[%s2521_s5 + $0x168] sm:$0xff]  ;;  %v2179_v61 = vld [vmem:[%s2521_s5 + $0x2f0] sm:$0xff] }
 0x143   : >> { %v1285_v11 = vsel %vm834_vm3, %v1283_v1, %v1284_v5  ;;  %v1287_v12 = vsel %vm834_vm3, %v1284_v5, %v1286_v6  ;;  %v1300_v48 = vrot.slane %v2963_v31, 3  ;;  %v1311_v16 = vrot.slane %v2936_v25, 3  ;;  %v2192_v5 = vld [vmem:[%s2521_s5 + $0x30] sm:$0xff] }
 0x144   : >> { %v1264_v17 = vadd.f32 %v1262_v53, %v1250_v54  ;;  %v1265_v18 = vadd.f32 %v1263_v55, %v1251_v7  ;;  %v1290_v19 = vmul.f32 %v2169_v3, %v1285_v11  ;;  %v1291_v8 = vmul.f32 %v2170_v4, %v1287_v12  ;;  %v2177_v55 = vld [vmem:[%s2521_s5 + $0x160] sm:$0xff]  ;;  %v3050_v4 = vld [vmem:[%s2695_s25 + $0x48] sm:$0xff]  ;;  %v3056_v54 = vld [vmem:[%s2695_s25 + $0x50] sm:$0xff] }
 0x145   : >> { %v1299_v21 = vsel %vm877_vm4, %v1297_v44, %v1298_v10  ;;  %v1301_v22 = vsel %vm877_vm4, %v1298_v10, %v1300_v48  ;;  %v1312_v62 = vrot.slane %v2941_v32, 3  ;;  %v1314_v26 = vrot.slane %v2968_v60, 3  ;;  %v3059_v7 = vld [vmem:[%s2695_s25 + $0xc0] sm:$0xff] }
 0x146   : >> { %v1278_v27 = vadd.f32 %v1276_v0, %v1264_v17  ;;  %v1279_v28 = vadd.f32 %v1277_v9, %v1265_v18  ;;  %v1304_v29 = vmul.f32 %v2171_v14, %v1299_v21  ;;  %v1305_v30 = vmul.f32 %v2172_v45, %v1301_v22  ;;  %v2193_v9 = vld [vmem:[%s2521_s5 + $0x38] sm:$0xff]  ;;  %v3064_v45 = vld [vmem:[%s2695_s25 + $0xc8] sm:$0xff]  ;;  %v2194_v48 = vld [vmem:[%s2521_s5 + $0x1c0] sm:$0xff] }
 0x147   : >> { %v1313_v37 = vsel %vm877_vm4, %v1311_v16, %v1312_v62  ;;  %v1315_v38 = vsel %vm877_vm4, %v1312_v62, %v1314_v26  ;;  %v1325_v39 = vrot.slane %v2951_v34, 3  ;;  %v1326_v40 = vrot.slane %v2955_v36, 3  ;;  %v2195_v16 = vld [vmem:[%s2521_s5 + $0x1c8] sm:$0xff]  ;;  %v2181_v17 = vld [vmem:[%s2521_s5 + $0x480] sm:$0xff]  ;;  %v3074_v21 = vld [vmem:[%s2695_s25 + $0x138] sm:$0xff] }
 0x148   : >> { %v1292_v33 = vadd.f32 %v1290_v19, %v1278_v27  ;;  %v1293_v41 = vadd.f32 %v1291_v8, %v1279_v28  ;;  %v1318_v46 = vmul.f32 %v2173_v23, %v1313_v37  ;;  %v1319_v63 = vmul.f32 %v2174_v57, %v1315_v38  ;;  %v2182_v18 = vld [vmem:[%s2521_s5 + $0x488] sm:$0xff]  ;;  %v3078_v62 = vld [vmem:[%s2695_s25 + $0x140] sm:$0xff]  ;;  %v2196_v27 = vld [vmem:[%s2521_s5 + $0x350] sm:$0xff] }
 0x149   : >> { %v1327_v35 = vsel %vm877_vm4, %v1325_v39, %v1326_v40  ;;  %v1328_v49 = vrot.slane %v2985_v15, 3  ;;  %v1339_v50 = vrot.slane %v2927_v20, 4  ;;  %v1340_v51 = vrot.slane %v2933_v24, 4  ;;  %v2197_v28 = vld [vmem:[%s2521_s5 + $0x358] sm:$0xff] }
 0x14a   : >> { %v1306_v52 = vadd.f32 %v1304_v29, %v1292_v33  ;;  %v1307_v2 = vadd.f32 %v1305_v30, %v1293_v41  ;;  %v1332_v53 = vmul.f32 %v2175_v13, %v1327_v35  ;;  %v1342_v42 = vrot.slane %v2963_v31, 4  ;;  %v2180_v31 = vld [vmem:[%s2521_s5 + $0x2f8] sm:$0xff]  ;;  %v3091_v33 = vld [vmem:[%s2695_s25 + $0xd0] sm:$0xf] }
 0x14b   : >> { %v1329_v58 = vsel %vm877_vm4, %v1326_v40, %v1328_v49  ;;  %v1341_v59 = vsel %vm920_vm5, %v1339_v50, %v1340_v51  ;;  %v1353_v20 = vrot.slane %v2936_v25, 4  ;;  %v1354_v24 = vrot.slane %v2941_v32, 4 }
 0x14c   : >> { %v1320_v0 = vadd.f32 %v1318_v46, %v1306_v52  ;;  %v1321_v1 = vadd.f32 %v1319_v63, %v1307_v2  ;;  %v1333_v43 = vmul.f32 %v2176_v47, %v1329_v58  ;;  %v1343_v3 = vsel %vm920_vm5, %v1340_v51, %v1342_v42  ;;  %v2198_v63 = vld [vmem:[%s2521_s5 + $0x80] sm:$0xff]  ;;  %v2199_v51 = vld [vmem:[%s2521_s5 + $0x88] sm:$0xff] }
 0x14d   : >> { %v1346_v6 = vmul.f32 %v2177_v55, %v1341_v59  ;;  %v1347_v44 = vmul.f32 %v2178_v56, %v1343_v3  ;;  %v1355_v25 = vsel %vm920_vm5, %v1353_v20, %v1354_v24  ;;  %v1356_v32 = vrot.slane %v2968_v60, 4  ;;  %v2200_v55 = vld [vmem:[%s2521_s5 + $0x210] sm:$0xff]  ;;  %v2201_v56 = vld [vmem:[%s2521_s5 + $0x218] sm:$0xff] }
 0x14e   : >> { %v1334_v10 = vadd.f32 %v1332_v53, %v1320_v0  ;;  %v1335_v11 = vadd.f32 %v1333_v43, %v1321_v1  ;;  %v1360_v12 = vmul.f32 %v2179_v61, %v1355_v25  ;;  %v1367_v14 = vrot.slane %v2951_v34, 4  ;;  %v3108_v61 = vld [vmem:[%s2695_s25 + $0x148] sm:$0xf] }
 0x14f   : >> { %v1357_v60 = vsel %vm920_vm5, %v1354_v24, %v1356_v32  ;;  %v1368_v19 = vrot.slane %v2955_v36, 4  ;;  %v1370_v8 = vrot.slane %v2985_v15, 4  ;;  %v1392_v22 = vmul.f32 %v2192_v5, %v3050_v4  ;;  %v3086_v15 = vld [vmem:[%s2695_s25 + $0x58] sm:$0xf]  ;;  %v2202_v5 = vld [vmem:[%s2521_s5 + $0x3a0] sm:$0xff] }
 0x150   : >> { %v1348_v34 = vadd.f32 %v1346_v6, %v1334_v10  ;;  %v1349_v23 = vadd.f32 %v1347_v44, %v1335_v11  ;;  %v1361_v57 = vmul.f32 %v2180_v31, %v1357_v60  ;;  %v1393_v26 = vmul.f32 %v2193_v9, %v3056_v54  ;;  %v2203_v10 = vld [vmem:[%s2521_s5 + $0x3a8] sm:$0xff] }
 0x151   : >> { %v1369_v29 = vsel %vm920_vm5, %v1367_v14, %v1368_v19  ;;  %v1371_v36 = vsel %vm920_vm5, %v1368_v19, %v1370_v8  ;;  %v1399_v30 = vmul.f32 %v2194_v48, %v3059_v7  ;;  %v1400_v37 = vmul.f32 %v2195_v16, %v3064_v45  ;;  %v2205_v19 = vld [vmem:[%s2521_s5 + $0xd8] sm:$0xff] }
 0x152   : >> { %v1362_v38 = vadd.f32 %v1360_v12, %v1348_v34  ;;  %v1363_v13 = vadd.f32 %v1361_v57, %v1349_v23  ;;  %v1374_v39 = vmul.f32 %v2181_v17, %v1369_v29  ;;  %v1375_v40 = vmul.f32 %v2182_v18, %v1371_v36  ;;  %v2204_v18 = vld [vmem:[%s2521_s5 + $0xd0] sm:$0xff]  ;;  %v2206_v23 = vld [vmem:[%s2521_s5 + $0x260] sm:$0xff] }
 0x153   : >> { %v1406_v41 = vmul.f32 %v2196_v27, %v3074_v21  ;;  %v1407_v46 = vmul.f32 %v2197_v28, %v3078_v62  ;;  %v1416_v47 = vrot.slane %v3050_v4, 1  ;;  %v1417_v35 = vrot.slane %v3056_v54, 1 }
 0x154   : >> { %v1376_v49 = vadd.f32 %v1374_v39, %v1362_v38  ;;  %v1377_v50 = vadd.f32 %v1375_v40, %v1363_v13  ;;  %v1419_v52 = vrot.slane %v3086_v15, 1  ;;  %v1433_v2 = vrot.slane %v3059_v7, 1  ;;  %v2207_v38 = vld [vmem:[%s2521_s5 + $0x268] sm:$0xff] }
 0x155   : >> { %v1418_v53 = vsel %vm785_vm2, %v1416_v47, %v1417_v35  ;;  %v1434_v42 = vrot.slane %v3064_v45, 1  ;;  %v1436_v58 = vrot.slane %v3091_v33, 1  ;;  %v1450_v59 = vrot.slane %v3074_v21, 1 }
 0x156   : >> { %v1394_v20 = vadd.f32 %v1392_v22, %v1376_v49  ;;  %v1395_v24 = vadd.f32 %v1393_v26, %v1377_v50  ;;  %v1420_v0 = vsel %vm785_vm2, %v1417_v35, %v1419_v52  ;;  %v1423_v1 = vmul.f32 %v2198_v63, %v1418_v53  ;;  %v2208_v35 = vld [vmem:[%s2521_s5 + $0x3f0] sm:$0xff]  ;;  %v2209_v49 = vld [vmem:[%s2521_s5 + $0x3f8] sm:$0xff] }
 0x157   : >> { %v1424_v43 = vmul.f32 %v2199_v51, %v1420_v0  ;;  %v1435_v3 = vsel %vm785_vm2, %v1433_v2, %v1434_v42  ;;  %v1437_v31 = vsel %vm785_vm2, %v1434_v42, %v1436_v58  ;;  %v1451_v6 = vrot.slane %v3078_v62, 1 }
 0x158   : >> { %v1401_v44 = vadd.f32 %v1399_v30, %v1394_v20  ;;  %v1402_v25 = vadd.f32 %v1400_v37, %v1395_v24  ;;  %v1440_v32 = vmul.f32 %v2200_v55, %v1435_v3  ;;  %v1441_v9 = vmul.f32 %v2201_v56, %v1437_v31  ;;  %v2211_v20 = vld [vmem:[%s2521_s5 + $0x128] sm:$0xff] }
 0x159   : >> { %v1452_v11 = vsel %vm785_vm2, %v1450_v59, %v1451_v6  ;;  %v1453_v12 = vrot.slane %v3108_v61, 1  ;;  %v1464_v14 = vrot.slane %v3050_v4, 2  ;;  %v1465_v48 = vrot.slane %v3056_v54, 2  ;;  %v2210_v59 = vld [vmem:[%s2521_s5 + $0x120] sm:$0xff] }
 0x15a   : >> { %v1408_v16 = vadd.f32 %v1406_v41, %v1401_v44  ;;  %v1409_v60 = vadd.f32 %v1407_v46, %v1402_v25  ;;  %v1457_v17 = vmul.f32 %v2202_v5, %v1452_v11  ;;  %v1467_v8 = vrot.slane %v3086_v15, 2  ;;  %v2212_v44 = vld [vmem:[%s2521_s5 + $0x2b0] sm:$0xff]  ;;  %v2213_v25 = vld [vmem:[%s2521_s5 + $0x2b8] sm:$0xff] }
 0x15b   : >> { %v1454_v22 = vsel %vm785_vm2, %v1451_v6, %v1453_v12  ;;  %v1466_v34 = vsel %vm834_vm3, %v1464_v14, %v1465_v48  ;;  %v1478_v57 = vrot.slane %v3059_v7, 2  ;;  %v1479_v26 = vrot.slane %v3064_v45, 2 }
 0x15c   : >> { %v1425_v27 = vadd.f32 %v1423_v1, %v1408_v16  ;;  %v1426_v28 = vadd.f32 %v1424_v43, %v1409_v60  ;;  %v1458_v29 = vmul.f32 %v2203_v10, %v1454_v22  ;;  %v1468_v36 = vsel %vm834_vm3, %v1465_v48, %v1467_v8  ;;  %v2214_v60 = vld [vmem:[%s2521_s5 + $0x440] sm:$0xff] }
 0x15d   : >> { %v1471_v30 = vmul.f32 %v2204_v18, %v1466_v34  ;;  %v1472_v37 = vmul.f32 %v2205_v19, %v1468_v36  ;;  %v1480_v13 = vsel %vm834_vm3, %v1478_v57, %v1479_v26  ;;  %v1481_v39 = vrot.slane %v3091_v33, 2 }
 0x15e   : >> { %v1442_v40 = vadd.f32 %v1440_v32, %v1425_v27  ;;  %v1443_v41 = vadd.f32 %v1441_v9, %v1426_v28  ;;  %v1485_v46 = vmul.f32 %v2206_v23, %v1480_v13  ;;  %v1492_v63 = vrot.slane %v3074_v21, 2  ;;  %v2215_v23 = vld [vmem:[%s2521_s5 + $0x448] sm:$0xff] }
 0x15f   : >> { %v1482_v47 = vsel %vm834_vm3, %v1479_v26, %v1481_v39  ;;  %v1493_v50 = vrot.slane %v3078_v62, 2  ;;  %v1495_v51 = vrot.slane %v3108_v61, 2  ;;  %v1506_v52 = vrot.slane %v3050_v4, 3 }
 0x160   : >> { %v1459_v2 = vadd.f32 %v1457_v17, %v1442_v40  ;;  %v1460_v53 = vadd.f32 %v1458_v29, %v1443_v41  ;;  %v1486_v55 = vmul.f32 %v2207_v38, %v1482_v47  ;;  %v1507_v56 = vrot.slane %v3056_v54, 3  ;;  %v2217_v38 = vld [vmem:[%s2521_s5 + $0x178] sm:$0xff]  ;;  %v2218_v41 = vld [vmem:[%s2521_s5 + $0x300] sm:$0xff] }
 0x161   : >> { %v1494_v42 = vsel %vm834_vm3, %v1492_v63, %v1493_v50  ;;  %v1496_v58 = vsel %vm834_vm3, %v1493_v50, %v1495_v51  ;;  %v1509_v24 = vrot.slane %v3086_v15, 3  ;;  %v1520_v0 = vrot.slane %v3059_v7, 3  ;;  %v2231_v50 = vld [vmem:[%s2521_s5 + $0x40] sm:$0xff] }
 0x162   : >> { %v1473_v1 = vadd.f32 %v1471_v30, %v1459_v2  ;;  %v1474_v43 = vadd.f32 %v1472_v37, %v1460_v53  ;;  %v1499_v3 = vmul.f32 %v2208_v35, %v1494_v42  ;;  %v1500_v31 = vmul.f32 %v2209_v49, %v1496_v58  ;;  %v2216_v37 = vld [vmem:[%s2521_s5 + $0x170] sm:$0xff]  ;;  %v3173_v49 = vld [vmem:[%s2695_s25 + $0x60] sm:$0xff]  ;;  %v3179_v2 = vld [vmem:[%s2695_s25 + $0x68] sm:$0xff] }
 0x163   : >> { %v1508_v5 = vsel %vm877_vm4, %v1506_v52, %v1507_v56  ;;  %v1510_v6 = vsel %vm877_vm4, %v1507_v56, %v1509_v24  ;;  %v1521_v32 = vrot.slane %v3064_v45, 3  ;;  %v1523_v9 = vrot.slane %v3091_v33, 3  ;;  %v3182_v53 = vld [vmem:[%s2695_s25 + $0xd8] sm:$0xff]  ;;  %v2233_v24 = vld [vmem:[%s2521_s5 + $0x1d0] sm:$0xff] }
 0x164   : >> { %v1487_v10 = vadd.f32 %v1485_v46, %v1473_v1  ;;  %v1488_v11 = vadd.f32 %v1486_v55, %v1474_v43  ;;  %v1513_v12 = vmul.f32 %v2210_v59, %v1508_v5  ;;  %v1514_v14 = vmul.f32 %v2211_v20, %v1510_v6  ;;  %v2232_v55 = vld [vmem:[%s2521_s5 + $0x48] sm:$0xff]  ;;  %v3187_v20 = vld [vmem:[%s2695_s25 + $0xe0] sm:$0xff]  ;;  %v2220_v1 = vld [vmem:[%s2521_s5 + $0x490] sm:$0xff] }
 0x165   : >> { %v1522_v48 = vsel %vm877_vm4, %v1520_v0, %v1521_v32  ;;  %v1524_v16 = vsel %vm877_vm4, %v1521_v32, %v1523_v9  ;;  %v1534_v17 = vrot.slane %v3074_v21, 3  ;;  %v1535_v18 = vrot.slane %v3078_v62, 3  ;;  %v2234_v0 = vld [vmem:[%s2521_s5 + $0x1d8] sm:$0xff]  ;;  %v3197_v5 = vld [vmem:[%s2695_s25 + $0x150] sm:$0xff] }
 0x166   : >> { %v1501_v19 = vadd.f32 %v1499_v3, %v1487_v10  ;;  %v1502_v8 = vadd.f32 %v1500_v31, %v1488_v11  ;;  %v1527_v22 = vmul.f32 %v2212_v44, %v1522_v48  ;;  %v1528_v34 = vmul.f32 %v2213_v25, %v1524_v16  ;;  %v2221_v43 = vld [vmem:[%s2521_s5 + $0x498] sm:$0xff]  ;;  %v2235_v10 = vld [vmem:[%s2521_s5 + $0x360] sm:$0xff]  ;;  %v2236_v11 = vld [vmem:[%s2521_s5 + $0x368] sm:$0xff] }
 0x167   : >> { %v1536_v57 = vsel %vm877_vm4, %v1534_v17, %v1535_v18  ;;  %v1537_v26 = vrot.slane %v3108_v61, 3  ;;  %v1548_v27 = vrot.slane %v3050_v4, 4  ;;  %v1549_v28 = vrot.slane %v3056_v54, 4  ;;  %v3201_v32 = vld [vmem:[%s2695_s25 + $0x158] sm:$0xff] }
 0x168   : >> { %v1515_v29 = vadd.f32 %v1513_v12, %v1501_v19  ;;  %v1516_v36 = vadd.f32 %v1514_v14, %v1502_v8  ;;  %v1541_v30 = vmul.f32 %v2214_v60, %v1536_v57  ;;  %v1551_v13 = vrot.slane %v3086_v15, 4  ;;  %v2219_v15 = vld [vmem:[%s2521_s5 + $0x308] sm:$0xff] }
 0x169   : >> { %v1538_v39 = vsel %vm877_vm4, %v1535_v18, %v1537_v26  ;;  %v1550_v40 = vsel %vm920_vm5, %v1548_v27, %v1549_v28  ;;  %v1562_v4 = vrot.slane %v3059_v7, 4  ;;  %v1563_v54 = vrot.slane %v3064_v45, 4  ;;  %v3214_v19 = vld [vmem:[%s2695_s25 + $0xe8] sm:$0xf] }
 0x16a   : >> { %v1529_v46 = vadd.f32 %v1527_v22, %v1515_v29  ;;  %v1530_v63 = vadd.f32 %v1528_v34, %v1516_v36  ;;  %v1542_v47 = vmul.f32 %v2215_v23, %v1538_v39  ;;  %v1552_v35 = vsel %vm920_vm5, %v1549_v28, %v1551_v13  ;;  %v2237_v34 = vld [vmem:[%s2521_s5 + $0x90] sm:$0xff]  ;;  %v2238_v28 = vld [vmem:[%s2521_s5 + $0x98] sm:$0xff] }
 0x16b   : >> { %v1555_v51 = vmul.f32 %v2216_v37, %v1550_v40  ;;  %v1556_v52 = vmul.f32 %v2217_v38, %v1552_v35  ;;  %v1564_v7 = vsel %vm920_vm5, %v1562_v4, %v1563_v54  ;;  %v1565_v45 = vrot.slane %v3091_v33, 4  ;;  %v2239_v37 = vld [vmem:[%s2521_s5 + $0x220] sm:$0xff]  ;;  %v2240_v38 = vld [vmem:[%s2521_s5 + $0x228] sm:$0xff] }
 0x16c   : >> { %v1543_v56 = vadd.f32 %v1541_v30, %v1529_v46  ;;  %v1544_v42 = vadd.f32 %v1542_v47, %v1530_v63  ;;  %v1569_v58 = vmul.f32 %v2218_v41, %v1564_v7  ;;  %v1576_v59 = vrot.slane %v3074_v21, 4  ;;  %v3231_v41 = vld [vmem:[%s2695_s25 + $0x160] sm:$0xf] }
 0x16d   : >> { %v1566_v33 = vsel %vm920_vm5, %v1563_v54, %v1565_v45  ;;  %v1577_v3 = vrot.slane %v3078_v62, 4  ;;  %v1579_v31 = vrot.slane %v3108_v61, 4  ;;  %v1601_v6 = vmul.f32 %v2231_v50, %v3173_v49  ;;  %v3209_v61 = vld [vmem:[%s2695_s25 + $0x70] sm:$0xf] }
 0x16e   : >> { %v1557_v21 = vadd.f32 %v1555_v51, %v1543_v56  ;;  %v1558_v44 = vadd.f32 %v1556_v52, %v1544_v42  ;;  %v1570_v25 = vmul.f32 %v2219_v15, %v1566_v33  ;;  %v1602_v9 = vmul.f32 %v2232_v55, %v3179_v2  ;;  %v2241_v50 = vld [vmem:[%s2521_s5 + $0x3b0] sm:$0xff]  ;;  %v2242_v56 = vld [vmem:[%s2521_s5 + $0x3b8] sm:$0xff] }
 0x16f   : >> { %v1578_v12 = vsel %vm920_vm5, %v1576_v59, %v1577_v3  ;;  %v1580_v62 = vsel %vm920_vm5, %v1577_v3, %v1579_v31  ;;  %v1608_v14 = vmul.f32 %v2233_v24, %v3182_v53  ;;  %v1609_v48 = vmul.f32 %v2234_v0, %v3187_v20  ;;  %v2244_v3 = vld [vmem:[%s2521_s5 + $0xe8] sm:$0xff] }
 0x170   : >> { %v1571_v16 = vadd.f32 %v1569_v58, %v1557_v21  ;;  %v1572_v60 = vadd.f32 %v1570_v25, %v1558_v44  ;;  %v1583_v17 = vmul.f32 %v2220_v1, %v1578_v12  ;;  %v1584_v18 = vmul.f32 %v2221_v43, %v1580_v62  ;;  %v2243_v43 = vld [vmem:[%s2521_s5 + $0xe0] sm:$0xff]  ;;  %v2245_v44 = vld [vmem:[%s2521_s5 + $0x270] sm:$0xff] }
 0x171   : >> { %v1615_v8 = vmul.f32 %v2235_v10, %v3197_v5  ;;  %v1616_v22 = vmul.f32 %v2236_v11, %v3201_v32  ;;  %v1625_v23 = vrot.slane %v3173_v49, 1  ;;  %v1626_v57 = vrot.slane %v3179_v2, 1 }
 0x172   : >> { %v1585_v26 = vadd.f32 %v1583_v17, %v1571_v16  ;;  %v1586_v27 = vadd.f32 %v1584_v18, %v1572_v60  ;;  %v1628_v29 = vrot.slane %v3209_v61, 1  ;;  %v1642_v36 = vrot.slane %v3182_v53, 1  ;;  %v2246_v16 = vld [vmem:[%s2521_s5 + $0x278] sm:$0xff] }
 0x173   : >> { %v1627_v30 = vsel %vm785_vm2, %v1625_v23, %v1626_v57  ;;  %v1643_v13 = vrot.slane %v3187_v20, 1  ;;  %v1645_v39 = vrot.slane %v3214_v19, 1  ;;  %v1659_v40 = vrot.slane %v3197_v5, 1 }
 0x174   : >> { %v1603_v4 = vadd.f32 %v1601_v6, %v1585_v26  ;;  %v1604_v54 = vadd.f32 %v1602_v9, %v1586_v27  ;;  %v1629_v46 = vsel %vm785_vm2, %v1626_v57, %v1628_v29  ;;  %v1632_v63 = vmul.f32 %v2237_v34, %v1627_v30  ;;  %v2247_v57 = vld [vmem:[%s2521_s5 + $0x400] sm:$0xff]  ;;  %v2248_v26 = vld [vmem:[%s2521_s5 + $0x408] sm:$0xff] }
 0x175   : >> { %v1633_v47 = vmul.f32 %v2238_v28, %v1629_v46  ;;  %v1644_v35 = vsel %vm785_vm2, %v1642_v36, %v1643_v13  ;;  %v1646_v15 = vsel %vm785_vm2, %v1643_v13, %v1645_v39  ;;  %v1660_v51 = vrot.slane %v3201_v32, 1 }
 0x176   : >> { %v1610_v52 = vadd.f32 %v1608_v14, %v1603_v4  ;;  %v1611_v7 = vadd.f32 %v1609_v48, %v1604_v54  ;;  %v1649_v45 = vmul.f32 %v2239_v37, %v1644_v35  ;;  %v1650_v55 = vmul.f32 %v2240_v38, %v1646_v15  ;;  %v2250_v4 = vld [vmem:[%s2521_s5 + $0x138] sm:$0xff] }
 0x177   : >> { %v1661_v42 = vsel %vm785_vm2, %v1659_v40, %v1660_v51  ;;  %v1662_v58 = vrot.slane %v3231_v41, 1  ;;  %v1673_v59 = vrot.slane %v3173_v49, 2  ;;  %v1674_v24 = vrot.slane %v3179_v2, 2  ;;  %v2249_v40 = vld [vmem:[%s2521_s5 + $0x130] sm:$0xff] }
 0x178   : >> { %v1617_v0 = vadd.f32 %v1615_v8, %v1610_v52  ;;  %v1618_v33 = vadd.f32 %v1616_v22, %v1611_v7  ;;  %v1666_v1 = vmul.f32 %v2241_v50, %v1661_v42  ;;  %v1676_v31 = vrot.slane %v3209_v61, 2  ;;  %v2251_v52 = vld [vmem:[%s2521_s5 + $0x2c0] sm:$0xff]  ;;  %v2252_v7 = vld [vmem:[%s2521_s5 + $0x2c8] sm:$0xff] }
 0x179   : >> { %v1663_v6 = vsel %vm785_vm2, %v1660_v51, %v1662_v58  ;;  %v1675_v21 = vsel %vm834_vm3, %v1673_v59, %v1674_v24  ;;  %v1687_v25 = vrot.slane %v3182_v53, 2  ;;  %v1688_v9 = vrot.slane %v3187_v20, 2 }
 0x17a   : >> { %v1634_v10 = vadd.f32 %v1632_v63, %v1617_v0  ;;  %v1635_v11 = vadd.f32 %v1633_v47, %v1618_v33  ;;  %v1667_v12 = vmul.f32 %v2242_v56, %v1663_v6  ;;  %v1677_v62 = vsel %vm834_vm3, %v1674_v24, %v1676_v31  ;;  %v2253_v33 = vld [vmem:[%s2521_s5 + $0x450] sm:$0xff] }
 0x17b   : >> { %v1680_v14 = vmul.f32 %v2243_v43, %v1675_v21  ;;  %v1681_v48 = vmul.f32 %v2244_v3, %v1677_v62  ;;  %v1689_v60 = vsel %vm834_vm3, %v1687_v25, %v1688_v9  ;;  %v1690_v17 = vrot.slane %v3214_v19, 2 }
 0x17c   : >> { %v1651_v18 = vadd.f32 %v1649_v45, %v1634_v10  ;;  %v1652_v8 = vadd.f32 %v1650_v55, %v1635_v11  ;;  %v1694_v22 = vmul.f32 %v2245_v44, %v1689_v60  ;;  %v1701_v34 = vrot.slane %v3197_v5, 2  ;;  %v2254_v44 = vld [vmem:[%s2521_s5 + $0x458] sm:$0xff] }
 0x17d   : >> { %v1691_v23 = vsel %vm834_vm3, %v1688_v9, %v1690_v17  ;;  %v1702_v27 = vrot.slane %v3201_v32, 2  ;;  %v1704_v28 = vrot.slane %v3231_v41, 2  ;;  %v1715_v29 = vrot.slane %v3173_v49, 3 }
 0x17e   : >> { %v1668_v36 = vadd.f32 %v1666_v1, %v1651_v18  ;;  %v1669_v30 = vadd.f32 %v1667_v12, %v1652_v8  ;;  %v1695_v37 = vmul.f32 %v2246_v16, %v1691_v23  ;;  %v1716_v38 = vrot.slane %v3179_v2, 3  ;;  %v2256_v16 = vld [vmem:[%s2521_s5 + $0x188] sm:$0xff]  ;;  %v2257_v8 = vld [vmem:[%s2521_s5 + $0x310] sm:$0xff] }
 0x17f   : >> { %v1703_v13 = vsel %vm834_vm3, %v1701_v34, %v1702_v27  ;;  %v1705_v39 = vsel %vm834_vm3, %v1702_v27, %v1704_v28  ;;  %v1718_v54 = vrot.slane %v3209_v61, 3  ;;  %v1729_v46 = vrot.slane %v3182_v53, 3 }
 0x180   : >> { %v1682_v63 = vadd.f32 %v1680_v14, %v1668_v36  ;;  %v1683_v47 = vadd.f32 %v1681_v48, %v1669_v30  ;;  %v1708_v35 = vmul.f32 %v2247_v57, %v1703_v13  ;;  %v1709_v15 = vmul.f32 %v2248_v26, %v1705_v39  ;;  %v2255_v48 = vld [vmem:[%s2521_s5 + $0x180] sm:$0xff]  ;;  %v2260_v13 = vld [vmem:[%s2521_s5 + $0x4a8] sm:$0xff] }
 0x181   : >> { %v1717_v50 = vsel %vm877_vm4, %v1715_v29, %v1716_v38  ;;  %v1719_v51 = vsel %vm877_vm4, %v1716_v38, %v1718_v54  ;;  %v1730_v45 = vrot.slane %v3187_v20, 3  ;;  %v1732_v55 = vrot.slane %v3214_v19, 3  ;;  %v2259_v38 = vld [vmem:[%s2521_s5 + $0x4a0] sm:$0xff] }
 0x182   : >> { %v1696_v56 = vadd.f32 %v1694_v22, %v1682_v63  ;;  %v1697_v42 = vadd.f32 %v1695_v37, %v1683_v47  ;;  %v1722_v58 = vmul.f32 %v2249_v40, %v1717_v50  ;;  %v1723_v59 = vmul.f32 %v2250_v4, %v1719_v51 }
 0x183   : >> { %v1731_v24 = vsel %vm877_vm4, %v1729_v46, %v1730_v45  ;;  %v1733_v0 = vsel %vm877_vm4, %v1730_v45, %v1732_v55  ;;  %v1743_v1 = vrot.slane %v3197_v5, 3  ;;  %v1744_v43 = vrot.slane %v3201_v32, 3 }
 0x184   : >> { %v1710_v3 = vadd.f32 %v1708_v35, %v1696_v56  ;;  %v1711_v31 = vadd.f32 %v1709_v15, %v1697_v42  ;;  %v1736_v6 = vmul.f32 %v2251_v52, %v1731_v24  ;;  %v1737_v21 = vmul.f32 %v2252_v7, %v1733_v0 }
 0x185   : >> { %v1745_v25 = vsel %vm877_vm4, %v1743_v1, %v1744_v43  ;;  %v1746_v9 = vrot.slane %v3231_v41, 3  ;;  %v1757_v10 = vrot.slane %v3173_v49, 4  ;;  %v1758_v11 = vrot.slane %v3179_v2, 4 }
 0x186   : >> { %v1724_v12 = vadd.f32 %v1722_v58, %v1710_v3  ;;  %v1725_v62 = vadd.f32 %v1723_v59, %v1711_v31  ;;  %v1750_v14 = vmul.f32 %v2253_v33, %v1745_v25  ;;  %v1760_v60 = vrot.slane %v3209_v61, 4  ;;  %v2258_v61 = vld [vmem:[%s2521_s5 + $0x318] sm:$0xff]  ;;  %s2341_s5 = scalar_lea.vmem (%p744_p12), %s3321_s4, 1024 }
 0x187   : >> { %v1747_v17 = vsel %vm877_vm4, %v1744_v43, %v1746_v9  ;;  %v1759_v18 = vsel %vm920_vm5, %v1757_v10, %v1758_v11  ;;  %v1771_v22 = vrot.slane %v3182_v53, 4  ;;  %v1772_v49 = vrot.slane %v3187_v20, 4  ;;  %p2342_p13 = scmp.ne.s32.totalorder (%p744_p12), %s3321_s4, %s2341_s5  ;;  %p2349_p3 = scmp.lt.s32.totalorder (%p744_p12), %s2347_s15, %s2341_s5 }
 0x188   : >> { %v1738_v2 = vadd.f32 %v1736_v6, %v1724_v12  ;;  %v1739_v34 = vadd.f32 %v1737_v21, %v1725_v62  ;;  %v1751_v23 = vmul.f32 %v2254_v44, %v1747_v17  ;;  %v1761_v57 = vsel %vm920_vm5, %v1758_v11, %v1760_v60 }
 0x189   : >> { %v1764_v26 = vmul.f32 %v2255_v48, %v1759_v18  ;;  %v1765_v27 = vmul.f32 %v2256_v16, %v1761_v57  ;;  %v1773_v28 = vsel %vm920_vm5, %v1771_v22, %v1772_v49  ;;  %v1774_v29 = vrot.slane %v3214_v19, 4  ;;  %p2343_p0 = pnand (%p744_p12), %p2342_p13, %p2492_p4  ;;  %p2350_p5 = por (%p744_p12), %p2349_p3, %p2348_p2 }
 0x18a   : >> { %v1752_v36 = vadd.f32 %v1750_v14, %v1738_v2  ;;  %v1753_v30 = vadd.f32 %v1751_v23, %v1739_v34  ;;  %v1778_v53 = vmul.f32 %v2257_v8, %v1773_v28  ;;  %v1785_v37 = vrot.slane %v3197_v5, 4 }
 0x18b   : >> { %v1775_v20 = vsel %vm920_vm5, %v1772_v49, %v1774_v29  ;;  %v1786_v39 = vrot.slane %v3201_v32, 4  ;;  %v1788_v40 = vrot.slane %v3231_v41, 4  ;;  %p2344_p1 = pneg (%p744_p12), %p2343_p0 }
 0x18c   : >> { %v1766_v4 = vadd.f32 %v1764_v26, %v1752_v36  ;;  %v1767_v54 = vadd.f32 %v1765_v27, %v1753_v30  ;;  %v1779_v46 = vmul.f32 %v2258_v61, %v1775_v20 }
 0x18d   : >> { %v1787_v19 = vsel %vm920_vm5, %v1785_v37, %v1786_v39  ;;  %v1789_v63 = vsel %vm920_vm5, %v1786_v39, %v1788_v40  ;;  %p2351_p6 = pnand (%p744_p12), %p2350_p5, %p2344_p1 }
 0x18e   : >> { %v1780_v47 = vadd.f32 %v1778_v53, %v1766_v4  ;;  %v1781_v35 = vadd.f32 %v1779_v46, %v1767_v54  ;;  %v1792_v5 = vmul.f32 %v2259_v38, %v1787_v19  ;;  %v1793_v15 = vmul.f32 %v2260_v13, %v1789_v63  ;;  %746 = sbr.rel (!%p744_p12) target bundleno = 242 (0xf2), region = 289 }
 0x190   : >> { %v1794_v50 = vadd.f32 %v1792_v5, %v1780_v47  ;;  %v1795_v51 = vadd.f32 %v1793_v15, %v1781_v35 }
 0x192   : >> { %1798 = vst.msk [vmem:[%s1797_s27] sm:$0xff] %vm374_vm0, %v1794_v50  ;;  %1799 = vst.msk [vmem:[%s1797_s27 + $0x8] sm:$0xff] %vm374_vm0, %v1795_v51 }
 0x193   : > { %2354 = shalt.err (!%p2351_p6)
}
 0x194   : > { %s2355_s23 = scalar_lea.hbm %s3317_s3, 1024  ;;  %s2359_s16 = scalar_lea.hbm %s3372_s2, 2048 }
 0x195   : > { %p2356_p7 = scmp.ne.s32.totalorder %s3317_s3, %s2355_s23  ;;  %p2360_p11 = scmp.lt.s32.totalorder %s3317_s3, %s3372_s2 }
 0x196   : > { %p2361_p12 = scmp.lt.s32.totalorder %s2359_s16, %s2355_s23 }
 0x197   : > { %p2357_p9 = pnand %p2356_p7, %p2492_p4 }
 0x198   : > { %p2362_p13 = por %p2361_p12, %p2360_p11 }
 0x199   : > { %p2358_p10 = pneg %p2357_p9 }
 0x19b   : > { %p2363_p0 = pnand %p2362_p13, %p2358_p10 }
 0x19d   : > { %2366 = shalt.err (!%p2363_p0)
}
 0x19e   : > { %s2435_s25 = smov 128   ;;  %s2436_s26 = smov 8  }
 0x19f   : > { %2271 = dma.vmem_to_hbm [thread:$0]  (%p2492_p4), %s3321_s4, 1024, %s3317_s3, %s3325_s7, %s2435_s25, %s2435_s25, %s2436_s26  }
 0x1a0 PF: > { %p2277_p1 = scmp.ge.s32.totalorder %s2423_s14, 2  ;;  %s1832_s27 = sand.u32 1, %s2403_s9  }
 0x1a1   : > { %s1833_s28 = scalar_lea.sflag [#allocation6], %s1832_s27 }
 0x1a2   : > { %p2274_p2 = pnand %p2277_p1, %p2499_p8 }
 0x1a4   : > { %p2275_p3 = pneg %p2274_p2 }
 0x1a6   : > { %2398 = dma.done.wait (%p2275_p3), %s1833_s28, 1024  }
 0x1a7   : > { %2400 = vsyncadd (%p2275_p3), %s1833_s28, 4294966272  ;;  %s15_s14 = sadd.s32 1, %s2423_s14   ;;  %s3375_s9 = smov %s2407_s10 }
 0x1a8   : > { %p12_p5 = scmp.ge.s32.totalorder %s15_s14, 4   ;;  %s3376_s10 = smov %s2411_s11 }
 0x1a9   : > { %s3377_s11 = smov %s2505_s22  ;;  %s3378_s12 = smov %s2419_s13 }
 0x1aa   : > { %s3379_s13 = smov %s3381_s17  ;;  %14 = sbr.rel (!%p12_p5) target bundleno = 4 (0x4), region = 300 }
 0x1af   :  { %1838 = vsyncpa [#allocation6], 1 }
 0x1b0   :  { %1840 = vsyncpa [#allocation6 + $0x1], 1 }
 0x1b1   :  { %1841 = vsyncmov [#allocation4] }
 0x1b4   :  { %s1842_s19 = vpop.sfrf %1841 }
 0x1b5   :  { %p2267_p4 = scmp.ne.s32.totalorder %s1842_s19, 0 }
 0x1b7   :  { %1846 = shalt.err (%p2267_p4)  }
 0x1b8   :  { %1848 = vsyncmov [#allocation4 + $0x1] }
 0x1bb   :  { %s1849_s21 = vpop.sfrf %1848 }
 0x1bc   :  { %p2268_p8 = scmp.ne.s32.totalorder %s1849_s21, 0 }
 0x1be   :  { %1853 = shalt.err (%p2268_p8)  }

</bundles_post_ra>
